<compile_context>
chip_gen: v7x
topology: tpu7x:2x2x1
jax: 0.10.0
libtpu: 0.0.40
codegen_flags: <defaults>
</compile_context>

<pallas_src>
import functools

import jax
import jax.numpy as jnp
from jax.experimental import pallas as pl
from jax.experimental.pallas import tpu as pltpu

LANE = 128


def _round_up(n, m):
    return -(-n // m) * m


# ------------------------------ Pallas kernel -------------------------------

def _fc_decoder_kernel(x_ref,
                       w0_ref, b0_ref, w1_ref, b1_ref, w2_ref, b2_ref,
                       w3_ref, b3_ref, w4_ref, b4_ref,
                       o_ref):
    """Whole FCDecoder on one row-tile of the batch.

    x_ref : (tb, E)                           activation row tile (f32)
    w*    : (in_pad, out_pad)  bf16           BN-folded, pre-transposed weights
    b*    : (1, out_pad)       f32            BN-folded biases
    o_ref : (tb, out_pad_last) f32            sigmoid outputs (lane-padded)
    """
    hidden = ((w0_ref, b0_ref), (w1_ref, b1_ref),
              (w2_ref, b2_ref), (w3_ref, b3_ref))

    x = x_ref[...].astype(jnp.bfloat16)
    for w_ref, b_ref in hidden:                       # unrolled at trace time
        h = jnp.dot(x, w_ref[...], preferred_element_type=jnp.float32)
        h = jnp.maximum(h + b_ref[...], 0.0)          # bias + ReLU (f32)
        x = h.astype(jnp.bfloat16)                    # bf16 chain for the MXU
        # dropout(p=0.1): eval-mode identity

    y = jnp.dot(x, w4_ref[...], preferred_element_type=jnp.float32) + b4_ref[...]
    # exp + approx reciprocal both issue on the EUP slot (off the VALU path).
    o_ref[...] = pl.reciprocal(1.0 + jnp.exp(-y), approx=True)


# ------------------------------ host wrapper --------------------------------

def fc_decoder_forward(x, flat_params, *, n_features, row_tile=512):
    """Fused FCDecoder forward.  x: (B, E) f32 -> (B, n_features) f32."""
    B, E = x.shape
    n_pad = flat_params[-1].shape[-1]                 # lane-padded output width

    # Row tile: full batch if tiny; otherwise >= 2 grid steps (v7x megacore),
    # capped at row_tile (default 512, a 256-multiple for v6e/v7x MXUs).
    if B <= 8:
        tb = B
    else:
        tb = max(8, min(row_tile, _round_up(-(-B // 2), 8)))
    grid = (pl.cdiv(B, tb),)                          # ragged tail handled by Pallas

    def _const_spec(a):
        # Weights / biases: full-array block, constant index -> resident.
        return pl.BlockSpec(a.shape, lambda i: (0, 0))

    out = pl.pallas_call(
        _fc_decoder_kernel,
        grid=grid,
        in_specs=[pl.BlockSpec((tb, E), lambda i: (i, 0))]
                 + [_const_spec(a) for a in flat_params],
        out_specs=pl.BlockSpec((tb, n_pad), lambda i: (i, 0)),
        out_shape=jax.ShapeDtypeStruct((B, n_pad), jnp.float32),
        compiler_params=pltpu.CompilerParams(
            dimension_semantics=("parallel",),        # shard rows across v7x TCs
            vmem_limit_bytes=32 * 1024 * 1024),
    )(x, *flat_params)

    return out[:, :n_features]                        # drop lane padding


# ------------------------------- parameters ---------------------------------

def init_raw_params(key, embedding_size, n_features, eps=1e-5):
    """Deterministic 'PyTorch-like' params. Linear weights stored pre-transposed
    (in_features, out_features); eval-mode BatchNorm as per-feature scale/shift."""
    sizes = [embedding_size, embedding_size * 10, embedding_size * 20,
             embedding_size * 20, embedding_size * 30, n_features]
    n_layers = len(sizes) - 1
    keys = jax.random.split(key, 6 * n_layers)

    raw = {}
    for i, (fin, fout) in enumerate(zip(sizes[:-1], sizes[1:])):
        kw, kb, kg, kbeta, km, kv = keys[6 * i: 6 * i + 6]
        bound = 1.0 / float(fin) ** 0.5
        raw[f"w{i}"] = jax.random.uniform(kw, (fin, fout), jnp.float32, -bound, bound)
        raw[f"b{i}"] = jax.random.uniform(kb, (fout,), jnp.float32, -bound, bound)
        if i < n_layers - 1:                          # hidden layers carry BatchNorm1d
            gamma = 1.0 + 0.1 * jax.random.normal(kg, (fout,), jnp.float32)
            beta = 0.1 * jax.random.normal(kbeta, (fout,), jnp.float32)
            mean = 0.1 * jax.random.normal(km, (fout,), jnp.float32)
            var = jax.random.uniform(kv, (fout,), jnp.float32, 0.5, 1.5)
            s = gamma * jax.lax.rsqrt(var + eps)
            raw[f"s{i}"] = s
            raw[f"t{i}"] = beta - mean * s
    return raw


def prepare_params(raw):
    """Fold eval-mode BN of layer i into layer i+1, zero-pad every layer width
    to a lane (128) multiple, cast weights to bf16 (biases stay f32)."""
    w = [raw[f"w{i}"] for i in range(5)]
    b = [raw[f"b{i}"] for i in range(5)]
    for i in range(4):                                # BN(i) -> layer i+1
        s, t = raw[f"s{i}"], raw[f"t{i}"]
        b[i + 1] = b[i + 1] + t @ w[i + 1]            # b' = b + t @ W  (original W)
        w[i + 1] = w[i + 1] * s[:, None]              # W' = diag(s) @ W

    flat, pad_in = [], 0
    for i in range(5):
        fout = w[i].shape[1]
        fout_p = _round_up(fout, LANE)
        wi = jnp.pad(w[i], ((0, pad_in), (0, fout_p - fout)))
        bi = jnp.pad(b[i], (0, fout_p - fout)).reshape(1, fout_p)
        flat.append(wi.astype(jnp.bfloat16))
        flat.append(bi.astype(jnp.float32))
        pad_in = fout_p - fout                        # next layer's extra input rows
    return flat


def fc_decoder_reference(x, raw):
    """Pure-JAX f32 reference with the original (unfolded, unpadded) params."""
    for i in range(4):
        h = jnp.maximum(x @ raw[f"w{i}"] + raw[f"b{i}"], 0.0)
        x = h * raw[f"s{i}"] + raw[f"t{i}"]
    y = x @ raw["w4"] + raw["b4"]
    return 1.0 / (1.0 + jnp.exp(-y))


# ---------------------------------- main -------------------------------------

if __name__ == "__main__":
    embedding_size = 32
    n_features = 16
    batch = 8

    key = jax.random.PRNGKey(0)
    k_param, k_x = jax.random.split(key)

    raw = init_raw_params(k_param, embedding_size, n_features)
    flat = prepare_params(raw)
    x = jax.random.normal(k_x, (batch, embedding_size), jnp.float32)

    fwd = jax.jit(functools.partial(fc_decoder_forward, n_features=n_features))
    out = fwd(x, flat)
    jax.block_until_ready(out)

    assert out.shape == (batch, n_features)
    ref = fc_decoder_reference(x, raw)
    assert bool(jnp.all((out > -1e-5) & (out < 1.0 + 1e-5)))
    err = float(jnp.max(jnp.abs(out - ref)))
    # bf16 weights/activations (f32 accumulation) vs f32 reference.
    assert err < 2e-2, f"max abs diff = {err}"

    print("KERNEL_OK")
</pallas_src>

<mosaic_0001>
module attributes {stable_mosaic.version = 11 : i64} {
  func.func @_fc_decoder_kernel(%arg0: i32, %arg1: memref<8x32xf32, #tpu.memory_space<vmem>>, %arg2: memref<32x384xbf16, #tpu.memory_space<vmem>>, %arg3: memref<1x384xf32, #tpu.memory_space<vmem>>, %arg4: memref<384x640xbf16, #tpu.memory_space<vmem>>, %arg5: memref<1x640xf32, #tpu.memory_space<vmem>>, %arg6: memref<640x640xbf16, #tpu.memory_space<vmem>>, %arg7: memref<1x640xf32, #tpu.memory_space<vmem>>, %arg8: memref<640x1024xbf16, #tpu.memory_space<vmem>>, %arg9: memref<1x1024xf32, #tpu.memory_space<vmem>>, %arg10: memref<1024x128xbf16, #tpu.memory_space<vmem>>, %arg11: memref<1x128xf32, #tpu.memory_space<vmem>>, %arg12: memref<8x128xf32, #tpu.memory_space<vmem>>) attributes {dimension_semantics = [#tpu.dimension_semantics<parallel>], iteration_bounds = array<i64: 1>, scalar_prefetch = 0 : i64, scratch_operands = 0 : i64, tpu.core_type = #tpu.core_type<tc>, window_params = [{transform_indices = @transform_0, window_bounds = array<i64: 8, 32>}, {pipeline_mode = #tpu.pipeline_mode<synchronous>, transform_indices = @transform_1, window_bounds = array<i64: 32, 384>}, {pipeline_mode = #tpu.pipeline_mode<synchronous>, transform_indices = @transform_2, window_bounds = array<i64: 1, 384>}, {pipeline_mode = #tpu.pipeline_mode<synchronous>, transform_indices = @transform_3, window_bounds = array<i64: 384, 640>}, {pipeline_mode = #tpu.pipeline_mode<synchronous>, transform_indices = @transform_4, window_bounds = array<i64: 1, 640>}, {pipeline_mode = #tpu.pipeline_mode<synchronous>, transform_indices = @transform_5, window_bounds = array<i64: 640, 640>}, {pipeline_mode = #tpu.pipeline_mode<synchronous>, transform_indices = @transform_6, window_bounds = array<i64: 1, 640>}, {pipeline_mode = #tpu.pipeline_mode<synchronous>, transform_indices = @transform_7, window_bounds = array<i64: 640, 1024>}, {pipeline_mode = #tpu.pipeline_mode<synchronous>, transform_indices = @transform_8, window_bounds = array<i64: 1, 1024>}, {pipeline_mode = #tpu.pipeline_mode<synchronous>, transform_indices = @transform_9, window_bounds = array<i64: 1024, 128>}, {pipeline_mode = #tpu.pipeline_mode<synchronous>, transform_indices = @transform_10, window_bounds = array<i64: 1, 128>}, {transform_indices = @transform_11, window_bounds = array<i64: 8, 128>}]} {
    %c0 = arith.constant 0 : index
    %c0_0 = arith.constant 0 : index
    %0 = vector.load %arg1[%c0, %c0_0] : memref<8x32xf32, #tpu.memory_space<vmem>>, vector<8x32xf32>
    %1 = arith.truncf %0 : vector<8x32xf32> to vector<8x32xbf16>
    %c0_1 = arith.constant 0 : index
    %c0_2 = arith.constant 0 : index
    %2 = vector.load %arg2[%c0_1, %c0_2] : memref<32x384xbf16, #tpu.memory_space<vmem>>, vector<32x384xbf16>
    %cst = arith.constant dense<0.000000e+00> : vector<8x384xf32>
    %3 = tpu.matmul %1, %2, %cst {dimension_numbers = #tpu.dot_dimension_numbers<[1], [0], [0], [1], [0, 0, 1, 1], [], []>} : vector<8x32xbf16>, vector<32x384xbf16>, vector<8x384xf32> -> vector<8x384xf32>
    %c0_3 = arith.constant 0 : index
    %c0_4 = arith.constant 0 : index
    %4 = vector.load %arg3[%c0_3, %c0_4] : memref<1x384xf32, #tpu.memory_space<vmem>>, vector<1x384xf32>
    %5 = vector.broadcast %4 : vector<1x384xf32> to vector<8x384xf32>
    %6 = arith.addf %3, %5 : vector<8x384xf32>
    %cst_5 = arith.constant 0.000000e+00 : f32
    %7 = vector.broadcast %cst_5 : f32 to vector<8x384xf32>
    %8 = arith.maximumf %6, %7 : vector<8x384xf32>
    %9 = arith.truncf %8 : vector<8x384xf32> to vector<8x384xbf16>
    %c0_6 = arith.constant 0 : index
    %c0_7 = arith.constant 0 : index
    %10 = vector.load %arg4[%c0_6, %c0_7] : memref<384x640xbf16, #tpu.memory_space<vmem>>, vector<384x640xbf16>
    %cst_8 = arith.constant dense<0.000000e+00> : vector<8x640xf32>
    %11 = tpu.matmul %9, %10, %cst_8 {dimension_numbers = #tpu.dot_dimension_numbers<[1], [0], [0], [1], [0, 0, 1, 1], [], []>} : vector<8x384xbf16>, vector<384x640xbf16>, vector<8x640xf32> -> vector<8x640xf32>
    %c0_9 = arith.constant 0 : index
    %c0_10 = arith.constant 0 : index
    %12 = vector.load %arg5[%c0_9, %c0_10] : memref<1x640xf32, #tpu.memory_space<vmem>>, vector<1x640xf32>
    %13 = vector.broadcast %12 : vector<1x640xf32> to vector<8x640xf32>
    %14 = arith.addf %11, %13 : vector<8x640xf32>
    %cst_11 = arith.constant 0.000000e+00 : f32
    %15 = vector.broadcast %cst_11 : f32 to vector<8x640xf32>
    %16 = arith.maximumf %14, %15 : vector<8x640xf32>
    %17 = arith.truncf %16 : vector<8x640xf32> to vector<8x640xbf16>
    %c0_12 = arith.constant 0 : index
    %c0_13 = arith.constant 0 : index
    %18 = vector.load %arg6[%c0_12, %c0_13] : memref<640x640xbf16, #tpu.memory_space<vmem>>, vector<640x640xbf16>
    %cst_14 = arith.constant dense<0.000000e+00> : vector<8x640xf32>
    %19 = tpu.matmul %17, %18, %cst_14 {dimension_numbers = #tpu.dot_dimension_numbers<[1], [0], [0], [1], [0, 0, 1, 1], [], []>} : vector<8x640xbf16>, vector<640x640xbf16>, vector<8x640xf32> -> vector<8x640xf32>
    %c0_15 = arith.constant 0 : index
    %c0_16 = arith.constant 0 : index
    %20 = vector.load %arg7[%c0_15, %c0_16] : memref<1x640xf32, #tpu.memory_space<vmem>>, vector<1x640xf32>
    %21 = vector.broadcast %20 : vector<1x640xf32> to vector<8x640xf32>
    %22 = arith.addf %19, %21 : vector<8x640xf32>
    %cst_17 = arith.constant 0.000000e+00 : f32
    %23 = vector.broadcast %cst_17 : f32 to vector<8x640xf32>
    %24 = arith.maximumf %22, %23 : vector<8x640xf32>
    %25 = arith.truncf %24 : vector<8x640xf32> to vector<8x640xbf16>
    %c0_18 = arith.constant 0 : index
    %c0_19 = arith.constant 0 : index
    %26 = vector.load %arg8[%c0_18, %c0_19] : memref<640x1024xbf16, #tpu.memory_space<vmem>>, vector<640x1024xbf16>
    %cst_20 = arith.constant dense<0.000000e+00> : vector<8x1024xf32>
    %27 = tpu.matmul %25, %26, %cst_20 {dimension_numbers = #tpu.dot_dimension_numbers<[1], [0], [0], [1], [0, 0, 1, 1], [], []>} : vector<8x640xbf16>, vector<640x1024xbf16>, vector<8x1024xf32> -> vector<8x1024xf32>
    %c0_21 = arith.constant 0 : index
    %c0_22 = arith.constant 0 : index
    %28 = vector.load %arg9[%c0_21, %c0_22] : memref<1x1024xf32, #tpu.memory_space<vmem>>, vector<1x1024xf32>
    %29 = vector.broadcast %28 : vector<1x1024xf32> to vector<8x1024xf32>
    %30 = arith.addf %27, %29 : vector<8x1024xf32>
    %cst_23 = arith.constant 0.000000e+00 : f32
    %31 = vector.broadcast %cst_23 : f32 to vector<8x1024xf32>
    %32 = arith.maximumf %30, %31 : vector<8x1024xf32>
    %33 = arith.truncf %32 : vector<8x1024xf32> to vector<8x1024xbf16>
    %c0_24 = arith.constant 0 : index
    %c0_25 = arith.constant 0 : index
    %34 = vector.load %arg10[%c0_24, %c0_25] : memref<1024x128xbf16, #tpu.memory_space<vmem>>, vector<1024x128xbf16>
    %cst_26 = arith.constant dense<0.000000e+00> : vector<8x128xf32>
    %35 = tpu.matmul %33, %34, %cst_26 {dimension_numbers = #tpu.dot_dimension_numbers<[1], [0], [0], [1], [0, 0, 1, 1], [], []>} : vector<8x1024xbf16>, vector<1024x128xbf16>, vector<8x128xf32> -> vector<8x128xf32>
    %c0_27 = arith.constant 0 : index
    %c0_28 = arith.constant 0 : index
    %36 = vector.load %arg11[%c0_27, %c0_28] : memref<1x128xf32, #tpu.memory_space<vmem>>, vector<1x128xf32>
    %37 = vector.broadcast %36 : vector<1x128xf32> to vector<8x128xf32>
    %38 = arith.addf %35, %37 : vector<8x128xf32>
    %cst_29 = arith.constant 0.000000e+00 : f32
    %39 = vector.broadcast %cst_29 : f32 to vector<8x128xf32>
    %40 = arith.subf %39, %38 : vector<8x128xf32>
    %41 = math.exp %40 : vector<8x128xf32>
    %cst_30 = arith.constant 1.000000e+00 : f32
    %42 = vector.broadcast %cst_30 : f32 to vector<8x128xf32>
    %43 = arith.addf %42, %41 : vector<8x128xf32>
    %44 = tpu.reciprocal %43 {approx = true} : vector<8x128xf32> -> vector<8x128xf32>
    %c0_31 = arith.constant 0 : index
    %c0_32 = arith.constant 0 : index
    %45 = vector.load %arg12[%c0_31, %c0_32] : memref<8x128xf32, #tpu.memory_space<vmem>>, vector<8x128xf32>
    tpu.vector_store %arg12[%c0_31, %c0_32], %44 {strides = array<i32>} : memref<8x128xf32, #tpu.memory_space<vmem>>, vector<8x128xf32>,
    return
  }
  func.func @transform_0(%arg0: i32) -> (i32, i32) {
    %c0_i32 = arith.constant 0 : i32
    %c0_i32_0 = arith.constant 0 : i32
    return %arg0, %c0_i32 : i32, i32
  }
  func.func @transform_1(%arg0: i32) -> (i32, i32) {
    %c0_i32 = arith.constant 0 : i32
    %c0_i32_0 = arith.constant 0 : i32
    %c0_i32_1 = arith.constant 0 : i32
    return %c0_i32, %c0_i32_0 : i32, i32
  }
  func.func @transform_2(%arg0: i32) -> (i32, i32) {
    %c0_i32 = arith.constant 0 : i32
    %c0_i32_0 = arith.constant 0 : i32
    %c0_i32_1 = arith.constant 0 : i32
    return %c0_i32, %c0_i32_0 : i32, i32
  }
  func.func @transform_3(%arg0: i32) -> (i32, i32) {
    %c0_i32 = arith.constant 0 : i32
    %c0_i32_0 = arith.constant 0 : i32
    %c0_i32_1 = arith.constant 0 : i32
    return %c0_i32, %c0_i32_0 : i32, i32
  }
  func.func @transform_4(%arg0: i32) -> (i32, i32) {
    %c0_i32 = arith.constant 0 : i32
    %c0_i32_0 = arith.constant 0 : i32
    %c0_i32_1 = arith.constant 0 : i32
    return %c0_i32, %c0_i32_0 : i32, i32
  }
  func.func @transform_5(%arg0: i32) -> (i32, i32) {
    %c0_i32 = arith.constant 0 : i32
    %c0_i32_0 = arith.constant 0 : i32
    %c0_i32_1 = arith.constant 0 : i32
    return %c0_i32, %c0_i32_0 : i32, i32
  }
  func.func @transform_6(%arg0: i32) -> (i32, i32) {
    %c0_i32 = arith.constant 0 : i32
    %c0_i32_0 = arith.constant 0 : i32
    %c0_i32_1 = arith.constant 0 : i32
    return %c0_i32, %c0_i32_0 : i32, i32
  }
  func.func @transform_7(%arg0: i32) -> (i32, i32) {
    %c0_i32 = arith.constant 0 : i32
    %c0_i32_0 = arith.constant 0 : i32
    %c0_i32_1 = arith.constant 0 : i32
    return %c0_i32, %c0_i32_0 : i32, i32
  }
  func.func @transform_8(%arg0: i32) -> (i32, i32) {
    %c0_i32 = arith.constant 0 : i32
    %c0_i32_0 = arith.constant 0 : i32
    %c0_i32_1 = arith.constant 0 : i32
    return %c0_i32, %c0_i32_0 : i32, i32
  }
  func.func @transform_9(%arg0: i32) -> (i32, i32) {
    %c0_i32 = arith.constant 0 : i32
    %c0_i32_0 = arith.constant 0 : i32
    %c0_i32_1 = arith.constant 0 : i32
    return %c0_i32, %c0_i32_0 : i32, i32
  }
  func.func @transform_10(%arg0: i32) -> (i32, i32) {
    %c0_i32 = arith.constant 0 : i32
    %c0_i32_0 = arith.constant 0 : i32
    %c0_i32_1 = arith.constant 0 : i32
    return %c0_i32, %c0_i32_0 : i32, i32
  }
  func.func @transform_11(%arg0: i32) -> (i32, i32) {
    %c0_i32 = arith.constant 0 : i32
    %c0_i32_0 = arith.constant 0 : i32
    return %arg0, %c0_i32 : i32, i32
  }
}

</mosaic_0001>

<bundles_post_ra>
// kernel: fc_decoder_forward.1
= control target key start
LH: loop header
LB: loop body
LE: loop exit
PB: predicated region body
PF: predicated region fallthrough
CT: control target
= control target key end

     0   :  { %16 = vsyncpa [#allocation3], 0  ;;  %s8510_s0 = inlined_call_operand.hbm [shape: f32[8,32], index: 0, kind: input, shape index: {}]   ;;  %s8511_s1 = inlined_call_operand.hbm [shape: bf16[32,384], index: 1, kind: input, shape index: {}]   ;;  %s8512_s2 = inlined_call_operand.hbm [shape: f32[1,384], index: 2, kind: input, shape index: {}]   ;;  %s8513_s3 = inlined_call_operand.hbm [shape: bf16[384,640], index: 3, kind: input, shape index: {}]   ;;  %s8514_s4 = inlined_call_operand.hbm [shape: f32[1,640], index: 4, kind: input, shape index: {}]   ;;  %s8515_s5 = inlined_call_operand.hbm [shape: bf16[640,640], index: 5, kind: input, shape index: {}]   ;;  %s8516_s6 = inlined_call_operand.hbm [shape: f32[1,640], index: 6, kind: input, shape index: {}]   ;;  %s8517_s7 = inlined_call_operand.hbm [shape: bf16[640,1024], index: 7, kind: input, shape index: {}]   ;;  %s8518_s8 = inlined_call_operand.hbm [shape: f32[1,1024], index: 8, kind: input, shape index: {}]   ;;  %s8519_s9 = inlined_call_operand.hbm [shape: bf16[1024,128], index: 9, kind: input, shape index: {}]   ;;  %s8520_s10 = inlined_call_operand.hbm [shape: f32[1,128], index: 10, kind: input, shape index: {}]   ;;  %s8521_s11 = inlined_call_operand.hbm [shape: f32[8,128], index: 11, kind: output, shape index: {}]  }
   0x1   :  { %17 = vsyncpa [#allocation6], 0 }
   0x2   :  { %18 = vsyncpa [#allocation9], 0 }
   0x3   :  { %19 = vsyncpa [#allocation12], 0 }
   0x4   :  { %20 = vsyncpa [#allocation15], 0 }
   0x5   :  { %21 = vsyncpa [#allocation18], 0 }
   0x6   :  { %22 = vsyncpa [#allocation4], 0  ;;  %s8067_s17 = smov [#allocation5]   ;;  %s7789_s21 = scalar_lea.hbm %s8511_s1, 768 }
   0x7   :  { %s38_s18 = sshll.u32 %s8067_s17, 4  ;;  %p7790_p0 = scmp.ne.s32.totalorder %s8511_s1, %s7789_s21  ;;  %s39_s18 = int_to_ptr.vmem [resolvable:$true] %s38_s18 }
   0x8   :  { %p7793_p1 = scmp.lt.u32.totalorder %s7789_s21, %s8511_s1 }
   0xa   :  { %p7795_p2 = pnand %p7793_p1, %p7790_p0 }
   0xc   :  { %7798 = shalt.err (!%p7795_p2)
}
   0xd   :  { %s7799_s26 = scalar_lea.vmem %s39_s18, 768  ;;  %p7804_p4 = scmp.lt.s32.totalorder %s39_s18, %s39_s18 }
   0xe   :  { %p7800_p3 = scmp.ne.s32.totalorder %s39_s18, %s7799_s26  ;;  %p7805_p5 = scmp.lt.s32.totalorder %s7799_s26, %s7799_s26 }
  0x10   :  { %p7806_p6 = por %p7805_p5, %p7804_p4 }
  0x12   :  { %p7807_p7 = pnand %p7806_p6, %p7800_p3 }
  0x14   :  { %7810 = shalt.err (!%p7807_p7)
}
  0x15   :  { %s8068_s27 = smov 192   ;;  %s8069_s28 = smov 12  }
  0x16   :  { %44 = dma.hbm_to_vmem [thread:$0]  %s8511_s1, 768, %s39_s18, [#allocation6], %s8068_s27, %s8068_s27, %s8069_s28  }
  0x17   :  { %s8070_s12 = smov [#allocation8]   ;;  %s7811_s16 = scalar_lea.hbm %s8513_s3, 15360 }
  0x18   :  { %s60_s13 = sshll.u32 %s8070_s12, 4  ;;  %p7812_p8 = scmp.ne.s32.totalorder %s8513_s3, %s7811_s16  ;;  %s61_s13 = int_to_ptr.vmem [resolvable:$true] %s60_s13 }
  0x19   :  { %p7815_p9 = scmp.lt.u32.totalorder %s7811_s16, %s8513_s3 }
  0x1b   :  { %p7817_p10 = pnand %p7815_p9, %p7812_p8 }
  0x1d   :  { %7820 = shalt.err (!%p7817_p10)
}
  0x1e   :  { %s7821_s22 = scalar_lea.vmem %s61_s13, 15360  ;;  %p7826_p12 = scmp.lt.s32.totalorder %s61_s13, %s61_s13 }
  0x1f   :  { %p7822_p11 = scmp.ne.s32.totalorder %s61_s13, %s7821_s22  ;;  %p7827_p13 = scmp.lt.s32.totalorder %s7821_s22, %s7821_s22 }
  0x21   :  { %p7828_p0 = por %p7827_p13, %p7826_p12 }
  0x23   :  { %p7829_p1 = pnand %p7828_p0, %p7822_p11 }
  0x25   :  { %7832 = shalt.err (!%p7829_p1)
}
  0x26   :  { %s8071_s1 = smov 320   ;;  %s8072_s18 = smov 20  }
  0x27   :  { %66 = dma.hbm_to_vmem [thread:$0]  %s8513_s3, 15360, %s61_s13, [#allocation9], %s8071_s1, %s8071_s1, %s8072_s18  }
  0x28   :  { %s8073_s25 = smov [#allocation11]   ;;  %s8074_s27 = smov [#allocation14]  }
  0x29   :  { %s82_s26 = sshll.u32 %s8073_s25, 4  ;;  %s104_s28 = sshll.u32 %s8074_s27, 4  ;;  %s83_s26 = int_to_ptr.vmem [resolvable:$true] %s82_s26  ;;  %s8174_s28 = int_to_ptr.vmem [resolvable:$true] %s104_s28 }
  0x2a   :  { %s7833_s12 = scalar_lea.hbm %s8515_s5, 25600 }
  0x2b   :  { %p7834_p2 = scmp.ne.s32.totalorder %s8515_s5, %s7833_s12  ;;  %p7837_p3 = scmp.lt.u32.totalorder %s7833_s12, %s8515_s5 }
  0x2d   :  { %p7839_p4 = pnand %p7837_p3, %p7834_p2 }
  0x2f   :  { %7842 = shalt.err (!%p7839_p4)
}
  0x30   :  { %s7843_s3 = scalar_lea.vmem %s83_s26, 25600  ;;  %p7848_p6 = scmp.lt.s32.totalorder %s83_s26, %s83_s26 }
  0x31   :  { %p7844_p5 = scmp.ne.s32.totalorder %s83_s26, %s7843_s3  ;;  %p7849_p7 = scmp.lt.s32.totalorder %s7843_s3, %s7843_s3 }
  0x33   :  { %p7850_p8 = por %p7849_p7, %p7848_p6 }
  0x35   :  { %p7851_p9 = pnand %p7850_p8, %p7844_p5 }
  0x37   :  { %7854 = shalt.err (!%p7851_p9)
}
  0x38   :  { %88 = dma.hbm_to_vmem [thread:$0]  %s8515_s5, 25600, %s83_s26, [#allocation12], %s8071_s1, %s8071_s1, %s8072_s18  }
  0x39   :  { %s7855_s22 = scalar_lea.hbm %s8517_s7, 40960 }
  0x3a   :  { %p7856_p10 = scmp.ne.s32.totalorder %s8517_s7, %s7855_s22  ;;  %p7859_p11 = scmp.lt.u32.totalorder %s7855_s22, %s8517_s7 }
  0x3c   :  { %p7861_p12 = pnand %p7859_p11, %p7856_p10 }
  0x3e   :  { %7864 = shalt.err (!%p7861_p12)
}
  0x3f   :  { %s7865_s29 = scalar_lea.vmem %s8174_s28, 40960  ;;  %p7870_p0 = scmp.lt.s32.totalorder %s8174_s28, %s8174_s28 }
  0x40   :  { %p7866_p13 = scmp.ne.s32.totalorder %s8174_s28, %s7865_s29  ;;  %p7871_p1 = scmp.lt.s32.totalorder %s7865_s29, %s7865_s29 }
  0x42   :  { %p7872_p2 = por %p7871_p1, %p7870_p0 }
  0x44   :  { %p7873_p3 = pnand %p7872_p2, %p7866_p13 }
  0x46   :  { %7876 = shalt.err (!%p7873_p3)
}
  0x47   :  { %s8075_s5 = smov 512   ;;  %s8076_s1 = smov 32  }
  0x48   :  { %110 = dma.hbm_to_vmem [thread:$0]  %s8517_s7, 40960, %s8174_s28, [#allocation15], %s8075_s5, %s8075_s5, %s8076_s1  }
  0x49   :  { %s8077_s30 = smov [#allocation17]   ;;  %s7877_s16 = scalar_lea.hbm %s8519_s9, 8192 }
  0x4a   :  { %s126_s12 = sshll.u32 %s8077_s30, 4  ;;  %p7878_p4 = scmp.ne.s32.totalorder %s8519_s9, %s7877_s16  ;;  %s127_s12 = int_to_ptr.vmem [resolvable:$true] %s126_s12 }
  0x4b   :  { %p7881_p5 = scmp.lt.u32.totalorder %s7877_s16, %s8519_s9 }
  0x4d   :  { %p7883_p6 = pnand %p7881_p5, %p7878_p4 }
  0x4f   :  { %7886 = shalt.err (!%p7883_p6)
}
  0x50   :  { %s7887_s20 = scalar_lea.vmem %s127_s12, 8192  ;;  %p7892_p8 = scmp.lt.s32.totalorder %s127_s12, %s127_s12 }
  0x51   :  { %p7888_p7 = scmp.ne.s32.totalorder %s127_s12, %s7887_s20  ;;  %p7893_p9 = scmp.lt.s32.totalorder %s7887_s20, %s7887_s20 }
  0x53   :  { %p7894_p10 = por %p7893_p9, %p7892_p8 }
  0x55   :  { %p7895_p11 = pnand %p7894_p10, %p7888_p7 }
  0x57   :  { %7898 = shalt.err (!%p7895_p11)
}
  0x58   :  { %s8078_s7 = smov 64   ;;  %s8079_s28 = smov 4  }
  0x59   :  { %132 = dma.hbm_to_vmem [thread:$0]  %s8519_s9, 8192, %s127_s12, [#allocation18], %s8078_s7, %s8078_s7, %s8079_s28  }
  0x5a   :  { %s8080_s23 = smov [#allocation2]   ;;  %s8081_s25 = smov [#allocation7]  }
  0x5b   :  { %s29_s24 = sshll.u32 %s8080_s23, 4  ;;  %s51_s27 = sshll.u32 %s8081_s25, 4  ;;  %s30_s24 = int_to_ptr.vmem [resolvable:$true] %s29_s24  ;;  %s52_s27 = int_to_ptr.vmem [resolvable:$true] %s51_s27 }
  0x5c   :  { %s7899_s1 = scalar_lea.hbm %s8510_s0, 128 }
  0x5d   :  { %p7900_p12 = scmp.ne.s32.totalorder %s8510_s0, %s7899_s1  ;;  %p7903_p13 = scmp.lt.u32.totalorder %s7899_s1, %s8510_s0 }
  0x5f   :  { %p7905_p0 = pnand %p7903_p13, %p7900_p12 }
  0x61   :  { %7908 = shalt.err (!%p7905_p0)
}
  0x62   :  { %s7909_s9 = scalar_lea.vmem %s30_s24, 128  ;;  %p7914_p2 = scmp.lt.s32.totalorder %s30_s24, %s30_s24 }
  0x63   :  { %p7910_p1 = scmp.ne.s32.totalorder %s30_s24, %s7909_s9  ;;  %p7915_p3 = scmp.lt.s32.totalorder %s7909_s9, %s7909_s9 }
  0x65   :  { %p7916_p4 = por %p7915_p3, %p7914_p2 }
  0x67   :  { %p7917_p5 = pnand %p7916_p4, %p7910_p1 }
  0x69   :  { %7920 = shalt.err (!%p7917_p5)
}
  0x6a   :  { %32 = dma.hbm_to_vmem [thread:$0]  %s8510_s0, 128, %s30_s24, [#allocation3]  }
  0x6b   :  { %s7921_s3 = scalar_lea.hbm %s8512_s2, 48 }
  0x6c   :  { %p7922_p6 = scmp.ne.s32.totalorder %s8512_s2, %s7921_s3  ;;  %p7925_p7 = scmp.lt.u32.totalorder %s7921_s3, %s8512_s2 }
  0x6e   :  { %p7927_p8 = pnand %p7925_p7, %p7922_p6 }
  0x70   :  { %7930 = shalt.err (!%p7927_p8)
}
  0x71   :  { %s7931_s28 = scalar_lea.vmem %s52_s27, 48  ;;  %s7935_s21 = scalar_lea.vmem %s52_s27, 64 }
  0x72   :  { %p7932_p9 = scmp.ne.s32.totalorder %s52_s27, %s7931_s28  ;;  %p7936_p10 = scmp.lt.s32.totalorder %s52_s27, %s52_s27 }
  0x73   :  { %p7937_p11 = scmp.lt.s32.totalorder %s7935_s21, %s7931_s28 }
  0x75   :  { %p7938_p12 = por %p7937_p11, %p7936_p10 }
  0x77   :  { %p7939_p13 = pnand %p7938_p12, %p7932_p9 }
  0x79   :  { %7942 = shalt.err (!%p7939_p13)
}
  0x7a   :  { %54 = dma.hbm_to_vmem [thread:$0]  %s8512_s2, 48, %s52_s27, [#allocation6]  }
  0x7b   :  { %s8082_s23 = smov [#allocation10]   ;;  %s8083_s25 = smov [#allocation13]  }
  0x7c   :  { %s73_s24 = sshll.u32 %s8082_s23, 4  ;;  %s95_s29 = sshll.u32 %s8083_s25, 4  ;;  %s74_s24 = int_to_ptr.vmem [resolvable:$true] %s73_s24  ;;  %s96_s29 = int_to_ptr.vmem [resolvable:$true] %s95_s29 }
  0x7d   :  { %s7943_s18 = scalar_lea.hbm %s8514_s4, 80 }
  0x7e   :  { %p7944_p0 = scmp.ne.s32.totalorder %s8514_s4, %s7943_s18  ;;  %p7947_p1 = scmp.lt.u32.totalorder %s7943_s18, %s8514_s4 }
  0x80   :  { %p7949_p2 = pnand %p7947_p1, %p7944_p0 }
  0x82   :  { %7952 = shalt.err (!%p7949_p2)
}
  0x83   :  { %s7953_s2 = scalar_lea.vmem %s74_s24, 80  ;;  %s7957_s27 = scalar_lea.vmem %s74_s24, 96 }
  0x84   :  { %p7954_p3 = scmp.ne.s32.totalorder %s74_s24, %s7953_s2  ;;  %p7958_p4 = scmp.lt.s32.totalorder %s74_s24, %s74_s24 }
  0x85   :  { %p7959_p5 = scmp.lt.s32.totalorder %s7957_s27, %s7953_s2 }
  0x87   :  { %p7960_p6 = por %p7959_p5, %p7958_p4 }
  0x89   :  { %p7961_p7 = pnand %p7960_p6, %p7954_p3 }
  0x8b   :  { %7964 = shalt.err (!%p7961_p7)
}
  0x8c   :  { %76 = dma.hbm_to_vmem [thread:$0]  %s8514_s4, 80, %s74_s24, [#allocation9]  }
  0x8d   :  { %s7965_s3 = scalar_lea.hbm %s8516_s6, 80 }
  0x8e   :  { %p7966_p8 = scmp.ne.s32.totalorder %s8516_s6, %s7965_s3  ;;  %p7969_p9 = scmp.lt.u32.totalorder %s7965_s3, %s8516_s6 }
  0x90   :  { %p7971_p10 = pnand %p7969_p9, %p7966_p8 }
  0x92   :  { %7974 = shalt.err (!%p7971_p10)
}
  0x93   :  { %s7975_s28 = scalar_lea.vmem %s96_s29, 80  ;;  %s7979_s21 = scalar_lea.vmem %s96_s29, 96 }
  0x94   :  { %p7976_p11 = scmp.ne.s32.totalorder %s96_s29, %s7975_s28  ;;  %p7980_p12 = scmp.lt.s32.totalorder %s96_s29, %s96_s29 }
  0x95   :  { %p7981_p13 = scmp.lt.s32.totalorder %s7979_s21, %s7975_s28 }
  0x97   :  { %p7982_p0 = por %p7981_p13, %p7980_p12 }
  0x99   :  { %p7983_p1 = pnand %p7982_p0, %p7976_p11 }
  0x9b   :  { %7986 = shalt.err (!%p7983_p1)
}
  0x9c   :  { %98 = dma.hbm_to_vmem [thread:$0]  %s8516_s6, 80, %s96_s29, [#allocation12]  }
  0x9d   :  { %s8084_s22 = smov [#allocation16]   ;;  %s8085_s24 = smov [#allocation19]  }
  0x9e   :  { %s117_s23 = sshll.u32 %s8084_s22, 4  ;;  %s139_s25 = sshll.u32 %s8085_s24, 4  ;;  %s118_s23 = int_to_ptr.vmem [resolvable:$true] %s117_s23  ;;  %s140_s25 = int_to_ptr.vmem [resolvable:$true] %s139_s25 }
  0x9f   :  { %s7987_s18 = scalar_lea.hbm %s8518_s8, 128 }
  0xa0   :  { %p7988_p2 = scmp.ne.s32.totalorder %s8518_s8, %s7987_s18  ;;  %p7991_p3 = scmp.lt.u32.totalorder %s7987_s18, %s8518_s8 }
  0xa2   :  { %p7993_p4 = pnand %p7991_p3, %p7988_p2 }
  0xa4   :  { %7996 = shalt.err (!%p7993_p4)
}
  0xa5   :  { %s7997_s6 = scalar_lea.vmem %s118_s23, 128  ;;  %p8002_p6 = scmp.lt.s32.totalorder %s118_s23, %s118_s23 }
  0xa6   :  { %p7998_p5 = scmp.ne.s32.totalorder %s118_s23, %s7997_s6  ;;  %p8003_p7 = scmp.lt.s32.totalorder %s7997_s6, %s7997_s6 }
  0xa8   :  { %p8004_p8 = por %p8003_p7, %p8002_p6 }
  0xaa   :  { %p8005_p9 = pnand %p8004_p8, %p7998_p5 }
  0xac   :  { %8008 = shalt.err (!%p8005_p9)
}
  0xad   :  { %120 = dma.hbm_to_vmem [thread:$0]  %s8518_s8, 128, %s118_s23, [#allocation15]  }
  0xae   :  { %s8009_s15 = scalar_lea.hbm %s8520_s10, 16 }
  0xaf   :  { %p8010_p10 = scmp.ne.s32.totalorder %s8520_s10, %s8009_s15  ;;  %p8013_p11 = scmp.lt.u32.totalorder %s8009_s15, %s8520_s10 }
  0xb1   :  { %p8015_p12 = pnand %p8013_p11, %p8010_p10 }
  0xb3   :  { %8018 = shalt.err (!%p8015_p12)
}
  0xb4   :  { %s8019_s19 = scalar_lea.vmem %s140_s25, 16  ;;  %s8023_s20 = scalar_lea.vmem %s140_s25, 32 }
  0xb5   :  { %p8020_p13 = scmp.ne.s32.totalorder %s140_s25, %s8019_s19  ;;  %p8024_p0 = scmp.lt.s32.totalorder %s140_s25, %s140_s25 }
  0xb6   :  { %p8025_p1 = scmp.lt.s32.totalorder %s8023_s20, %s8019_s19 }
  0xb8   :  { %p8026_p2 = por %p8025_p1, %p8024_p0 }
  0xba   :  { %p8027_p3 = pnand %p8026_p2, %p8020_p13 }
  0xbc   :  { %8030 = shalt.err (!%p8027_p3)
}
  0xbd   :  { %142 = dma.hbm_to_vmem [thread:$0]  %s8520_s10, 16, %s140_s25, [#allocation18]  }
  0xbe   :  { %8053 = dma.done.wait [#allocation3], 128  }
  0xbf   :  { %8054 = vsyncadd [#allocation3], 4294967168 }
  0xc0   :  { %8055 = dma.done.wait [#allocation6], 816  }
  0xc1   :  { %8056 = vsyncadd [#allocation6], 4294966480 }
  0xc2   :  { %8057 = dma.done.wait [#allocation9], 15440  }
  0xc3   :  { %8058 = vsyncadd [#allocation9], 4294951856 }
  0xc4   :  { %8059 = dma.done.wait [#allocation12], 25680  }
  0xc5   :  { %8060 = vsyncadd [#allocation12], 4294941616 }
  0xc6   :  { %8061 = dma.done.wait [#allocation15], 41088  }
  0xc7   :  { %8062 = vsyncadd [#allocation15], 4294926208 }
  0xc8   :  { %8063 = dma.done.wait [#allocation18], 8208  }
  0xc9   :  { %8064 = vsyncadd [#allocation18], 4294959088  ;;  %v8086_v0 = vmov 0   ;;  %v7265_v1 = vld [vmem:[#allocation5 + $0x4] ss:$12 sps:$4 sm:$0xff]   ;;  %v177_v5 = vld [vmem:[#allocation2] sm:$0xff] }
  0xca   :  { %272 = vmatprep.mubr.bf16.mxu1 %v8086_v0  ;;  %v7267_v2 = vld [vmem:[#allocation5] ss:$12 sps:$4 sm:$0xff]   ;;  %240 = vmatprep.subr.bf16.mxu1 %v7265_v1  ;;  %v7268_v3 = vld [vmem:[#allocation5 + $0x1c] ss:$12 sps:$4 sm:$0xff]   ;;  %v7270_v4 = vld [vmem:[#allocation5 + $0x18] ss:$12 sps:$4 sm:$0xff]   ;;  %v178_v7 = vpack.c.bf16 %v177_v5, %v177_v5 }
  0xcb   :  { %241 = vmatpush1.bf16.msra.mxu1 %v7267_v2  ;;  %v7273_v6 = vld [vmem:[#allocation8 + $0x4] ss:$20 sps:$4 sm:$0xff]   ;;  %vm236_vm0 = vcmask 261120   ;;  %v7271_v8 = vld [vmem:[#allocation5 + $0x8] ss:$12 sps:$4 sm:$0xff]   ;;  %v8087_v10 = vmov 0.0  }
  0xcc   :  { %242 = vmatprep.subr.bf16.mxu1 %v7268_v3  ;;  %1122 = vmatprep.subr.bf16.mxu0 %v7273_v6  ;;  %v7278_v9 = vld [vmem:[#allocation8] ss:$20 sps:$4 sm:$0xff]   ;;  %v7272_v12 = vld [vmem:[#allocation5 + $0x20] ss:$12 sps:$4 sm:$0xff]   ;;  %v7284_v13 = vld [vmem:[#allocation8 + $0x28] ss:$20 sps:$4 sm:$0xff]  }
  0xcd   :  { %v7279_v11 = vld [vmem:[#allocation8 + $0x2c] ss:$20 sps:$4 sm:$0xff]   ;;  %1123 = vmatpush1.bf16.msra.mxu0 %v7278_v9  ;;  %vm8088_vm1 = vmmov 0   ;;  %v7285_v14 = vld [vmem:[#allocation8 + $0x54] ss:$20 sps:$4 sm:$0xff]   ;;  %s8089_s10 = smov [#allocation20]  }
  0xce   :  { %1124 = vmatprep.subr.bf16.mxu0 %v7279_v11  ;;  %v7277_v15 = vld [vmem:[#allocation8 + $0xc] ss:$20 sps:$4 sm:$0xff]   ;;  %v7290_v16 = vld [vmem:[#allocation8 + $0x50] ss:$20 sps:$4 sm:$0xff]   ;;  %v7275_v18 = vld [vmem:[#allocation8 + $0x8] ss:$20 sps:$4 sm:$0xff]  }
  0xcf   :  { %243 = vmatpush1.bf16.msra.mxu1 %v7270_v4  ;;  %v7291_v17 = vld [vmem:[#allocation8 + $0x7c] ss:$20 sps:$4 sm:$0xff]   ;;  %v7283_v19 = vld [vmem:[#allocation8 + $0x34] ss:$20 sps:$4 sm:$0xff]   ;;  %v7296_v20 = vld [vmem:[#allocation8 + $0x78] ss:$20 sps:$4 sm:$0xff]  }
  0xd0   :  { %7122 = vmatprep.subr.bf16.mxu1 %v8087_v10  ;;  %v7297_v21 = vld [vmem:[#allocation8 + $0xa4] ss:$20 sps:$4 sm:$0xff]   ;;  %v7289_v23 = vld [vmem:[#allocation8 + $0x5c] ss:$20 sps:$4 sm:$0xff]   ;;  %v7302_v24 = vld [vmem:[#allocation8 + $0xa0] ss:$20 sps:$4 sm:$0xff]  }
  0xd1   :  { %1125 = vmatpush1.bf16.msra.mxu0 %v7284_v13  ;;  %v7281_v22 = vld [vmem:[#allocation8 + $0x30] ss:$20 sps:$4 sm:$0xff]   ;;  %v7303_v25 = vld [vmem:[#allocation8 + $0xcc] ss:$20 sps:$4 sm:$0xff]   ;;  %v7308_v28 = vld [vmem:[#allocation8 + $0xc8] ss:$20 sps:$4 sm:$0xff]  }
  0xd2   :  { %6240 = vmatmul.mubr.msk.bf16.vlgmr.msra.gmra.mrb[0].mxu1 %vm236_vm0, %v178_v7  ;;  %1126 = vmatprep.subr.bf16.mxu0 %v7285_v14  ;;  %v7287_v26 = vld [vmem:[#allocation8 + $0x58] ss:$20 sps:$4 sm:$0xff]   ;;  %v7309_v29 = vld [vmem:[#allocation8 + $0xf4] ss:$20 sps:$4 sm:$0xff]   ;;  %v7314_v32 = vld [vmem:[#allocation8 + $0xf0] ss:$20 sps:$4 sm:$0xff]   ;;  %v189_v14 = vlaneseq }
  0xd3   :  { %7123 = vmatpush3.bf16.msra.mxu1 %v7271_v8  ;;  %7126 = vmatprep.mubr.msk.bf16.mxu1 %vm8088_vm1, %v8087_v10  ;;  %v7295_v27 = vld [vmem:[#allocation8 + $0x84] ss:$20 sps:$4 sm:$0xff]   ;;  %v7293_v30 = vld [vmem:[#allocation8 + $0x80] ss:$20 sps:$4 sm:$0xff]   ;;  %v7315_v33 = vld [vmem:[#allocation8 + $0x11c] ss:$20 sps:$4 sm:$0xff]  }
  0xd4   :  { %7124 = vmatprep.subr.bf16.mxu1 %v8087_v10  ;;  %v7301_v31 = vld [vmem:[#allocation8 + $0xac] ss:$20 sps:$4 sm:$0xff]   ;;  %v7299_v34 = vld [vmem:[#allocation8 + $0xa8] ss:$20 sps:$4 sm:$0xff]   ;;  %v7321_v37 = vld [vmem:[#allocation8 + $0x144] ss:$20 sps:$4 sm:$0xff]  }
  0xd5   :  { %1127 = vmatpush1.bf16.msra.mxu0 %v7290_v16  ;;  %v7307_v35 = vld [vmem:[#allocation8 + $0xd4] ss:$20 sps:$4 sm:$0xff]   ;;  %v7320_v36 = vld [vmem:[#allocation8 + $0x118] ss:$20 sps:$4 sm:$0xff]   ;;  %v7305_v38 = vld [vmem:[#allocation8 + $0xd0] ss:$20 sps:$4 sm:$0xff]  }
  0xd6   :  { %1128 = vmatprep.subr.bf16.mxu0 %v7291_v17  ;;  %v7313_v39 = vld [vmem:[#allocation8 + $0xfc] ss:$20 sps:$4 sm:$0xff]   ;;  %v7326_v40 = vld [vmem:[#allocation8 + $0x140] ss:$20 sps:$4 sm:$0xff]   ;;  %v7311_v42 = vld [vmem:[#allocation8 + $0xf8] ss:$20 sps:$4 sm:$0xff]  }
  0xd7   :  { %7125 = vmatpush3.bf16.msra.mxu1 %v7272_v12  ;;  %v7327_v41 = vld [vmem:[#allocation8 + $0x16c] ss:$20 sps:$4 sm:$0xff]   ;;  %v7319_v43 = vld [vmem:[#allocation8 + $0x124] ss:$20 sps:$4 sm:$0xff]   ;;  %v7332_v45 = vld [vmem:[#allocation8 + $0x168] ss:$20 sps:$4 sm:$0xff]  }
  0xd8   :  { %1204 = vmatprep.subr.bf16.mxu1 %v7277_v15  ;;  %v7317_v44 = vld [vmem:[#allocation8 + $0x120] ss:$20 sps:$4 sm:$0xff]   ;;  %v7338_v48 = vld [vmem:[#allocation8 + $0x190] ss:$20 sps:$4 sm:$0xff]   ;;  %v7323_v50 = vld [vmem:[#allocation8 + $0x148] ss:$20 sps:$4 sm:$0xff]  }
  0xd9   :  { %1129 = vmatpush1.bf16.msra.mxu0 %v7296_v20  ;;  %v7325_v46 = vld [vmem:[#allocation8 + $0x14c] ss:$20 sps:$4 sm:$0xff]   ;;  %v7333_v47 = vld [vmem:[#allocation8 + $0x194] ss:$20 sps:$4 sm:$0xff]   ;;  %v7339_v49 = vld [vmem:[#allocation8 + $0x1bc] ss:$20 sps:$4 sm:$0xff]  }
  0xda   :  { %7127 = vmatmul.mubr.msk.bf16.vlgmr.msra.gmra.mrb[4].mxu1 %vm236_vm0, %v178_v7  ;;  %1130 = vmatprep.subr.bf16.mxu0 %v7297_v21  ;;  %v7331_v51 = vld [vmem:[#allocation8 + $0x174] ss:$20 sps:$4 sm:$0xff]   ;;  %v7344_v52 = vld [vmem:[#allocation8 + $0x1b8] ss:$20 sps:$4 sm:$0xff]   ;;  %v7329_v54 = vld [vmem:[#allocation8 + $0x170] ss:$20 sps:$4 sm:$0xff]  }
  0xdb   :  { %1205 = vmatpush1.bf16.msra.mxu1 %v7275_v18  ;;  %v7345_v53 = vld [vmem:[#allocation8 + $0x1e4] ss:$20 sps:$4 sm:$0xff]   ;;  %v7337_v55 = vld [vmem:[#allocation8 + $0x19c] ss:$20 sps:$4 sm:$0xff]   ;;  %v7350_v56 = vld [vmem:[#allocation8 + $0x1e0] ss:$20 sps:$4 sm:$0xff]  }
  0xdc   :  { %1206 = vmatprep.subr.bf16.mxu1 %v7283_v19  ;;  %v7351_v57 = vld [vmem:[#allocation8 + $0x20c] ss:$20 sps:$4 sm:$0xff]   ;;  %v7343_v59 = vld [vmem:[#allocation8 + $0x1c4] ss:$20 sps:$4 sm:$0xff]   ;;  %v7356_v60 = vld [vmem:[#allocation8 + $0x208] ss:$20 sps:$4 sm:$0xff]  }
  0xdd   :  { %1131 = vmatpush1.bf16.msra.mxu0 %v7302_v24  ;;  %v7335_v58 = vld [vmem:[#allocation8 + $0x198] ss:$20 sps:$4 sm:$0xff]   ;;  %v7341_v61 = vld [vmem:[#allocation8 + $0x1c0] ss:$20 sps:$4 sm:$0xff]   ;;  %v7347_v63 = vld [vmem:[#allocation8 + $0x1e8] ss:$20 sps:$4 sm:$0xff]  }
  0xde   :  { %1132 = vmatprep.subr.bf16.mxu0 %v7303_v25  ;;  %v7349_v62 = vld [vmem:[#allocation8 + $0x1ec] ss:$20 sps:$4 sm:$0xff]   ;;  %v7355_v1 = vld [vmem:[#allocation8 + $0x214] ss:$20 sps:$4 sm:$0xff]   ;;  %v7353_v2 = vld [vmem:[#allocation8 + $0x210] ss:$20 sps:$4 sm:$0xff]  }
  0xdf   :  { %1207 = vmatpush1.bf16.msra.mxu1 %v7281_v22  ;;  %v7357_v3 = vld [vmem:[#allocation8 + $0x234] ss:$20 sps:$4 sm:$0xff]   ;;  %v7361_v4 = vld [vmem:[#allocation8 + $0x23c] ss:$20 sps:$4 sm:$0xff]   ;;  %v7359_v5 = vld [vmem:[#allocation8 + $0x238] ss:$20 sps:$4 sm:$0xff]  }
  0xe0   :  { %1208 = vmatprep.subr.bf16.mxu1 %v7289_v23  ;;  %v7362_v6 = vld [vmem:[#allocation8 + $0x230] ss:$20 sps:$4 sm:$0xff]   ;;  %v7365_v9 = vld [vmem:[#allocation8 + $0x260] ss:$20 sps:$4 sm:$0xff]   ;;  %v7368_v11 = vld [vmem:[#allocation8 + $0x258] ss:$20 sps:$4 sm:$0xff]  }
  0xe1   :  { %1133 = vmatpush1.bf16.msra.mxu0 %v7308_v28  ;;  %v7363_v7 = vld [vmem:[#allocation8 + $0x25c] ss:$20 sps:$4 sm:$0xff]   ;;  %v7367_v8 = vld [vmem:[#allocation8 + $0x264] ss:$20 sps:$4 sm:$0xff]   ;;  %v7374_v13 = vld [vmem:[#allocation8 + $0x28c] ss:$20 sps:$4 sm:$0xff]  }
  0xe2   :  { %1134 = vmatprep.subr.bf16.mxu0 %v7309_v29  ;;  %v7371_v12 = vld [vmem:[#allocation8 + $0x284] ss:$20 sps:$4 sm:$0xff]   ;;  %v8296_v15 = vshrl.u32 %v189_v14, 7  ;;  %v8298_v16 = vld [vmem:[#allocation7] sm:$0x7]  ;;  %s6220_s28 = sshll.u32 %s8089_s10, 4  ;;  %s6221_s28 = int_to_ptr.vmem [resolvable:$true] %s6220_s28 }
  0xe3   :  { %1209 = vmatpush1.bf16.msra.mxu1 %v7287_v26  ;;  %v7369_v29 = vld [vmem:[#allocation8 + $0x280] ss:$20 sps:$4 sm:$0xff]   ;;  %s8031_s21 = scalar_lea.vmem %s6221_s28, 128  ;;  %p8036_p5 = scmp.lt.s32.totalorder %s6221_s28, %s6221_s28 }
  0xe4   :  { %1210 = vmatprep.subr.bf16.mxu1 %v7295_v27  ;;  %v8301_v17 = vsub.s32 0, %v8296_v15  ;;  %v8304_v18 = vsub.s32 1, %v8296_v15  ;;  %v7423_v14 = vld [vmem:[#allocation8 + $0x1a0] ss:$20 sps:$4 sm:$0xff]   ;;  %p8032_p4 = scmp.ne.s32.totalorder %s6221_s28, %s8031_s21  ;;  %p8037_p6 = scmp.lt.s32.totalorder %s8031_s21, %s8031_s21 }
  0xe5   :  { %1135 = vmatpush1.bf16.msra.mxu0 %v7314_v32  ;;  %v7380_v32 = vld [vmem:[#allocation8 + $0x2b4] ss:$20 sps:$4 sm:$0xff]  }
  0xe6   :  { %1136 = vmatprep.subr.bf16.mxu0 %v7315_v33  ;;  %v192_v19 = vrot.slane %v8298_v16, %v8301_v17  ;;  %v196_v20 = vrot.slane %v8298_v16, %v8304_v18  ;;  %p8038_p7 = por %p8037_p6, %p8036_p5 }
  0xe7   :  { %1211 = vmatpush1.bf16.msra.mxu1 %v7293_v30  ;;  %v7372_v30 = vld [vmem:[#allocation8 + $0x288] ss:$20 sps:$4 sm:$0xff]  }
  0xe8   :  { %1212 = vmatprep.subr.bf16.mxu1 %v7301_v31  ;;  %v7377_v31 = vld [vmem:[#allocation8 + $0x2ac] ss:$20 sps:$4 sm:$0xff]   ;;  %p8039_p8 = pnand %p8038_p7, %p8032_p4 }
  0xe9   :  { %1137 = vmatpush1.bf16.msra.mxu0 %v7320_v36  ;;  %v7378_v36 = vld [vmem:[#allocation8 + $0x2b0] ss:$20 sps:$4 sm:$0xff]  }
  0xea   :  { %1138 = vmatprep.subr.bf16.mxu0 %v7321_v37 }
  0xeb   :  { %1213 = vmatpush1.bf16.msra.mxu1 %v7299_v34 }
  0xec   :  { %1214 = vmatprep.subr.bf16.mxu1 %v7307_v35  ;;  %v7375_v35 = vld [vmem:[#allocation8 + $0x2a8] ss:$20 sps:$4 sm:$0xff]  }
  0xed   :  { %1139 = vmatpush1.bf16.msra.mxu0 %v7326_v40 }
  0xee   :  { %1140 = vmatprep.subr.bf16.mxu0 %v7327_v41 }
  0xef   :  { %1215 = vmatpush1.bf16.msra.mxu1 %v7305_v38  ;;  %v7383_v38 = vld [vmem:[#allocation8 + $0x2d4] ss:$20 sps:$4 sm:$0xff]  }
  0xf0   :  { %1216 = vmatprep.subr.bf16.mxu1 %v7313_v39  ;;  %v7386_v39 = vld [vmem:[#allocation8 + $0x2dc] ss:$20 sps:$4 sm:$0xff]  }
  0xf1   :  { %1141 = vmatpush1.bf16.msra.mxu0 %v7332_v45  ;;  %v7389_v45 = vld [vmem:[#allocation8 + $0x2fc] ss:$20 sps:$4 sm:$0xff]  }
  0xf2   :  { %1142 = vmatprep.subr.bf16.mxu0 %v7333_v47  ;;  %v7387_v47 = vld [vmem:[#allocation8 + $0x2f8] ss:$20 sps:$4 sm:$0xff]  }
  0xf3   :  { %1217 = vmatpush1.bf16.msra.mxu1 %v7311_v42 }
  0xf4   :  { %1218 = vmatprep.subr.bf16.mxu1 %v7319_v43  ;;  %v7381_v43 = vld [vmem:[#allocation8 + $0x2d0] ss:$20 sps:$4 sm:$0xff]  }
  0xf5   :  { %1143 = vmatpush1.bf16.msra.mxu0 %v7338_v48  ;;  %v7390_v48 = vld [vmem:[#allocation8 + $0x300] ss:$20 sps:$4 sm:$0xff]  }
  0xf6   :  { %1144 = vmatprep.subr.bf16.mxu0 %v7339_v49  ;;  %v7395_v49 = vld [vmem:[#allocation8 + $0x324] ss:$20 sps:$4 sm:$0xff]  }
  0xf7   :  { %1219 = vmatpush1.bf16.msra.mxu1 %v7317_v44  ;;  %v7384_v44 = vld [vmem:[#allocation8 + $0x2d8] ss:$20 sps:$4 sm:$0xff]  }
  0xf8   :  { %1220 = vmatprep.subr.bf16.mxu1 %v7325_v46  ;;  %v7392_v46 = vld [vmem:[#allocation8 + $0x304] ss:$20 sps:$4 sm:$0xff]  }
  0xf9   :  { %1145 = vmatpush1.bf16.msra.mxu0 %v7344_v52  ;;  %v7393_v52 = vld [vmem:[#allocation8 + $0x320] ss:$20 sps:$4 sm:$0xff]  }
  0xfa   :  { %1146 = vmatprep.subr.bf16.mxu0 %v7345_v53  ;;  %v7396_v53 = vld [vmem:[#allocation8 + $0x328] ss:$20 sps:$4 sm:$0xff]  }
  0xfb   :  { %1221 = vmatpush1.bf16.msra.mxu1 %v7323_v50  ;;  %v7398_v50 = vld [vmem:[#allocation8 + $0x32c] ss:$20 sps:$4 sm:$0xff]  }
  0xfc   :  { %1222 = vmatprep.subr.bf16.mxu1 %v7331_v51  ;;  %v8321_v51 = vsub.s32 2, %v8296_v15 }
  0xfd   :  { %1147 = vmatpush1.bf16.msra.mxu0 %v7350_v56 }
  0xfe   :  { %1148 = vmatprep.subr.bf16.mxu0 %v7351_v57  ;;  %v200_v56 = vrot.slane %v8298_v16, %v8321_v51  ;;  %v7399_v57 = vld [vmem:[#allocation8 + $0x348] ss:$20 sps:$4 sm:$0xff]   ;;  %v7424_v16 = vld [vmem:[#allocation8 + $0x60] ss:$20 sps:$4 sm:$0xff]  }
  0xff   :  { %1223 = vmatpush1.bf16.msra.mxu1 %v7329_v54  ;;  %v7401_v54 = vld [vmem:[#allocation8 + $0x34c] ss:$20 sps:$4 sm:$0xff]  }
 0x100   :  { %1224 = vmatprep.subr.bf16.mxu1 %v7337_v55  ;;  %v7404_v55 = vld [vmem:[#allocation8 + $0x354] ss:$20 sps:$4 sm:$0xff]  }
 0x101   :  { %1149 = vmatpush1.bf16.msra.mxu0 %v7356_v60  ;;  %v7410_v60 = vld [vmem:[#allocation8 + $0x37c] ss:$20 sps:$4 sm:$0xff]  }
 0x102   :  { %1150 = vmatprep.subr.bf16.mxu0 %v7357_v3 }
 0x103   :  { %1225 = vmatpush1.bf16.msra.mxu1 %v7335_v58  ;;  %v7402_v58 = vld [vmem:[#allocation8 + $0x350] ss:$20 sps:$4 sm:$0xff]  }
 0x104   :  { %1226 = vmatprep.subr.bf16.mxu1 %v7343_v59  ;;  %v7407_v59 = vld [vmem:[#allocation8 + $0x374] ss:$20 sps:$4 sm:$0xff]  }
 0x105   :  { %1151 = vmatpush1.bf16.msra.mxu0 %v7362_v6  ;;  %v7417_v6 = vld [vmem:[#allocation8 + $0x150] ss:$20 sps:$4 sm:$0xff]  }
 0x106   :  { %1152 = vmatprep.subr.bf16.mxu0 %v7363_v7 }
 0x107   :  { %1227 = vmatpush1.bf16.msra.mxu1 %v7341_v61 }
 0x108   :  { %1228 = vmatprep.subr.bf16.mxu1 %v7349_v62  ;;  %v7405_v62 = vld [vmem:[#allocation8 + $0x370] ss:$20 sps:$4 sm:$0xff]  }
 0x109   :  { %1153 = vmatpush1.bf16.msra.mxu0 %v7368_v11  ;;  %v7420_v11 = vld [vmem:[#allocation8 + $0x178] ss:$20 sps:$4 sm:$0xff]  }
 0x10a   :  { %1163 = vmatprep.subr.bf16.mxu0 %v7371_v12  ;;  %v7421_v12 = vld [vmem:[#allocation8 + $0x38] ss:$20 sps:$4 sm:$0xff]  }
 0x10b   :  { %1229 = vmatpush1.bf16.msra.mxu1 %v7347_v63  ;;  %v7408_v63 = vld [vmem:[#allocation8 + $0x378] ss:$20 sps:$4 sm:$0xff]  }
 0x10c   :  { %1230 = vmatprep.subr.bf16.mxu1 %v7355_v1  ;;  %v7413_v1 = vld [vmem:[#allocation8 + $0x39c] ss:$20 sps:$4 sm:$0xff]  }
 0x10f   :  { %1231 = vmatpush1.bf16.msra.mxu1 %v7353_v2  ;;  %v7416_v2 = vld [vmem:[#allocation8 + $0x3a4] ss:$20 sps:$4 sm:$0xff]  }
 0x110   :  { %1232 = vmatprep.subr.bf16.mxu1 %v7361_v4  ;;  %v7411_v4 = vld [vmem:[#allocation8 + $0x398] ss:$20 sps:$4 sm:$0xff]  }
 0x113   :  { %1233 = vmatpush1.bf16.msra.mxu1 %v7359_v5  ;;  %v7414_v5 = vld [vmem:[#allocation8 + $0x3a0] ss:$20 sps:$4 sm:$0xff]  }
 0x114   :  { %1234 = vmatprep.subr.bf16.mxu1 %v7367_v8  ;;  %v7418_v8 = vld [vmem:[#allocation8 + $0x10] ss:$20 sps:$4 sm:$0xff]  }
 0x117   :  { %1235 = vmatpush1.bf16.msra.mxu1 %v7365_v9  ;;  %v7419_v9 = vld [vmem:[#allocation8 + $0x290] ss:$20 sps:$4 sm:$0xff]  }
 0x118   :  { %1245 = vmatprep.subr.bf16.mxu1 %v7374_v13  ;;  %v7422_v13 = vld [vmem:[#allocation8 + $0x2b8] ss:$20 sps:$4 sm:$0xff]  }
 0x1a5   :  { %v274_v21 = vpop.f32.mrb[0].mxu1 }
 0x1a6   :  { %v275_v22 = vadd.f32 %v274_v21, %v192_v19  ;;  %v276_v23 = vpop.f32.mrb[1].mxu1  ;;  %v7425_v19 = vld [vmem:[#allocation8 + $0x2e0] ss:$20 sps:$4 sm:$0xff]   ;;  %v7427_v21 = vld [vmem:[#allocation8 + $0x88] ss:$20 sps:$4 sm:$0xff]  }
 0x1a7   :  { %v277_v24 = vadd.f32 %v276_v23, %v196_v20  ;;  %v278_v25 = vpop.f32.mrb[2].mxu1  ;;  %v7426_v20 = vld [vmem:[#allocation8 + $0x1c8] ss:$20 sps:$4 sm:$0xff]   ;;  %v7429_v23 = vld [vmem:[#allocation8 + $0x1f0] ss:$20 sps:$4 sm:$0xff]  }
 0x1a8   :  { %v321_v26 = vmax.f32 %v275_v22, 0.0  ;;  %v279_v27 = vpop.f32.mrb[3].mxu1  ;;  %v7428_v22 = vld [vmem:[#allocation8 + $0x308] ss:$20 sps:$4 sm:$0xff]   ;;  %v7431_v25 = vld [vmem:[#allocation8 + $0x330] ss:$20 sps:$4 sm:$0xff]  }
 0x1a9   :  { %v322_v28 = vmax.f32 %v277_v24, 0.0  ;;  %v7430_v24 = vld [vmem:[#allocation8 + $0xb0] ss:$20 sps:$4 sm:$0xff]   ;;  %v7433_v27 = vld [vmem:[#allocation8 + $0xd8] ss:$20 sps:$4 sm:$0xff]  }
 0x1aa   :  { %v8312_v34 = vpack.c.bf16 %v321_v26, %v321_v26  ;;  %v7432_v26 = vld [vmem:[#allocation8 + $0x218] ss:$20 sps:$4 sm:$0xff]  }
 0x1ab   :  { %v8310_v33 = vpack.c.bf16 %v322_v28, %v322_v28  ;;  %v7434_v28 = vld [vmem:[#allocation8 + $0x358] ss:$20 sps:$4 sm:$0xff]  }
 0x1ad   :  { %1154 = vmatprep.mubr.bf16.mxu0 %v8310_v33  ;;  %1236 = vmatprep.mubr.bf16.mxu1 %v8310_v33  ;;  %v315_v37 = vpop.f32.mrb[4].mxu1 }
 0x1ae   :  { %1155 = vmatmul.mubr.bf16.vlgmr.msra.gmra.mrb[0].mxu0 %v8312_v34  ;;  %1237 = vmatmul.mubr.bf16.vlgmr.msra.gmra.mrb[8].mxu1 %v8312_v34  ;;  %v7128_v40 = vpop.f32.mrb[5].mxu1  ;;  %v316_v61 = vadd.f32 %v315_v37, %v200_v56  ;;  %v7446_v37 = vld [vmem:[#allocation11 + $0xc] ss:$20 sps:$4 sm:$0xff]  }
 0x1af   :  { %1164 = vmatpush1.bf16.msra.mxu0 %v7369_v29  ;;  %1246 = vmatpush1.bf16.msra.mxu1 %v7372_v30  ;;  %v318_v41 = vpop.f32.mrb[6].mxu1  ;;  %v7435_v29 = vld [vmem:[#allocation8 + $0x240] ss:$20 sps:$4 sm:$0xff]  }
 0x1b0   :  { %1165 = vmatprep.subr.bf16.mxu0 %v7377_v31  ;;  %1247 = vmatprep.subr.bf16.mxu1 %v7380_v32  ;;  %v7129_v42 = vpop.f32.mrb[7].mxu1  ;;  %v323_v3 = vmax.f32 %v316_v61, 0.0  ;;  %v7436_v30 = vld [vmem:[#allocation8 + $0x100] ss:$20 sps:$4 sm:$0xff]   ;;  %v7438_v32 = vld [vmem:[#allocation8 + $0x268] ss:$20 sps:$4 sm:$0xff]  }
 0x1b1   :  { %1195 = vmatprep.mubr.bf16.mxu0 %v8086_v0  ;;  %1277 = vmatprep.mubr.bf16.mxu1 %v8086_v0  ;;  %v7437_v31 = vld [vmem:[#allocation8 + $0x380] ss:$20 sps:$4 sm:$0xff]   ;;  %v7452_v41 = vld [vmem:[#allocation11 + $0x34] ss:$20 sps:$4 sm:$0xff]  }
 0x1b2   :  { %v8325_v7 = vpack.c.bf16 %v323_v3, %v323_v3  ;;  %v7449_v40 = vld [vmem:[#allocation11 + $0x2c] ss:$20 sps:$4 sm:$0xff]   ;;  %v7447_v42 = vld [vmem:[#allocation11 + $0x28] ss:$20 sps:$4 sm:$0xff]  }
 0x1b3   :  { %1166 = vmatpush1.bf16.msra.mxu0 %v7375_v35  ;;  %1248 = vmatpush1.bf16.msra.mxu1 %v7378_v36  ;;  %v7440_v35 = vld [vmem:[#allocation8 + $0x3a8] ss:$20 sps:$4 sm:$0xff]   ;;  %v7482_v61 = vld [vmem:[#allocation11 + $0xfc] ss:$20 sps:$4 sm:$0xff]  }
 0x1b4   :  { %1167 = vmatprep.subr.bf16.mxu0 %v7383_v38  ;;  %1249 = vmatprep.subr.bf16.mxu1 %v7386_v39  ;;  %v7443_v36 = vld [vmem:[#allocation11 + $0x4] ss:$20 sps:$4 sm:$0xff]   ;;  %v7441_v38 = vld [vmem:[#allocation11] ss:$20 sps:$4 sm:$0xff]   ;;  %v7444_v39 = vld [vmem:[#allocation11 + $0x8] ss:$20 sps:$4 sm:$0xff]  }
 0x1b5   :  { %v7473_v56 = vld [vmem:[#allocation11 + $0xcc] ss:$20 sps:$4 sm:$0xff]  }
 0x1b6   :  { %v7483_v3 = vld [vmem:[#allocation11 + $0x118] ss:$20 sps:$4 sm:$0xff]  }
 0x1b7   :  { %1168 = vmatpush1.bf16.msra.mxu0 %v7381_v43  ;;  %1250 = vmatpush1.bf16.msra.mxu1 %v7384_v44  ;;  %v7450_v43 = vld [vmem:[#allocation11 + $0x30] ss:$20 sps:$4 sm:$0xff]   ;;  %v7455_v44 = vld [vmem:[#allocation11 + $0x54] ss:$20 sps:$4 sm:$0xff]  }
 0x1b8   :  { %1169 = vmatprep.subr.bf16.mxu0 %v7389_v45  ;;  %1251 = vmatprep.subr.bf16.mxu1 %v7392_v46  ;;  %v7458_v45 = vld [vmem:[#allocation11 + $0x5c] ss:$20 sps:$4 sm:$0xff]  }
 0x1b9   :  { %v7453_v46 = vld [vmem:[#allocation11 + $0x50] ss:$20 sps:$4 sm:$0xff]  }
 0x1bb   :  { %1170 = vmatpush1.bf16.msra.mxu0 %v7387_v47  ;;  %1252 = vmatpush1.bf16.msra.mxu1 %v7390_v48  ;;  %v7456_v47 = vld [vmem:[#allocation11 + $0x58] ss:$20 sps:$4 sm:$0xff]   ;;  %v7461_v48 = vld [vmem:[#allocation11 + $0x7c] ss:$20 sps:$4 sm:$0xff]  }
 0x1bc   :  { %1171 = vmatprep.subr.bf16.mxu0 %v7395_v49  ;;  %1253 = vmatprep.subr.bf16.mxu1 %v7398_v50  ;;  %v7464_v49 = vld [vmem:[#allocation11 + $0x84] ss:$20 sps:$4 sm:$0xff]   ;;  %v7462_v50 = vld [vmem:[#allocation11 + $0x80] ss:$20 sps:$4 sm:$0xff]  }
 0x1bf   :  { %1172 = vmatpush1.bf16.msra.mxu0 %v7393_v52  ;;  %1254 = vmatpush1.bf16.msra.mxu1 %v7396_v53  ;;  %v7467_v52 = vld [vmem:[#allocation11 + $0xa4] ss:$20 sps:$4 sm:$0xff]   ;;  %v7470_v53 = vld [vmem:[#allocation11 + $0xac] ss:$20 sps:$4 sm:$0xff]  }
 0x1c0   :  { %1173 = vmatprep.subr.bf16.mxu0 %v7401_v54  ;;  %1255 = vmatprep.subr.bf16.mxu1 %v7404_v55  ;;  %v7465_v54 = vld [vmem:[#allocation11 + $0xa0] ss:$20 sps:$4 sm:$0xff]   ;;  %v7468_v55 = vld [vmem:[#allocation11 + $0xa8] ss:$20 sps:$4 sm:$0xff]  }
 0x1c3   :  { %1174 = vmatpush1.bf16.msra.mxu0 %v7399_v57  ;;  %1256 = vmatpush1.bf16.msra.mxu1 %v7402_v58  ;;  %v7476_v57 = vld [vmem:[#allocation11 + $0xd4] ss:$20 sps:$4 sm:$0xff]  }
 0x1c4   :  { %1175 = vmatprep.subr.bf16.mxu0 %v7407_v59  ;;  %1257 = vmatprep.subr.bf16.mxu1 %v7410_v60  ;;  %v7471_v58 = vld [vmem:[#allocation11 + $0xc8] ss:$20 sps:$4 sm:$0xff]   ;;  %v7474_v59 = vld [vmem:[#allocation11 + $0xd0] ss:$20 sps:$4 sm:$0xff]  }
 0x1c5   :  { %v7479_v60 = vld [vmem:[#allocation11 + $0xf4] ss:$20 sps:$4 sm:$0xff]  }
 0x1c7   :  { %1176 = vmatpush1.bf16.msra.mxu0 %v7405_v62  ;;  %1258 = vmatpush1.bf16.msra.mxu1 %v7408_v63  ;;  %v7477_v62 = vld [vmem:[#allocation11 + $0xf0] ss:$20 sps:$4 sm:$0xff]   ;;  %v7480_v63 = vld [vmem:[#allocation11 + $0xf8] ss:$20 sps:$4 sm:$0xff]  }
 0x1c8   :  { %1177 = vmatprep.subr.bf16.mxu0 %v7413_v1  ;;  %1259 = vmatprep.subr.bf16.mxu1 %v7416_v2  ;;  %v7485_v1 = vld [vmem:[#allocation11 + $0x11c] ss:$20 sps:$4 sm:$0xff]   ;;  %v7488_v2 = vld [vmem:[#allocation11 + $0x124] ss:$20 sps:$4 sm:$0xff]  }
 0x1cb   :  { %1178 = vmatpush1.bf16.msra.mxu0 %v7411_v4  ;;  %1260 = vmatpush1.bf16.msra.mxu1 %v7414_v5  ;;  %v7486_v4 = vld [vmem:[#allocation11 + $0x120] ss:$20 sps:$4 sm:$0xff]   ;;  %v7491_v5 = vld [vmem:[#allocation11 + $0x144] ss:$20 sps:$4 sm:$0xff]  }
 0x1cc   :  { %6950 = vmatprep.subr.bf16.mxu0 %v7417_v6  ;;  %7130 = vmatprep.subr.bf16.mxu1 %v8087_v10  ;;  %v7494_v6 = vld [vmem:[#allocation11 + $0x14c] ss:$20 sps:$4 sm:$0xff]  }
 0x1ce   :  { %1196 = vmatmul.mubr.bf16.vlgmr.msra.gmra.mrb[0].mxu0 %v8325_v7  ;;  %1278 = vmatmul.mubr.bf16.vlgmr.msra.gmra.mrb[8].mxu1 %v8325_v7 }
 0x1cf   :  { %6951 = vmatpush3.bf16.msra.mxu0 %v7418_v8  ;;  %1318 = vmatprep.mubr.bf16.mxu0 %v8310_v33  ;;  %v7439_v33 = vld [vmem:[#allocation8 + $0x128] ss:$20 sps:$4 sm:$0xff]   ;;  %v7492_v8 = vld [vmem:[#allocation11 + $0x148] ss:$20 sps:$4 sm:$0xff]  }
 0x1d0   :  { %7131 = vmatpush3.bf16.msra.mxu1 %v7419_v9  ;;  %6952 = vmatprep.subr.bf16.mxu0 %v7420_v11  ;;  %v7497_v9 = vld [vmem:[#allocation11 + $0x16c] ss:$20 sps:$4 sm:$0xff]   ;;  %v7500_v11 = vld [vmem:[#allocation11 + $0x174] ss:$20 sps:$4 sm:$0xff]  }
 0x1d1   :  { %7132 = vmatprep.subr.bf16.mxu1 %v8087_v10  ;;  %7146 = vmatprep.mubr.msk.bf16.mxu1 %vm8088_vm1, %v8087_v10 }
 0x1d3   :  { %6953 = vmatpush3.bf16.msra.mxu0 %v7421_v12  ;;  %v7495_v12 = vld [vmem:[#allocation11 + $0x168] ss:$20 sps:$4 sm:$0xff]  }
 0x1d4   :  { %7133 = vmatpush3.bf16.msra.mxu1 %v7422_v13  ;;  %6954 = vmatprep.subr.bf16.mxu0 %v7423_v14  ;;  %v7498_v13 = vld [vmem:[#allocation11 + $0x170] ss:$20 sps:$4 sm:$0xff]   ;;  %v7503_v14 = vld [vmem:[#allocation11 + $0x194] ss:$20 sps:$4 sm:$0xff]  }
 0x1d5   :  { %7134 = vmatprep.subr.bf16.mxu1 %v8087_v10 }
 0x1d7   :  { %6955 = vmatpush3.bf16.msra.mxu0 %v7424_v16  ;;  %v7506_v16 = vld [vmem:[#allocation11 + $0x19c] ss:$20 sps:$4 sm:$0xff]  }
 0x1d8   :  { %7135 = vmatpush3.bf16.msra.mxu1 %v7425_v19  ;;  %6956 = vmatprep.subr.bf16.mxu0 %v7426_v20  ;;  %v7501_v19 = vld [vmem:[#allocation11 + $0x190] ss:$20 sps:$4 sm:$0xff]   ;;  %v7504_v20 = vld [vmem:[#allocation11 + $0x198] ss:$20 sps:$4 sm:$0xff]  }
 0x1d9   :  { %7136 = vmatprep.subr.bf16.mxu1 %v8087_v10 }
 0x1db   :  { %6957 = vmatpush3.bf16.msra.mxu0 %v7427_v21  ;;  %v7509_v21 = vld [vmem:[#allocation11 + $0x1bc] ss:$20 sps:$4 sm:$0xff]  }
 0x1dc   :  { %7137 = vmatpush3.bf16.msra.mxu1 %v7428_v22  ;;  %6958 = vmatprep.subr.bf16.mxu0 %v7429_v23  ;;  %v7512_v22 = vld [vmem:[#allocation11 + $0x1c4] ss:$20 sps:$4 sm:$0xff]  }
 0x1dd   :  { %7138 = vmatprep.subr.bf16.mxu1 %v8087_v10  ;;  %v7507_v23 = vld [vmem:[#allocation11 + $0x1b8] ss:$20 sps:$4 sm:$0xff]  }
 0x1df   :  { %6959 = vmatpush3.bf16.msra.mxu0 %v7430_v24  ;;  %v7510_v24 = vld [vmem:[#allocation11 + $0x1c0] ss:$20 sps:$4 sm:$0xff]  }
 0x1e0   :  { %7139 = vmatpush3.bf16.msra.mxu1 %v7431_v25  ;;  %6960 = vmatprep.subr.bf16.mxu0 %v7432_v26  ;;  %v7515_v25 = vld [vmem:[#allocation11 + $0x1e4] ss:$20 sps:$4 sm:$0xff]   ;;  %v7518_v26 = vld [vmem:[#allocation11 + $0x1ec] ss:$20 sps:$4 sm:$0xff]  }
 0x1e1   :  { %7140 = vmatprep.subr.bf16.mxu1 %v8087_v10 }
 0x1e3   :  { %6961 = vmatpush3.bf16.msra.mxu0 %v7433_v27  ;;  %v7513_v27 = vld [vmem:[#allocation11 + $0x1e0] ss:$20 sps:$4 sm:$0xff]  }
 0x1e4   :  { %7141 = vmatpush3.bf16.msra.mxu1 %v7434_v28  ;;  %6962 = vmatprep.subr.bf16.mxu0 %v7435_v29  ;;  %v7516_v28 = vld [vmem:[#allocation11 + $0x1e8] ss:$20 sps:$4 sm:$0xff]   ;;  %v7521_v29 = vld [vmem:[#allocation11 + $0x20c] ss:$20 sps:$4 sm:$0xff]  }
 0x1e5   :  { %7142 = vmatprep.subr.bf16.mxu1 %v8087_v10 }
 0x1e7   :  { %6963 = vmatpush3.bf16.msra.mxu0 %v7436_v30  ;;  %v7524_v30 = vld [vmem:[#allocation11 + $0x214] ss:$20 sps:$4 sm:$0xff]  }
 0x1e8   :  { %7143 = vmatpush3.bf16.msra.mxu1 %v7437_v31  ;;  %6964 = vmatprep.subr.bf16.mxu0 %v7438_v32  ;;  %v7519_v31 = vld [vmem:[#allocation11 + $0x208] ss:$20 sps:$4 sm:$0xff]   ;;  %v7522_v32 = vld [vmem:[#allocation11 + $0x210] ss:$20 sps:$4 sm:$0xff]  }
 0x1e9   :  { %7144 = vmatprep.subr.bf16.mxu1 %v8087_v10 }
 0x1eb   :  { %6965 = vmatpush3.bf16.msra.mxu0 %v7439_v33  ;;  %v7527_v33 = vld [vmem:[#allocation11 + $0x234] ss:$20 sps:$4 sm:$0xff]  }
 0x1ec   :  { %7145 = vmatpush3.bf16.msra.mxu1 %v7440_v35  ;;  %2683 = vmatprep.subr.bf16.mxu0 %v7443_v36  ;;  %v7530_v35 = vld [vmem:[#allocation11 + $0x23c] ss:$20 sps:$4 sm:$0xff]  }
 0x1ed   :  { %2806 = vmatprep.subr.bf16.mxu1 %v7446_v37  ;;  %v7525_v36 = vld [vmem:[#allocation11 + $0x230] ss:$20 sps:$4 sm:$0xff]   ;;  %v7528_v37 = vld [vmem:[#allocation11 + $0x238] ss:$20 sps:$4 sm:$0xff]  }
 0x1ee   :  { %1319 = vmatmul.mubr.bf16.vlgmr.msra.gmra.mrb[4].mxu0 %v8312_v34  ;;  %v7459_v34 = vld [vmem:[#allocation11 + $0x78] ss:$20 sps:$4 sm:$0xff]  }
 0x1ef   :  { %7147 = vmatmul.mubr.bf16.vlgmr.msra.gmra.mrb[12].mxu1 %v8325_v7  ;;  %2684 = vmatpush1.bf16.msra.mxu0 %v7441_v38  ;;  %v7489_v7 = vld [vmem:[#allocation11 + $0x140] ss:$20 sps:$4 sm:$0xff]   ;;  %v7533_v38 = vld [vmem:[#allocation11 + $0x25c] ss:$20 sps:$4 sm:$0xff]  }
 0x1f0   :  { %2807 = vmatpush1.bf16.msra.mxu1 %v7444_v39  ;;  %2685 = vmatprep.subr.bf16.mxu0 %v7449_v40  ;;  %v7536_v39 = vld [vmem:[#allocation11 + $0x264] ss:$20 sps:$4 sm:$0xff]  }
 0x1f1   :  { %2808 = vmatprep.subr.bf16.mxu1 %v7452_v41  ;;  %v7531_v40 = vld [vmem:[#allocation11 + $0x258] ss:$20 sps:$4 sm:$0xff]   ;;  %v7534_v41 = vld [vmem:[#allocation11 + $0x260] ss:$20 sps:$4 sm:$0xff]  }
 0x1f3   :  { %2686 = vmatpush1.bf16.msra.mxu0 %v7447_v42  ;;  %v7539_v42 = vld [vmem:[#allocation11 + $0x284] ss:$20 sps:$4 sm:$0xff]  }
 0x1f4   :  { %2809 = vmatpush1.bf16.msra.mxu1 %v7450_v43  ;;  %2687 = vmatprep.subr.bf16.mxu0 %v7455_v44  ;;  %v7542_v43 = vld [vmem:[#allocation11 + $0x28c] ss:$20 sps:$4 sm:$0xff]   ;;  %v8342_v44 = vld [vmem:[#allocation10] sm:$0x1f] }
 0x1f5   :  { %2810 = vmatprep.subr.bf16.mxu1 %v7458_v45  ;;  %v8345_v45 = vsub.s32 3, %v8296_v15 }
 0x1f7   :  { %2688 = vmatpush1.bf16.msra.mxu0 %v7453_v46  ;;  %v476_v46 = vrot.slane %v8342_v44, %v8301_v17 }
 0x1f8   :  { %2811 = vmatpush1.bf16.msra.mxu1 %v7456_v47  ;;  %2689 = vmatprep.subr.bf16.mxu0 %v7461_v48  ;;  %v480_v47 = vrot.slane %v8342_v44, %v8304_v18  ;;  %v488_v48 = vrot.slane %v8342_v44, %v8345_v45 }
 0x1f9   :  { %2812 = vmatprep.subr.bf16.mxu1 %v7464_v49 }
 0x1fb   :  { %2690 = vmatpush1.bf16.msra.mxu0 %v7459_v34 }
 0x1fc   :  { %2813 = vmatpush1.bf16.msra.mxu1 %v7462_v50  ;;  %2691 = vmatprep.subr.bf16.mxu0 %v7467_v52 }
 0x1fd   :  { %2814 = vmatprep.subr.bf16.mxu1 %v7470_v53 }
 0x1ff   :  { %2692 = vmatpush1.bf16.msra.mxu0 %v7465_v54 }
 0x200   :  { %2815 = vmatpush1.bf16.msra.mxu1 %v7468_v55  ;;  %2693 = vmatprep.subr.bf16.mxu0 %v7473_v56 }
 0x201   :  { %2816 = vmatprep.subr.bf16.mxu1 %v7476_v57 }
 0x203   :  { %2694 = vmatpush1.bf16.msra.mxu0 %v7471_v58 }
 0x204   :  { %2817 = vmatpush1.bf16.msra.mxu1 %v7474_v59  ;;  %2695 = vmatprep.subr.bf16.mxu0 %v7479_v60 }
 0x205   :  { %2818 = vmatprep.subr.bf16.mxu1 %v7482_v61 }
 0x207   :  { %2696 = vmatpush1.bf16.msra.mxu0 %v7477_v62 }
 0x208   :  { %2819 = vmatpush1.bf16.msra.mxu1 %v7480_v63  ;;  %2697 = vmatprep.subr.bf16.mxu0 %v7485_v1  ;;  %v7537_v1 = vld [vmem:[#allocation11 + $0x280] ss:$20 sps:$4 sm:$0xff]  }
 0x209   :  { %2820 = vmatprep.subr.bf16.mxu1 %v7488_v2  ;;  %v7540_v2 = vld [vmem:[#allocation11 + $0x288] ss:$20 sps:$4 sm:$0xff]  }
 0x20b   :  { %2698 = vmatpush1.bf16.msra.mxu0 %v7483_v3 }
 0x20c   :  { %2821 = vmatpush1.bf16.msra.mxu1 %v7486_v4  ;;  %2699 = vmatprep.subr.bf16.mxu0 %v7491_v5  ;;  %v7545_v4 = vld [vmem:[#allocation11 + $0x2ac] ss:$20 sps:$4 sm:$0xff]   ;;  %v7548_v5 = vld [vmem:[#allocation11 + $0x2b4] ss:$20 sps:$4 sm:$0xff]  }
 0x20d   :  { %2822 = vmatprep.subr.bf16.mxu1 %v7494_v6 }
 0x20f   :  { %2700 = vmatpush1.bf16.msra.mxu0 %v7489_v7  ;;  %v7543_v7 = vld [vmem:[#allocation11 + $0x2a8] ss:$20 sps:$4 sm:$0xff]  }
 0x210   :  { %2823 = vmatpush1.bf16.msra.mxu1 %v7492_v8  ;;  %2701 = vmatprep.subr.bf16.mxu0 %v7497_v9  ;;  %v7546_v8 = vld [vmem:[#allocation11 + $0x2b0] ss:$20 sps:$4 sm:$0xff]   ;;  %v7551_v9 = vld [vmem:[#allocation11 + $0x2d4] ss:$20 sps:$4 sm:$0xff]  }
 0x211   :  { %2824 = vmatprep.subr.bf16.mxu1 %v7500_v11  ;;  %v7554_v11 = vld [vmem:[#allocation11 + $0x2dc] ss:$20 sps:$4 sm:$0xff]  }
 0x213   :  { %2702 = vmatpush1.bf16.msra.mxu0 %v7495_v12  ;;  %v7549_v12 = vld [vmem:[#allocation11 + $0x2d0] ss:$20 sps:$4 sm:$0xff]  }
 0x214   :  { %2825 = vmatpush1.bf16.msra.mxu1 %v7498_v13  ;;  %2703 = vmatprep.subr.bf16.mxu0 %v7503_v14  ;;  %v7552_v13 = vld [vmem:[#allocation11 + $0x2d8] ss:$20 sps:$4 sm:$0xff]   ;;  %v7557_v14 = vld [vmem:[#allocation11 + $0x2fc] ss:$20 sps:$4 sm:$0xff]  }
 0x215   :  { %2826 = vmatprep.subr.bf16.mxu1 %v7506_v16  ;;  %v7560_v16 = vld [vmem:[#allocation11 + $0x304] ss:$20 sps:$4 sm:$0xff]  }
 0x217   :  { %2704 = vmatpush1.bf16.msra.mxu0 %v7501_v19  ;;  %v7555_v19 = vld [vmem:[#allocation11 + $0x2f8] ss:$20 sps:$4 sm:$0xff]  }
 0x218   :  { %2827 = vmatpush1.bf16.msra.mxu1 %v7504_v20  ;;  %2705 = vmatprep.subr.bf16.mxu0 %v7509_v21  ;;  %v7558_v20 = vld [vmem:[#allocation11 + $0x300] ss:$20 sps:$4 sm:$0xff]   ;;  %v7563_v21 = vld [vmem:[#allocation11 + $0x324] ss:$20 sps:$4 sm:$0xff]  }
 0x219   :  { %2828 = vmatprep.subr.bf16.mxu1 %v7512_v22  ;;  %v7566_v22 = vld [vmem:[#allocation11 + $0x32c] ss:$20 sps:$4 sm:$0xff]  }
 0x21b   :  { %2706 = vmatpush1.bf16.msra.mxu0 %v7507_v23  ;;  %v7561_v23 = vld [vmem:[#allocation11 + $0x320] ss:$20 sps:$4 sm:$0xff]  }
 0x21c   :  { %2829 = vmatpush1.bf16.msra.mxu1 %v7510_v24  ;;  %2707 = vmatprep.subr.bf16.mxu0 %v7515_v25  ;;  %v7564_v24 = vld [vmem:[#allocation11 + $0x328] ss:$20 sps:$4 sm:$0xff]   ;;  %v7569_v25 = vld [vmem:[#allocation11 + $0x34c] ss:$20 sps:$4 sm:$0xff]  }
 0x21d   :  { %2830 = vmatprep.subr.bf16.mxu1 %v7518_v26  ;;  %v7572_v26 = vld [vmem:[#allocation11 + $0x354] ss:$20 sps:$4 sm:$0xff]  }
 0x21f   :  { %2708 = vmatpush1.bf16.msra.mxu0 %v7513_v27  ;;  %v7567_v27 = vld [vmem:[#allocation11 + $0x348] ss:$20 sps:$4 sm:$0xff]  }
 0x220   :  { %2831 = vmatpush1.bf16.msra.mxu1 %v7516_v28  ;;  %2709 = vmatprep.subr.bf16.mxu0 %v7521_v29  ;;  %v7570_v28 = vld [vmem:[#allocation11 + $0x350] ss:$20 sps:$4 sm:$0xff]   ;;  %v7575_v29 = vld [vmem:[#allocation11 + $0x374] ss:$20 sps:$4 sm:$0xff]  }
 0x221   :  { %2832 = vmatprep.subr.bf16.mxu1 %v7524_v30  ;;  %v7578_v30 = vld [vmem:[#allocation11 + $0x37c] ss:$20 sps:$4 sm:$0xff]  }
 0x223   :  { %2710 = vmatpush1.bf16.msra.mxu0 %v7519_v31  ;;  %v8368_v31 = vsub.s32 4, %v8296_v15 }
 0x224   :  { %2833 = vmatpush1.bf16.msra.mxu1 %v7522_v32  ;;  %2711 = vmatprep.subr.bf16.mxu0 %v7527_v33  ;;  %v7573_v32 = vld [vmem:[#allocation11 + $0x370] ss:$20 sps:$4 sm:$0xff]   ;;  %v7576_v33 = vld [vmem:[#allocation11 + $0x378] ss:$20 sps:$4 sm:$0xff]  }
 0x225   :  { %2834 = vmatprep.subr.bf16.mxu1 %v7530_v35  ;;  %v7581_v35 = vld [vmem:[#allocation11 + $0x39c] ss:$20 sps:$4 sm:$0xff]  }
 0x227   :  { %2712 = vmatpush1.bf16.msra.mxu0 %v7525_v36  ;;  %v7584_v36 = vld [vmem:[#allocation11 + $0x3a4] ss:$20 sps:$4 sm:$0xff]  }
 0x228   :  { %2835 = vmatpush1.bf16.msra.mxu1 %v7528_v37  ;;  %2713 = vmatprep.subr.bf16.mxu0 %v7533_v38  ;;  %v492_v38 = vrot.slane %v8342_v44, %v8368_v31 }
 0x229   :  { %2836 = vmatprep.subr.bf16.mxu1 %v7536_v39 }
 0x22b   :  { %2714 = vmatpush1.bf16.msra.mxu0 %v7531_v40 }
 0x22c   :  { %2837 = vmatpush1.bf16.msra.mxu1 %v7534_v41  ;;  %2724 = vmatprep.subr.bf16.mxu0 %v7539_v42 }
 0x22d   :  { %2847 = vmatprep.subr.bf16.mxu1 %v7542_v43 }
 0x2a1   :  { %v1197_v49 = vpop.f32.mrb[0].mxu0  ;;  %v8353_v34 = vpop.f32.mrb[8].mxu1 }
 0x2a2   :  { %v7170_v50 = vadd.f32 %v1197_v49, %v476_v46  ;;  %v1199_v52 = vpop.f32.mrb[1].mxu0  ;;  %v1281_v53 = vpop.f32.mrb[9].mxu1  ;;  %v7579_v46 = vld [vmem:[#allocation11 + $0x398] ss:$20 sps:$4 sm:$0xff]  }
 0x2a3   :  { %v7171_v54 = vadd.f32 %v1199_v52, %v480_v47  ;;  %v7173_v55 = vadd.f32 %v1281_v53, %v488_v48  ;;  %v1201_v56 = vpop.f32.mrb[2].mxu0  ;;  %v1283_v57 = vpop.f32.mrb[10].mxu1  ;;  %v7582_v47 = vld [vmem:[#allocation11 + $0x3a0] ss:$20 sps:$4 sm:$0xff]  }
 0x2a4   :  { %v1366_v58 = vmax.f32 %v7170_v50, 0.0  ;;  %v1202_v59 = vpop.f32.mrb[3].mxu0  ;;  %v1284_v60 = vpop.f32.mrb[11].mxu1  ;;  %v7587_v50 = vld [vmem:[#allocation11 + $0x3c4] ss:$20 sps:$4 sm:$0xff]  }
 0x2a5   :  { %v1367_v61 = vmax.f32 %v7171_v54, 0.0  ;;  %v1369_v62 = vmax.f32 %v7173_v55, 0.0  ;;  %v7590_v52 = vld [vmem:[#allocation11 + $0x3cc] ss:$20 sps:$4 sm:$0xff]   ;;  %v7588_v57 = vld [vmem:[#allocation11 + $0x3c8] ss:$20 sps:$4 sm:$0xff]  }
 0x2a6   :  { %v8357_v3 = vpack.c.bf16 %v1366_v58, %v1366_v58  ;;  %v7585_v56 = vld [vmem:[#allocation11 + $0x3c0] ss:$20 sps:$4 sm:$0xff]   ;;  %v7591_v60 = vld [vmem:[#allocation11 + $0x3e8] ss:$20 sps:$4 sm:$0xff]  }
 0x2a7   :  { %v8355_v63 = vpack.c.bf16 %v1367_v61, %v1367_v61  ;;  %v8361_v6 = vpack.c.bf16 %v1369_v62, %v1369_v62  ;;  %v7593_v58 = vld [vmem:[#allocation11 + $0x3ec] ss:$20 sps:$4 sm:$0xff]   ;;  %v7596_v59 = vld [vmem:[#allocation11 + $0x3f4] ss:$20 sps:$4 sm:$0xff]   ;;  %v7594_v61 = vld [vmem:[#allocation11 + $0x3f0] ss:$20 sps:$4 sm:$0xff]  }
 0x2a8   :  { %v7599_v62 = vld [vmem:[#allocation11 + $0x414] ss:$20 sps:$4 sm:$0xff]  }
 0x2a9   :  { %2715 = vmatprep.mubr.bf16.mxu0 %v8355_v63  ;;  %2838 = vmatprep.mubr.bf16.mxu1 %v8355_v63 }
 0x2aa   :  { %2716 = vmatmul.mubr.bf16.vlgmr.msra.gmra.mrb[8].mxu0 %v8357_v3  ;;  %2839 = vmatmul.mubr.bf16.vlgmr.msra.gmra.mrb[16].mxu1 %v8357_v3 }
 0x2ab   :  { %2725 = vmatpush1.bf16.msra.mxu0 %v7537_v1  ;;  %2848 = vmatpush1.bf16.msra.mxu1 %v7540_v2  ;;  %v7602_v1 = vld [vmem:[#allocation11 + $0x41c] ss:$20 sps:$4 sm:$0xff]  }
 0x2ac   :  { %2756 = vmatprep.mubr.bf16.mxu0 %v8361_v6  ;;  %2879 = vmatprep.mubr.bf16.mxu1 %v8361_v6  ;;  %v7597_v2 = vld [vmem:[#allocation11 + $0x410] ss:$20 sps:$4 sm:$0xff]  }
 0x2ad   :  { %2726 = vmatprep.subr.bf16.mxu0 %v7545_v4  ;;  %2849 = vmatprep.subr.bf16.mxu1 %v7548_v5  ;;  %v7600_v4 = vld [vmem:[#allocation11 + $0x418] ss:$20 sps:$4 sm:$0xff]   ;;  %v7605_v5 = vld [vmem:[#allocation11 + $0x43c] ss:$20 sps:$4 sm:$0xff]  }
 0x2af   :  { %2727 = vmatpush1.bf16.msra.mxu0 %v7543_v7  ;;  %2850 = vmatpush1.bf16.msra.mxu1 %v7546_v8  ;;  %v7608_v7 = vld [vmem:[#allocation11 + $0x444] ss:$20 sps:$4 sm:$0xff]  }
 0x2b0   :  { %2728 = vmatprep.subr.bf16.mxu0 %v7551_v9  ;;  %2851 = vmatprep.subr.bf16.mxu1 %v7554_v11  ;;  %v7603_v8 = vld [vmem:[#allocation11 + $0x438] ss:$20 sps:$4 sm:$0xff]   ;;  %v7606_v9 = vld [vmem:[#allocation11 + $0x440] ss:$20 sps:$4 sm:$0xff]  }
 0x2b1   :  { %v7611_v11 = vld [vmem:[#allocation11 + $0x464] ss:$20 sps:$4 sm:$0xff]  }
 0x2b3   :  { %2729 = vmatpush1.bf16.msra.mxu0 %v7549_v12  ;;  %2852 = vmatpush1.bf16.msra.mxu1 %v7552_v13  ;;  %v7614_v12 = vld [vmem:[#allocation11 + $0x46c] ss:$20 sps:$4 sm:$0xff]  }
 0x2b4   :  { %2730 = vmatprep.subr.bf16.mxu0 %v7557_v14  ;;  %2853 = vmatprep.subr.bf16.mxu1 %v7560_v16  ;;  %v7609_v13 = vld [vmem:[#allocation11 + $0x460] ss:$20 sps:$4 sm:$0xff]   ;;  %v7612_v14 = vld [vmem:[#allocation11 + $0x468] ss:$20 sps:$4 sm:$0xff]  }
 0x2b5   :  { %v7617_v16 = vld [vmem:[#allocation11 + $0x48c] ss:$20 sps:$4 sm:$0xff]  }
 0x2b7   :  { %2731 = vmatpush1.bf16.msra.mxu0 %v7555_v19  ;;  %2854 = vmatpush1.bf16.msra.mxu1 %v7558_v20  ;;  %v7620_v19 = vld [vmem:[#allocation11 + $0x494] ss:$20 sps:$4 sm:$0xff]  }
 0x2b8   :  { %2732 = vmatprep.subr.bf16.mxu0 %v7563_v21  ;;  %2855 = vmatprep.subr.bf16.mxu1 %v7566_v22  ;;  %v7615_v20 = vld [vmem:[#allocation11 + $0x488] ss:$20 sps:$4 sm:$0xff]   ;;  %v7618_v21 = vld [vmem:[#allocation11 + $0x490] ss:$20 sps:$4 sm:$0xff]   ;;  %v484_v22 = vrot.slane %v8342_v44, %v8321_v51 }
 0x2b9   :  { %v7635_v44 = vld [vmem:[#allocation11 + $0x504] ss:$20 sps:$4 sm:$0xff]  }
 0x2bb   :  { %2733 = vmatpush1.bf16.msra.mxu0 %v7561_v23  ;;  %2856 = vmatpush1.bf16.msra.mxu1 %v7564_v24  ;;  %v7623_v23 = vld [vmem:[#allocation11 + $0x4b4] ss:$20 sps:$4 sm:$0xff]   ;;  %v7626_v24 = vld [vmem:[#allocation11 + $0x4bc] ss:$20 sps:$4 sm:$0xff]  }
 0x2bc   :  { %2734 = vmatprep.subr.bf16.mxu0 %v7569_v25  ;;  %2857 = vmatprep.subr.bf16.mxu1 %v7572_v26  ;;  %v7621_v25 = vld [vmem:[#allocation11 + $0x4b0] ss:$20 sps:$4 sm:$0xff]   ;;  %v7624_v26 = vld [vmem:[#allocation11 + $0x4b8] ss:$20 sps:$4 sm:$0xff]  }
 0x2bf   :  { %2735 = vmatpush1.bf16.msra.mxu0 %v7567_v27  ;;  %2858 = vmatpush1.bf16.msra.mxu1 %v7570_v28  ;;  %v7172_v27 = vadd.f32 %v8353_v34, %v484_v22  ;;  %v7629_v28 = vld [vmem:[#allocation11 + $0x4dc] ss:$20 sps:$4 sm:$0xff]   ;;  %v7641_v34 = vld [vmem:[#allocation11 + $0x52c] ss:$20 sps:$4 sm:$0xff]  }
 0x2c0   :  { %2736 = vmatprep.subr.bf16.mxu0 %v7575_v29  ;;  %2859 = vmatprep.subr.bf16.mxu1 %v7578_v30  ;;  %v7632_v29 = vld [vmem:[#allocation11 + $0x4e4] ss:$20 sps:$4 sm:$0xff]  }
 0x2c1   :  { %v6966_v37 = vpop.f32.mrb[4].mxu0  ;;  %v7627_v30 = vld [vmem:[#allocation11 + $0x4d8] ss:$20 sps:$4 sm:$0xff]  }
 0x2c2   :  { %v1360_v39 = vpop.f32.mrb[12].mxu1  ;;  %v6967_v40 = vpop.f32.mrb[5].mxu0  ;;  %v7688_v22 = vld [vmem:[#allocation11 + $0x2b8] ss:$20 sps:$4 sm:$0xff]  }
 0x2c3   :  { %v6968_v41 = vadd.f32 %v6967_v40, %v6966_v37  ;;  %v7148_v42 = vpop.f32.mrb[13].mxu1  ;;  %2737 = vmatpush1.bf16.msra.mxu0 %v7573_v32  ;;  %2860 = vmatpush1.bf16.msra.mxu1 %v7576_v33  ;;  %v6969_v43 = vpop.f32.mrb[6].mxu0  ;;  %v7630_v32 = vld [vmem:[#allocation11 + $0x4e0] ss:$20 sps:$4 sm:$0xff]   ;;  %v1368_v33 = vmax.f32 %v7172_v27, 0.0 }
 0x2c4   :  { %v1363_v48 = vpop.f32.mrb[14].mxu1  ;;  %v6970_v49 = vpop.f32.mrb[7].mxu0  ;;  %2738 = vmatprep.subr.bf16.mxu0 %v7581_v35  ;;  %2861 = vmatprep.subr.bf16.mxu1 %v7584_v36  ;;  %v7638_v35 = vld [vmem:[#allocation11 + $0x50c] ss:$20 sps:$4 sm:$0xff]   ;;  %v7636_v37 = vld [vmem:[#allocation11 + $0x508] ss:$20 sps:$4 sm:$0xff]  }
 0x2c5   :  { %v1321_v53 = vadd.f32 %v6968_v41, %v492_v38  ;;  %v7149_v54 = vpop.f32.mrb[15].mxu1  ;;  %v7633_v36 = vld [vmem:[#allocation11 + $0x500] ss:$20 sps:$4 sm:$0xff]   ;;  %v8377_v38 = vpack.c.bf16 %v1368_v33, %v1368_v33  ;;  %v7639_v40 = vld [vmem:[#allocation11 + $0x528] ss:$20 sps:$4 sm:$0xff]  }
 0x2c6   :  { %v7642_v41 = vld [vmem:[#allocation11 + $0x530] ss:$20 sps:$4 sm:$0xff]   ;;  %v7647_v42 = vld [vmem:[#allocation11 + $0x554] ss:$20 sps:$4 sm:$0xff]   ;;  %v7662_v54 = vld [vmem:[#allocation11 + $0x5ac] ss:$20 sps:$4 sm:$0xff]  }
 0x2c7   :  { %v8372_v55 = vadd.f32 %v1360_v39, %v1321_v53  ;;  %2739 = vmatpush1.bf16.msra.mxu0 %v7579_v46  ;;  %2862 = vmatpush1.bf16.msra.mxu1 %v7582_v47  ;;  %v7644_v39 = vld [vmem:[#allocation11 + $0x534] ss:$20 sps:$4 sm:$0xff]   ;;  %v7650_v43 = vld [vmem:[#allocation11 + $0x55c] ss:$20 sps:$4 sm:$0xff]   ;;  %v7648_v47 = vld [vmem:[#allocation11 + $0x558] ss:$20 sps:$4 sm:$0xff]  }
 0x2c8   :  { %2740 = vmatprep.subr.bf16.mxu0 %v7587_v50  ;;  %2863 = vmatprep.subr.bf16.mxu1 %v7590_v52  ;;  %v7645_v46 = vld [vmem:[#allocation11 + $0x550] ss:$20 sps:$4 sm:$0xff]   ;;  %v7651_v50 = vld [vmem:[#allocation11 + $0x578] ss:$20 sps:$4 sm:$0xff]   ;;  %v7654_v52 = vld [vmem:[#allocation11 + $0x580] ss:$20 sps:$4 sm:$0xff]  }
 0x2c9   :  { %v7653_v48 = vld [vmem:[#allocation11 + $0x57c] ss:$20 sps:$4 sm:$0xff]   ;;  %v7656_v49 = vld [vmem:[#allocation11 + $0x584] ss:$20 sps:$4 sm:$0xff]  }
 0x2ca   :  { %v7659_v53 = vld [vmem:[#allocation11 + $0x5a4] ss:$20 sps:$4 sm:$0xff]   ;;  %v7693_v27 = vld [vmem:[#allocation11 + $0x1c8] ss:$20 sps:$4 sm:$0xff]  }
 0x2cb   :  { %2741 = vmatpush1.bf16.msra.mxu0 %v7585_v56  ;;  %2864 = vmatpush1.bf16.msra.mxu1 %v7588_v57  ;;  %v7657_v56 = vld [vmem:[#allocation11 + $0x5a0] ss:$20 sps:$4 sm:$0xff]   ;;  %v7660_v57 = vld [vmem:[#allocation11 + $0x5a8] ss:$20 sps:$4 sm:$0xff]   ;;  %v7700_v33 = vld [vmem:[#allocation11 + $0x330] ss:$20 sps:$4 sm:$0xff]  }
 0x2cc   :  { %2742 = vmatprep.subr.bf16.mxu0 %v7593_v58  ;;  %2865 = vmatprep.subr.bf16.mxu1 %v7596_v59  ;;  %v7665_v58 = vld [vmem:[#allocation11 + $0x5cc] ss:$20 sps:$4 sm:$0xff]   ;;  %v7668_v59 = vld [vmem:[#allocation11 + $0x5d4] ss:$20 sps:$4 sm:$0xff]  }
 0x2cf   :  { %2743 = vmatpush1.bf16.msra.mxu0 %v7591_v60  ;;  %2866 = vmatpush1.bf16.msra.mxu1 %v7594_v61  ;;  %v7663_v60 = vld [vmem:[#allocation11 + $0x5c8] ss:$20 sps:$4 sm:$0xff]   ;;  %v7666_v61 = vld [vmem:[#allocation11 + $0x5d0] ss:$20 sps:$4 sm:$0xff]  }
 0x2d0   :  { %2744 = vmatprep.subr.bf16.mxu0 %v7599_v62  ;;  %2867 = vmatprep.subr.bf16.mxu1 %v7602_v1  ;;  %v7671_v62 = vld [vmem:[#allocation11 + $0x5f4] ss:$20 sps:$4 sm:$0xff]   ;;  %v7674_v1 = vld [vmem:[#allocation11 + $0x5fc] ss:$20 sps:$4 sm:$0xff]  }
 0x2d3   :  { %2745 = vmatpush1.bf16.msra.mxu0 %v7597_v2  ;;  %2868 = vmatpush1.bf16.msra.mxu1 %v7600_v4  ;;  %v7669_v2 = vld [vmem:[#allocation11 + $0x5f0] ss:$20 sps:$4 sm:$0xff]   ;;  %v7672_v4 = vld [vmem:[#allocation11 + $0x5f8] ss:$20 sps:$4 sm:$0xff]  }
 0x2d4   :  { %2746 = vmatprep.subr.bf16.mxu0 %v7605_v5  ;;  %2869 = vmatprep.subr.bf16.mxu1 %v7608_v7  ;;  %v7677_v5 = vld [vmem:[#allocation11 + $0x61c] ss:$20 sps:$4 sm:$0xff]   ;;  %v7680_v7 = vld [vmem:[#allocation11 + $0x624] ss:$20 sps:$4 sm:$0xff]  }
 0x2d7   :  { %2747 = vmatpush1.bf16.msra.mxu0 %v7603_v8  ;;  %2870 = vmatpush1.bf16.msra.mxu1 %v7606_v9  ;;  %v7675_v8 = vld [vmem:[#allocation11 + $0x618] ss:$20 sps:$4 sm:$0xff]   ;;  %v7678_v9 = vld [vmem:[#allocation11 + $0x620] ss:$20 sps:$4 sm:$0xff]  }
 0x2d8   :  { %2748 = vmatprep.subr.bf16.mxu0 %v7611_v11  ;;  %2871 = vmatprep.subr.bf16.mxu1 %v7614_v12  ;;  %v1370_v11 = vmax.f32 %v8372_v55, 0.0  ;;  %v7681_v12 = vld [vmem:[#allocation11 + $0x150] ss:$20 sps:$4 sm:$0xff]   ;;  %v7687_v55 = vld [vmem:[#allocation11 + $0x38] ss:$20 sps:$4 sm:$0xff]  }
 0x2db   :  { %2749 = vmatpush1.bf16.msra.mxu0 %v7609_v13  ;;  %2872 = vmatpush1.bf16.msra.mxu1 %v7612_v14  ;;  %v7682_v13 = vld [vmem:[#allocation11 + $0x3d0] ss:$20 sps:$4 sm:$0xff]  }
 0x2dc   :  { %2750 = vmatprep.subr.bf16.mxu0 %v7617_v16  ;;  %2873 = vmatprep.subr.bf16.mxu1 %v7620_v19  ;;  %v7683_v14 = vld [vmem:[#allocation11 + $0x10] ss:$20 sps:$4 sm:$0xff]   ;;  %v8384_v16 = vpack.c.bf16 %v1370_v11, %v1370_v11 }
 0x2dd   :  { %v7684_v19 = vld [vmem:[#allocation11 + $0x290] ss:$20 sps:$4 sm:$0xff]  }
 0x2df   :  { %2751 = vmatpush1.bf16.msra.mxu0 %v7615_v20  ;;  %2874 = vmatpush1.bf16.msra.mxu1 %v7618_v21  ;;  %v7685_v20 = vld [vmem:[#allocation11 + $0x178] ss:$20 sps:$4 sm:$0xff]  }
 0x2e0   :  { %2752 = vmatprep.subr.bf16.mxu0 %v7623_v23  ;;  %2875 = vmatprep.subr.bf16.mxu1 %v7626_v24  ;;  %v7686_v21 = vld [vmem:[#allocation11 + $0x3f8] ss:$20 sps:$4 sm:$0xff]   ;;  %v7689_v23 = vld [vmem:[#allocation11 + $0x1a0] ss:$20 sps:$4 sm:$0xff]  }
 0x2e1   :  { %v7690_v24 = vld [vmem:[#allocation11 + $0x420] ss:$20 sps:$4 sm:$0xff]  }
 0x2e3   :  { %2753 = vmatpush1.bf16.msra.mxu0 %v7621_v25  ;;  %2876 = vmatpush1.bf16.msra.mxu1 %v7624_v26  ;;  %v7691_v25 = vld [vmem:[#allocation11 + $0x60] ss:$20 sps:$4 sm:$0xff]  }
 0x2e4   :  { %2754 = vmatprep.subr.bf16.mxu0 %v7629_v28  ;;  %2877 = vmatprep.subr.bf16.mxu1 %v7632_v29  ;;  %v7692_v26 = vld [vmem:[#allocation11 + $0x2e0] ss:$20 sps:$4 sm:$0xff]   ;;  %v7694_v28 = vld [vmem:[#allocation11 + $0x448] ss:$20 sps:$4 sm:$0xff]  }
 0x2e5   :  { %v7695_v29 = vld [vmem:[#allocation11 + $0x88] ss:$20 sps:$4 sm:$0xff]  }
 0x2e7   :  { %2755 = vmatpush1.bf16.msra.mxu0 %v7627_v30  ;;  %2878 = vmatpush1.bf16.msra.mxu1 %v7630_v32  ;;  %v7697_v30 = vld [vmem:[#allocation11 + $0x1f0] ss:$20 sps:$4 sm:$0xff]  }
 0x2e8   :  { %2765 = vmatprep.subr.bf16.mxu0 %v7635_v44  ;;  %2888 = vmatprep.subr.bf16.mxu1 %v7638_v35  ;;  %v7699_v32 = vld [vmem:[#allocation11 + $0xb0] ss:$20 sps:$4 sm:$0xff]   ;;  %v7701_v44 = vld [vmem:[#allocation11 + $0x218] ss:$20 sps:$4 sm:$0xff]  }
 0x2e9   :  { %v7702_v35 = vld [vmem:[#allocation11 + $0x498] ss:$20 sps:$4 sm:$0xff]  }
 0x2ea   :  { %2757 = vmatmul.mubr.bf16.vlgmr.msra.gmra.mrb[8].mxu0 %v8377_v38  ;;  %2880 = vmatmul.mubr.bf16.vlgmr.msra.gmra.mrb[16].mxu1 %v8377_v38 }
 0x2eb   :  { %2766 = vmatpush1.bf16.msra.mxu0 %v7633_v36  ;;  %2889 = vmatpush1.bf16.msra.mxu1 %v7636_v37  ;;  %v7703_v36 = vld [vmem:[#allocation11 + $0xd8] ss:$20 sps:$4 sm:$0xff]  }
 0x2ec   :  { %2767 = vmatprep.subr.bf16.mxu0 %v7641_v34  ;;  %2890 = vmatprep.subr.bf16.mxu1 %v7644_v39  ;;  %v7704_v37 = vld [vmem:[#allocation11 + $0x358] ss:$20 sps:$4 sm:$0xff]   ;;  %v7705_v34 = vld [vmem:[#allocation11 + $0x240] ss:$20 sps:$4 sm:$0xff]  }
 0x2ed   :  { %2797 = vmatprep.mubr.bf16.mxu0 %v8086_v0  ;;  %2920 = vmatprep.mubr.bf16.mxu1 %v8086_v0  ;;  %v7706_v39 = vld [vmem:[#allocation11 + $0x4c0] ss:$20 sps:$4 sm:$0xff]  }
 0x2ef   :  { %2768 = vmatpush1.bf16.msra.mxu0 %v7639_v40  ;;  %2891 = vmatpush1.bf16.msra.mxu1 %v7642_v41  ;;  %v7707_v40 = vld [vmem:[#allocation11 + $0x100] ss:$20 sps:$4 sm:$0xff]  }
 0x2f0   :  { %2769 = vmatprep.subr.bf16.mxu0 %v7647_v42  ;;  %2892 = vmatprep.subr.bf16.mxu1 %v7650_v43  ;;  %v7708_v41 = vld [vmem:[#allocation11 + $0x380] ss:$20 sps:$4 sm:$0xff]   ;;  %v7709_v42 = vld [vmem:[#allocation11 + $0x268] ss:$20 sps:$4 sm:$0xff]  }
 0x2f1   :  { %v7710_v43 = vld [vmem:[#allocation11 + $0x4e8] ss:$20 sps:$4 sm:$0xff]  }
 0x2f3   :  { %2770 = vmatpush1.bf16.msra.mxu0 %v7645_v46  ;;  %2893 = vmatpush1.bf16.msra.mxu1 %v7648_v47  ;;  %v3059_v46 = vld [vmem:[#allocation14] sm:$0xff] }
 0x2f4   :  { %2771 = vmatprep.subr.bf16.mxu0 %v7653_v48  ;;  %2894 = vmatprep.subr.bf16.mxu1 %v7656_v49  ;;  %v3063_v47 = vld [vmem:[#allocation14 + $0x20] sm:$0xff] }
 0x2f5   :  { %v7711_v48 = vld [vmem:[#allocation11 + $0x128] ss:$20 sps:$4 sm:$0xff]  }
 0x2f6   :  { %v7712_v49 = vld [vmem:[#allocation11 + $0x3a8] ss:$20 sps:$4 sm:$0xff]  }
 0x2f7   :  { %2772 = vmatpush1.bf16.msra.mxu0 %v7651_v50  ;;  %2895 = vmatpush1.bf16.msra.mxu1 %v7654_v52  ;;  %v6563_v50 = vcombine.high %v3059_v46, %v3063_v47  ;;  %v7713_v52 = vld [vmem:[#allocation11 + $0x510] ss:$20 sps:$4 sm:$0xff]  }
 0x2f8   :  { %2773 = vmatprep.subr.bf16.mxu0 %v7659_v53  ;;  %2896 = vmatprep.subr.bf16.mxu1 %v7662_v54  ;;  %v3067_v53 = vld [vmem:[#allocation14 + $0x40] sm:$0xff] }
 0x2f9   :  { %v3071_v54 = vld [vmem:[#allocation14 + $0x60] sm:$0xff] }
 0x2fb   :  { %2774 = vmatpush1.bf16.msra.mxu0 %v7657_v56  ;;  %2897 = vmatpush1.bf16.msra.mxu1 %v7660_v57  ;;  %v6562_v56 = vcombine.low %v3059_v46, %v3063_v47  ;;  %v6571_v57 = vcombine.high %v3067_v53, %v3071_v54  ;;  %v3080_v46 = vld [vmem:[#allocation14 + $0xa8] sm:$0xff] }
 0x2fc   :  { %2775 = vmatprep.subr.bf16.mxu0 %v7665_v58  ;;  %2898 = vmatprep.subr.bf16.mxu1 %v7668_v59  ;;  %v7714_v58 = vld [vmem:[#allocation11 + $0x538] ss:$20 sps:$4 sm:$0xff]  }
 0x2fd   :  { %v3075_v59 = vld [vmem:[#allocation14 + $0x80] sm:$0xff] }
 0x2ff   :  { %2776 = vmatpush1.bf16.msra.mxu0 %v7663_v60  ;;  %2899 = vmatpush1.bf16.msra.mxu1 %v7666_v61  ;;  %v3079_v60 = vld [vmem:[#allocation14 + $0xa0] sm:$0xff]  ;;  %v6570_v61 = vcombine.low %v3067_v53, %v3071_v54  ;;  %v3084_v53 = vld [vmem:[#allocation14 + $0xc8] sm:$0xff] }
 0x300   :  { %2777 = vmatprep.subr.bf16.mxu0 %v7671_v62  ;;  %2900 = vmatprep.subr.bf16.mxu1 %v7674_v1  ;;  %v6579_v62 = vcombine.high %v3075_v59, %v3079_v60  ;;  %v7715_v1 = vld [vmem:[#allocation11 + $0x560] ss:$20 sps:$4 sm:$0xff]  }
 0x301   :  { %v3088_v54 = vld [vmem:[#allocation14 + $0xe8] sm:$0xff] }
 0x303   :  { %2778 = vmatpush1.bf16.msra.mxu0 %v7669_v2  ;;  %2901 = vmatpush1.bf16.msra.mxu1 %v7672_v4  ;;  %v3083_v2 = vld [vmem:[#allocation14 + $0xc0] sm:$0xff] }
 0x304   :  { %2779 = vmatprep.subr.bf16.mxu0 %v7677_v5  ;;  %2902 = vmatprep.subr.bf16.mxu1 %v7680_v7  ;;  %v7716_v5 = vld [vmem:[#allocation11 + $0x588] ss:$20 sps:$4 sm:$0xff]  }
 0x305   :  { %v3091_v7 = vld [vmem:[#allocation14 + $0x100] sm:$0xff] }
 0x307   :  { %2780 = vmatpush1.bf16.msra.mxu0 %v7675_v8  ;;  %2903 = vmatpush1.bf16.msra.mxu1 %v7678_v9  ;;  %v3095_v8 = vld [vmem:[#allocation14 + $0x120] sm:$0xff] }
 0x308   :  { %6981 = vmatprep.subr.bf16.mxu0 %v7681_v12  ;;  %7003 = vmatprep.subr.bf16.mxu1 %v7682_v13  ;;  %v6595_v11 = vcombine.high %v3091_v7, %v3095_v8  ;;  %v7717_v12 = vld [vmem:[#allocation11 + $0x5b0] ss:$20 sps:$4 sm:$0xff]  }
 0x309   :  { %v3099_v13 = vld [vmem:[#allocation14 + $0x140] sm:$0xff] }
 0x30a   :  { %2798 = vmatmul.mubr.bf16.vlgmr.msra.gmra.mrb[8].mxu0 %v8384_v16  ;;  %2921 = vmatmul.mubr.bf16.vlgmr.msra.gmra.mrb[16].mxu1 %v8384_v16 }
 0x30b   :  { %6982 = vmatpush3.bf16.msra.mxu0 %v7683_v14  ;;  %2961 = vmatprep.mubr.bf16.mxu0 %v8355_v63  ;;  %v7696_v63 = vld [vmem:[#allocation11 + $0x308] ss:$20 sps:$4 sm:$0xff]  }
 0x30c   :  { %7004 = vmatpush3.bf16.msra.mxu1 %v7684_v19  ;;  %3001 = vmatprep.mubr.bf16.mxu1 %v8361_v6  ;;  %v7698_v6 = vld [vmem:[#allocation11 + $0x470] ss:$20 sps:$4 sm:$0xff]   ;;  %v6594_v19 = vcombine.low %v3091_v7, %v3095_v8 }
 0x30d   :  { %6983 = vmatprep.subr.bf16.mxu0 %v7685_v20  ;;  %7005 = vmatprep.subr.bf16.mxu1 %v7686_v21  ;;  %v3103_v14 = vld [vmem:[#allocation14 + $0x160] sm:$0xff]  ;;  %v3100_v7 = vld [vmem:[#allocation14 + $0x148] sm:$0xff] }
 0x30e   :  { %v6603_v20 = vcombine.high %v3099_v13, %v3103_v14  ;;  %v7718_v21 = vld [vmem:[#allocation11 + $0x5d8] ss:$20 sps:$4 sm:$0xff]  }
 0x30f   :  { %6984 = vmatpush3.bf16.msra.mxu0 %v7687_v55  ;;  %v3107_v55 = vld [vmem:[#allocation14 + $0x180] sm:$0xff]  ;;  %v3104_v8 = vld [vmem:[#allocation14 + $0x168] sm:$0xff] }
 0x310   :  { %7006 = vmatpush3.bf16.msra.mxu1 %v7688_v22  ;;  %6985 = vmatprep.subr.bf16.mxu0 %v7689_v23  ;;  %v3111_v22 = vld [vmem:[#allocation14 + $0x1a0] sm:$0xff]  ;;  %v6602_v23 = vcombine.low %v3099_v13, %v3103_v14 }
 0x311   :  { %7007 = vmatprep.subr.bf16.mxu1 %v7690_v24  ;;  %v6611_v24 = vcombine.high %v3107_v55, %v3111_v22  ;;  %v3163_v13 = vld [vmem:[#allocation14 + $0x340] sm:$0xff] }
 0x312   :  { %v3167_v14 = vld [vmem:[#allocation14 + $0x360] sm:$0xff] }
 0x313   :  { %6986 = vmatpush3.bf16.msra.mxu0 %v7691_v25  ;;  %v7719_v25 = vld [vmem:[#allocation11 + $0x600] ss:$20 sps:$4 sm:$0xff]  }
 0x314   :  { %7008 = vmatpush3.bf16.msra.mxu1 %v7692_v26  ;;  %6987 = vmatprep.subr.bf16.mxu0 %v7693_v27  ;;  %v3115_v26 = vld [vmem:[#allocation14 + $0x1c0] sm:$0xff] }
 0x315   :  { %7009 = vmatprep.subr.bf16.mxu1 %v7694_v28  ;;  %v3119_v27 = vld [vmem:[#allocation14 + $0x1e0] sm:$0xff]  ;;  %v3060_v28 = vld [vmem:[#allocation14 + $0x8] sm:$0xff] }
 0x317   :  { %6988 = vmatpush3.bf16.msra.mxu0 %v7695_v29  ;;  %v3064_v29 = vld [vmem:[#allocation14 + $0x28] sm:$0xff] }
 0x318   :  { %7010 = vmatpush3.bf16.msra.mxu1 %v7696_v63  ;;  %6989 = vmatprep.subr.bf16.mxu0 %v7697_v30  ;;  %v6610_v63 = vcombine.low %v3107_v55, %v3111_v22  ;;  %v6619_v30 = vcombine.high %v3115_v26, %v3119_v27  ;;  %v6667_v22 = vcombine.high %v3163_v13, %v3167_v14 }
 0x319   :  { %7011 = vmatprep.subr.bf16.mxu1 %v7698_v6  ;;  %v7720_v6 = vld [vmem:[#allocation11 + $0x628] ss:$20 sps:$4 sm:$0xff]  }
 0x31b   :  { %6990 = vmatpush3.bf16.msra.mxu0 %v7699_v32  ;;  %v3123_v32 = vld [vmem:[#allocation14 + $0x200] sm:$0xff] }
 0x31c   :  { %7012 = vmatpush3.bf16.msra.mxu1 %v7700_v33  ;;  %6991 = vmatprep.subr.bf16.mxu0 %v7701_v44  ;;  %v3127_v33 = vld [vmem:[#allocation14 + $0x220] sm:$0xff]  ;;  %v6565_v44 = vcombine.high %v3060_v28, %v3064_v29 }
 0x31d   :  { %7013 = vmatprep.subr.bf16.mxu1 %v7702_v35  ;;  %v3068_v35 = vld [vmem:[#allocation14 + $0x48] sm:$0xff]  ;;  %v6626_v47 = vcombine.low %v3123_v32, %v3127_v33 }
 0x31f   :  { %6992 = vmatpush3.bf16.msra.mxu0 %v7703_v36  ;;  %v3072_v36 = vld [vmem:[#allocation14 + $0x68] sm:$0xff] }
 0x320   :  { %7014 = vmatpush3.bf16.msra.mxu1 %v7704_v37  ;;  %6993 = vmatprep.subr.bf16.mxu0 %v7705_v34  ;;  %v6618_v37 = vcombine.low %v3115_v26, %v3119_v27  ;;  %v6627_v34 = vcombine.high %v3123_v32, %v3127_v33  ;;  %v3116_v27 = vld [vmem:[#allocation14 + $0x1c8] sm:$0xff]  ;;  %v3183_v32 = vld [vmem:[#allocation14 + $0x3e0] sm:$0xff] }
 0x321   :  { %7015 = vmatprep.subr.bf16.mxu1 %v7706_v39  ;;  %v6564_v39 = vcombine.low %v3060_v28, %v3064_v29  ;;  %v3120_v28 = vld [vmem:[#allocation14 + $0x1e8] sm:$0xff]  ;;  %v6666_v29 = vcombine.low %v3163_v13, %v3167_v14 }
 0x322   :  { %v6621_v33 = vcombine.high %v3116_v27, %v3120_v28  ;;  %v3180_v13 = vld [vmem:[#allocation14 + $0x3c8] sm:$0xff] }
 0x323   :  { %6994 = vmatpush3.bf16.msra.mxu0 %v7707_v40  ;;  %v3131_v40 = vld [vmem:[#allocation14 + $0x240] sm:$0xff]  ;;  %v3184_v14 = vld [vmem:[#allocation14 + $0x3e8] sm:$0xff] }
 0x324   :  { %7016 = vmatpush3.bf16.msra.mxu1 %v7708_v41  ;;  %6995 = vmatprep.subr.bf16.mxu0 %v7709_v42  ;;  %v3135_v41 = vld [vmem:[#allocation14 + $0x260] sm:$0xff]  ;;  %v6573_v42 = vcombine.high %v3068_v35, %v3072_v36 }
 0x325   :  { %7017 = vmatprep.subr.bf16.mxu1 %v7710_v43  ;;  %v3076_v43 = vld [vmem:[#allocation14 + $0x88] sm:$0xff] }
 0x327   :  { %6996 = vmatpush3.bf16.msra.mxu0 %v7711_v48  ;;  %v6572_v48 = vcombine.low %v3068_v35, %v3072_v36  ;;  %v3128_v35 = vld [vmem:[#allocation14 + $0x228] sm:$0xff] }
 0x328   :  { %7018 = vmatpush3.bf16.msra.mxu1 %v7712_v49  ;;  %7150 = vmatprep.subr.bf16.mxu0 %v8087_v10  ;;  %v3139_v49 = vld [vmem:[#allocation14 + $0x280] sm:$0xff] }
 0x329   :  { %5021 = vmatprep.subr.bf16.mxu1 %v6563_v50  ;;  %v3143_v50 = vld [vmem:[#allocation14 + $0x2a0] sm:$0xff] }
 0x32a   :  { %2962 = vmatmul.mubr.bf16.vlgmr.msra.gmra.mrb[12].mxu0 %v8357_v3  ;;  %v3087_v3 = vld [vmem:[#allocation14 + $0xe0] sm:$0xff] }
 0x32b   :  { %3002 = vmatmul.mubr.bf16.vlgmr.msra.gmra.mrb[20].mxu1 %v8377_v38  ;;  %7151 = vmatpush3.bf16.msra.mxu0 %v7713_v52  ;;  %v6578_v38 = vcombine.low %v3075_v59, %v3079_v60  ;;  %v6587_v4 = vcombine.high %v3083_v2, %v3087_v3  ;;  %v6586_v9 = vcombine.low %v3083_v2, %v3087_v3  ;;  %v3147_v59 = vld [vmem:[#allocation14 + $0x2c0] sm:$0xff] }
 0x32c   :  { %7152 = vmatprep.subr.bf16.mxu0 %v8087_v10  ;;  %7166 = vmatprep.mubr.msk.bf16.mxu0 %vm8088_vm1, %v8087_v10  ;;  %v6581_v52 = vcombine.high %v3076_v43, %v3080_v46  ;;  %v3151_v60 = vld [vmem:[#allocation14 + $0x2e0] sm:$0xff]  ;;  %v6588_v3 = vcombine.low %v3084_v53, %v3088_v54 }
 0x32d   :  { %5022 = vmatpush1.bf16.msra.mxu1 %v6562_v56  ;;  %v6634_v56 = vcombine.low %v3131_v40, %v3135_v41  ;;  %v6651_v2 = vcombine.high %v3147_v59, %v3151_v60 }
 0x32e   :  { %5023 = vmatprep.subr.bf16.mxu1 %v6571_v57  ;;  %v6643_v57 = vcombine.high %v3139_v49, %v3143_v50 }
 0x32f   :  { %7153 = vmatpush3.bf16.msra.mxu0 %v7714_v58  ;;  %v6580_v58 = vcombine.low %v3076_v43, %v3080_v46  ;;  %v8409_v43 = vld [vmem:[#allocation14 + $0x428] sm:$0xff] }
 0x330   :  { %7154 = vmatprep.subr.bf16.mxu0 %v8087_v10  ;;  %v3132_v46 = vld [vmem:[#allocation14 + $0x248] sm:$0xff] }
 0x331   :  { %5024 = vmatpush1.bf16.msra.mxu1 %v6570_v61  ;;  %v3092_v61 = vld [vmem:[#allocation14 + $0x108] sm:$0xff] }
 0x332   :  { %5025 = vmatprep.subr.bf16.mxu1 %v6579_v62  ;;  %v3096_v62 = vld [vmem:[#allocation14 + $0x128] sm:$0xff] }
 0x333   :  { %7155 = vmatpush3.bf16.msra.mxu0 %v7715_v1  ;;  %v6642_v1 = vcombine.low %v3139_v49, %v3143_v50 }
 0x334   :  { %7156 = vmatprep.subr.bf16.mxu0 %v8087_v10 }
 0x335   :  { %5026 = vmatpush1.bf16.msra.mxu1 %v6578_v38  ;;  %v3155_v38 = vld [vmem:[#allocation14 + $0x300] sm:$0xff] }
 0x336   :  { %5027 = vmatprep.subr.bf16.mxu1 %v6587_v4  ;;  %v3159_v4 = vld [vmem:[#allocation14 + $0x320] sm:$0xff] }
 0x337   :  { %7157 = vmatpush3.bf16.msra.mxu0 %v7716_v5  ;;  %v6597_v5 = vcombine.high %v3092_v61, %v3096_v62  ;;  %v6658_v55 = vcombine.low %v3155_v38, %v3159_v4 }
 0x338   :  { %7158 = vmatprep.subr.bf16.mxu0 %v8087_v10 }
 0x339   :  { %5028 = vmatpush1.bf16.msra.mxu1 %v6586_v9  ;;  %v6650_v9 = vcombine.low %v3147_v59, %v3151_v60  ;;  %v3148_v59 = vld [vmem:[#allocation14 + $0x2c8] sm:$0xff] }
 0x33a   :  { %5029 = vmatprep.subr.bf16.mxu1 %v6595_v11  ;;  %v6659_v11 = vcombine.high %v3155_v38, %v3159_v4  ;;  %v3152_v60 = vld [vmem:[#allocation14 + $0x2e8] sm:$0xff] }
 0x33b   :  { %7159 = vmatpush3.bf16.msra.mxu0 %v7717_v12  ;;  %v6596_v12 = vcombine.low %v3092_v61, %v3096_v62  ;;  %v6653_v61 = vcombine.high %v3148_v59, %v3152_v60  ;;  %v3156_v62 = vld [vmem:[#allocation14 + $0x308] sm:$0xff] }
 0x33c   :  { %7160 = vmatprep.subr.bf16.mxu0 %v8087_v10  ;;  %v3164_v38 = vld [vmem:[#allocation14 + $0x348] sm:$0xff] }
 0x33d   :  { %5030 = vmatpush1.bf16.msra.mxu1 %v6594_v19  ;;  %v6605_v19 = vcombine.high %v3100_v7, %v3104_v8  ;;  %v3168_v4 = vld [vmem:[#allocation14 + $0x368] sm:$0xff] }
 0x33e   :  { %5031 = vmatprep.subr.bf16.mxu1 %v6603_v20  ;;  %v3108_v20 = vld [vmem:[#allocation14 + $0x188] sm:$0xff] }
 0x33f   :  { %7161 = vmatpush3.bf16.msra.mxu0 %v7718_v21  ;;  %v3112_v21 = vld [vmem:[#allocation14 + $0x1a8] sm:$0xff] }
 0x340   :  { %7162 = vmatprep.subr.bf16.mxu0 %v8087_v10  ;;  %v6613_v26 = vcombine.high %v3108_v20, %v3112_v21 }
 0x341   :  { %5032 = vmatpush1.bf16.msra.mxu1 %v6602_v23  ;;  %v6604_v23 = vcombine.low %v3100_v7, %v3104_v8  ;;  %v6669_v7 = vcombine.high %v3164_v38, %v3168_v4  ;;  %v3172_v8 = vld [vmem:[#allocation14 + $0x388] sm:$0xff] }
 0x342   :  { %5033 = vmatprep.subr.bf16.mxu1 %v6611_v24  ;;  %v3171_v24 = vld [vmem:[#allocation14 + $0x380] sm:$0xff] }
 0x343   :  { %7163 = vmatpush3.bf16.msra.mxu0 %v7719_v25  ;;  %v3175_v25 = vld [vmem:[#allocation14 + $0x3a0] sm:$0xff] }
 0x344   :  { %7164 = vmatprep.subr.bf16.mxu0 %v8087_v10  ;;  %v6635_v10 = vcombine.high %v3131_v40, %v3135_v41  ;;  %v6674_v36 = vcombine.low %v3171_v24, %v3175_v25  ;;  %v8405_v40 = vld [vmem:[#allocation14 + $0x420] sm:$0xff]  ;;  %v8407_v41 = vld [vmem:[#allocation14 + $0x408] sm:$0xff] }
 0x345   :  { %5034 = vmatpush1.bf16.msra.mxu1 %v6610_v63  ;;  %v6675_v63 = vcombine.high %v3171_v24, %v3175_v25  ;;  %v6692_v49 = vcombine.low %v8407_v41, %v8409_v43 }
 0x346   :  { %5035 = vmatprep.subr.bf16.mxu1 %v6619_v30  ;;  %v6612_v30 = vcombine.low %v3108_v20, %v3112_v21  ;;  %v6685_v20 = vcombine.high %v3180_v13, %v3184_v14  ;;  %v6684_v21 = vcombine.low %v3180_v13, %v3184_v14  ;;  %v3227_v13 = vld [vmem:[#allocation14 + $0x540] sm:$0xff] }
 0x347   :  { %7165 = vmatpush3.bf16.msra.mxu0 %v7720_v6  ;;  %v3179_v6 = vld [vmem:[#allocation14 + $0x3c0] sm:$0xff] }
 0x348   :  { %5144 = vmatprep.subr.bf16.mxu0 %v6565_v44  ;;  %v3124_v44 = vld [vmem:[#allocation14 + $0x208] sm:$0xff]  ;;  %v3231_v14 = vld [vmem:[#allocation14 + $0x560] sm:$0xff] }
 0x349   :  { %5036 = vmatpush1.bf16.msra.mxu1 %v6618_v37  ;;  %v6683_v37 = vcombine.high %v3179_v6, %v3183_v32 }
 0x34a   :  { %7167 = vmatmul.mubr.bf16.vlgmr.msra.gmra.mrb[16].mxu0 %v8384_v16  ;;  %5037 = vmatprep.subr.bf16.mxu1 %v6627_v34  ;;  %v6589_v16 = vcombine.high %v3084_v53, %v3088_v54  ;;  %v6620_v34 = vcombine.low %v3116_v27, %v3120_v28  ;;  %v3140_v54 = vld [vmem:[#allocation14 + $0x288] sm:$0xff] }
 0x34b   :  { %5145 = vmatpush1.bf16.msra.mxu0 %v6564_v39  ;;  %v8403_v39 = vld [vmem:[#allocation14 + $0x400] sm:$0xff] }
 0x34c   :  { %5146 = vmatprep.subr.bf16.mxu0 %v6573_v42  ;;  %v6629_v42 = vcombine.high %v3124_v44, %v3128_v35  ;;  %v6691_v50 = vcombine.high %v8403_v39, %v8405_v40 }
 0x34d   :  { %5038 = vmatpush1.bf16.msra.mxu1 %v6626_v47  ;;  %v3136_v47 = vld [vmem:[#allocation14 + $0x268] sm:$0xff] }
 0x34e   :  { %5039 = vmatprep.subr.bf16.mxu1 %v6635_v10  ;;  %v6682_v10 = vcombine.low %v3179_v6, %v3183_v32  ;;  %v6637_v53 = vcombine.high %v3132_v46, %v3136_v47 }
 0x34f   :  { %5147 = vmatpush1.bf16.msra.mxu0 %v6572_v48  ;;  %v6690_v48 = vcombine.low %v8403_v39, %v8405_v40 }
 0x350   :  { %5148 = vmatprep.subr.bf16.mxu0 %v6581_v52  ;;  %v6628_v52 = vcombine.low %v3124_v44, %v3128_v35 }
 0x351   :  { %5040 = vmatpush1.bf16.msra.mxu1 %v6634_v56  ;;  %v3144_v56 = vld [vmem:[#allocation14 + $0x2a8] sm:$0xff] }
 0x352   :  { %5041 = vmatprep.subr.bf16.mxu1 %v6643_v57  ;;  %v6636_v57 = vcombine.low %v3132_v46, %v3136_v47  ;;  %v3199_v46 = vld [vmem:[#allocation14 + $0x460] sm:$0xff]  ;;  %v3196_v47 = vld [vmem:[#allocation14 + $0x448] sm:$0xff] }
 0x353   :  { %5149 = vmatpush1.bf16.msra.mxu0 %v6580_v58  ;;  %v6645_v58 = vcombine.high %v3140_v54, %v3144_v56 }
 0x354   :  { %5150 = vmatprep.subr.bf16.mxu0 %v6589_v16  ;;  %v6644_v16 = vcombine.low %v3140_v54, %v3144_v56 }
 0x355   :  { %5042 = vmatpush1.bf16.msra.mxu1 %v6642_v1  ;;  %v3160_v1 = vld [vmem:[#allocation14 + $0x328] sm:$0xff] }
 0x356   :  { %5043 = vmatprep.subr.bf16.mxu1 %v6651_v2  ;;  %v6652_v2 = vcombine.low %v3148_v59, %v3152_v60  ;;  %v3208_v59 = vld [vmem:[#allocation14 + $0x4a8] sm:$0xff] }
 0x357   :  { %5151 = vmatpush1.bf16.msra.mxu0 %v6588_v3  ;;  %v6661_v3 = vcombine.high %v3156_v62, %v3160_v1 }
 0x358   :  { %5152 = vmatprep.subr.bf16.mxu0 %v6597_v5  ;;  %v6660_v5 = vcombine.low %v3156_v62, %v3160_v1 }
 0x359   :  { %5044 = vmatpush1.bf16.msra.mxu1 %v6650_v9  ;;  %v3176_v9 = vld [vmem:[#allocation14 + $0x3a8] sm:$0xff] }
 0x35a   :  { %5045 = vmatprep.subr.bf16.mxu1 %v6659_v11  ;;  %v6668_v11 = vcombine.low %v3164_v38, %v3168_v4  ;;  %v3212_v38 = vld [vmem:[#allocation14 + $0x4c8] sm:$0xff] }
 0x35b   :  { %5153 = vmatpush1.bf16.msra.mxu0 %v6596_v12  ;;  %v6677_v12 = vcombine.high %v3172_v8, %v3176_v9  ;;  %v3216_v4 = vld [vmem:[#allocation14 + $0x4e8] sm:$0xff] }
 0x35c   :  { %5154 = vmatprep.subr.bf16.mxu0 %v6605_v19  ;;  %v6676_v19 = vcombine.low %v3172_v8, %v3176_v9  ;;  %v6716_v9 = vcombine.low %v3212_v38, %v3216_v4 }
 0x35d   :  { %5046 = vmatpush1.bf16.msra.mxu1 %v6658_v55  ;;  %v6693_v55 = vcombine.high %v8407_v41, %v8409_v43  ;;  %v6717_v43 = vcombine.high %v3212_v38, %v3216_v4 }
 0x35e   :  { %5047 = vmatprep.subr.bf16.mxu1 %v6667_v22  ;;  %v8419_v22 = vld [vmem:[#allocation13] sm:$0x1f] }
 0x35f   :  { %5155 = vmatpush1.bf16.msra.mxu0 %v6604_v23  ;;  %v1621_v23 = vrot.slane %v8419_v22, %v8301_v17  ;;  %v1625_v24 = vrot.slane %v8419_v22, %v8304_v18  ;;  %v1633_v25 = vrot.slane %v8419_v22, %v8345_v45 }
 0x360   :  { %5156 = vmatprep.subr.bf16.mxu0 %v6613_v26 }
 0x361   :  { %5048 = vmatpush1.bf16.msra.mxu1 %v6666_v29 }
 0x362   :  { %5049 = vmatprep.subr.bf16.mxu1 %v6675_v63 }
 0x363   :  { %5157 = vmatpush1.bf16.msra.mxu0 %v6612_v30 }
 0x364   :  { %5158 = vmatprep.subr.bf16.mxu0 %v6621_v33 }
 0x365   :  { %5050 = vmatpush1.bf16.msra.mxu1 %v6674_v36 }
 0x366   :  { %5051 = vmatprep.subr.bf16.mxu1 %v6683_v37 }
 0x367   :  { %5159 = vmatpush1.bf16.msra.mxu0 %v6620_v34  ;;  %v3195_v34 = vld [vmem:[#allocation14 + $0x440] sm:$0xff] }
 0x368   :  { %5160 = vmatprep.subr.bf16.mxu0 %v6629_v42  ;;  %v6699_v54 = vcombine.high %v3195_v34, %v3199_v46 }
 0x369   :  { %5052 = vmatpush1.bf16.msra.mxu1 %v6682_v10  ;;  %v3200_v10 = vld [vmem:[#allocation14 + $0x468] sm:$0xff] }
 0x36a   :  { %5062 = vmatprep.subr.bf16.mxu1 %v6691_v50  ;;  %v6701_v56 = vcombine.high %v3196_v47, %v3200_v10 }
 0x36b   :  { %5161 = vmatpush1.bf16.msra.mxu0 %v6628_v52 }
 0x36c   :  { %5162 = vmatprep.subr.bf16.mxu0 %v6637_v53  ;;  %v3203_v53 = vld [vmem:[#allocation14 + $0x480] sm:$0xff] }
 0x36f   :  { %5163 = vmatpush1.bf16.msra.mxu0 %v6636_v57  ;;  %v3207_v57 = vld [vmem:[#allocation14 + $0x4a0] sm:$0xff] }
 0x370   :  { %5164 = vmatprep.subr.bf16.mxu0 %v6645_v58  ;;  %v3204_v58 = vld [vmem:[#allocation14 + $0x488] sm:$0xff]  ;;  %v6707_v62 = vcombine.high %v3203_v53, %v3207_v57  ;;  %v6706_v39 = vcombine.low %v3203_v53, %v3207_v57  ;;  %v1637_v53 = vrot.slane %v8419_v22, %v8368_v31 }
 0x371   :  { %v6709_v1 = vcombine.high %v3204_v58, %v3208_v59  ;;  %v6708_v40 = vcombine.low %v3204_v58, %v3208_v59  ;;  %v3256_v57 = vld [vmem:[#allocation14 + $0x628] sm:$0xff] }
 0x373   :  { %5165 = vmatpush1.bf16.msra.mxu0 %v6644_v16  ;;  %v6698_v16 = vcombine.low %v3195_v34, %v3199_v46 }
 0x374   :  { %5166 = vmatprep.subr.bf16.mxu0 %v6653_v61  ;;  %v6700_v61 = vcombine.low %v3196_v47, %v3200_v10  ;;  %v3251_v47 = vld [vmem:[#allocation14 + $0x600] sm:$0xff] }
 0x377   :  { %5167 = vmatpush1.bf16.msra.mxu0 %v6652_v2  ;;  %v3211_v2 = vld [vmem:[#allocation14 + $0x4c0] sm:$0xff] }
 0x378   :  { %5168 = vmatprep.subr.bf16.mxu0 %v6661_v3  ;;  %v3215_v3 = vld [vmem:[#allocation14 + $0x4e0] sm:$0xff] }
 0x379   :  { %v6715_v41 = vcombine.high %v3211_v2, %v3215_v3  ;;  %v6714_v8 = vcombine.low %v3211_v2, %v3215_v3 }
 0x37b   :  { %5169 = vmatpush1.bf16.msra.mxu0 %v6660_v5  ;;  %v3220_v5 = vld [vmem:[#allocation14 + $0x508] sm:$0xff] }
 0x37c   :  { %5170 = vmatprep.subr.bf16.mxu0 %v6669_v7  ;;  %v3224_v7 = vld [vmem:[#allocation14 + $0x528] sm:$0xff] }
 0x37f   :  { %5171 = vmatpush1.bf16.msra.mxu0 %v6668_v11 }
 0x380   :  { %5172 = vmatprep.subr.bf16.mxu0 %v6677_v12  ;;  %v6725_v12 = vcombine.high %v3220_v5, %v3224_v7 }
 0x383   :  { %5173 = vmatpush1.bf16.msra.mxu0 %v6676_v19  ;;  %v3228_v19 = vld [vmem:[#allocation14 + $0x548] sm:$0xff] }
 0x384   :  { %5174 = vmatprep.subr.bf16.mxu0 %v6685_v20  ;;  %v3232_v20 = vld [vmem:[#allocation14 + $0x568] sm:$0xff] }
 0x387   :  { %5175 = vmatpush1.bf16.msra.mxu0 %v6684_v21 }
 0x388   :  { %5185 = vmatprep.subr.bf16.mxu0 %v6693_v55  ;;  %v6724_v55 = vcombine.low %v3220_v5, %v3224_v7  ;;  %v3260_v5 = vld [vmem:[#allocation14 + $0x648] sm:$0xff] }
 0x389   :  { %v3264_v7 = vld [vmem:[#allocation14 + $0x668] sm:$0xff] }
 0x3dd   :  { %v2799_v26 = vpop.f32.mrb[8].mxu0  ;;  %v8427_v27 = vpop.f32.mrb[16].mxu1 }
 0x3de   :  { %v7174_v28 = vadd.f32 %v2799_v26, %v1621_v23  ;;  %v2801_v29 = vpop.f32.mrb[9].mxu0  ;;  %v2924_v63 = vpop.f32.mrb[17].mxu1  ;;  %v6731_v23 = vcombine.high %v3227_v13, %v3231_v14  ;;  %v3239_v26 = vld [vmem:[#allocation14 + $0x5a0] sm:$0xff] }
 0x3df   :  { %v7175_v30 = vadd.f32 %v2801_v29, %v1625_v24  ;;  %v7177_v6 = vadd.f32 %v2924_v63, %v1633_v25  ;;  %v2803_v32 = vpop.f32.mrb[10].mxu0  ;;  %v2926_v33 = vpop.f32.mrb[18].mxu1  ;;  %v6733_v24 = vcombine.high %v3228_v19, %v3232_v20  ;;  %v3235_v25 = vld [vmem:[#allocation14 + $0x580] sm:$0xff]  ;;  %v3240_v29 = vld [vmem:[#allocation14 + $0x5a8] sm:$0xff]  ;;  %v6730_v63 = vcombine.low %v3227_v13, %v3231_v14 }
 0x3e0   :  { %v3049_v44 = vmax.f32 %v7174_v28, 0.0  ;;  %v2804_v35 = vpop.f32.mrb[11].mxu0  ;;  %v2927_v36 = vpop.f32.mrb[19].mxu1  ;;  %v3236_v28 = vld [vmem:[#allocation14 + $0x588] sm:$0xff]  ;;  %v3243_v33 = vld [vmem:[#allocation14 + $0x5c0] sm:$0xff]  ;;  %v6765_v13 = vcombine.high %v3260_v5, %v3264_v7 }
 0x3e1   :  { %v3050_v37 = vmax.f32 %v7175_v30, 0.0  ;;  %v3052_v42 = vmax.f32 %v7177_v6, 0.0  ;;  %v6732_v30 = vcombine.low %v3228_v19, %v3232_v20  ;;  %v6739_v6 = vcombine.high %v3235_v25, %v3239_v26  ;;  %v3244_v35 = vld [vmem:[#allocation14 + $0x5c8] sm:$0xff]  ;;  %v3267_v14 = vld [vmem:[#allocation14 + $0x680] sm:$0xff] }
 0x3e2   :  { %v8431_v52 = vpack.c.bf16 %v3049_v44, %v3049_v44  ;;  %v6741_v32 = vcombine.high %v3236_v28, %v3240_v29  ;;  %v3247_v44 = vld [vmem:[#allocation14 + $0x5e0] sm:$0xff]  ;;  %v3248_v36 = vld [vmem:[#allocation14 + $0x5e8] sm:$0xff]  ;;  %v6740_v34 = vcombine.low %v3236_v28, %v3240_v29 }
 0x3e3   :  { %v8429_v50 = vpack.c.bf16 %v3050_v37, %v3050_v37  ;;  %v8435_v60 = vpack.c.bf16 %v3052_v42, %v3052_v42  ;;  %v6738_v37 = vcombine.low %v3235_v25, %v3239_v26  ;;  %v6747_v42 = vcombine.high %v3243_v33, %v3247_v44  ;;  %v3271_v19 = vld [vmem:[#allocation14 + $0x6a0] sm:$0xff]  ;;  %v3268_v20 = vld [vmem:[#allocation14 + $0x688] sm:$0xff] }
 0x3e4   :  { %v6749_v46 = vcombine.high %v3244_v35, %v3248_v36  ;;  %v6748_v2 = vcombine.low %v3244_v35, %v3248_v36  ;;  %v3275_v26 = vld [vmem:[#allocation14 + $0x6c0] sm:$0xff]  ;;  %v3276_v29 = vld [vmem:[#allocation14 + $0x6c8] sm:$0xff] }
 0x3e5   :  { %5053 = vmatprep.mubr.bf16.mxu1 %v8429_v50  ;;  %5176 = vmatprep.mubr.bf16.mxu0 %v8429_v50  ;;  %v3279_v28 = vld [vmem:[#allocation14 + $0x6e0] sm:$0xff]  ;;  %v3284_v36 = vld [vmem:[#allocation14 + $0x708] sm:$0xff] }
 0x3e6   :  { %5054 = vmatmul.mubr.bf16.vlgmr.msra.gmra.mrb[24].mxu1 %v8431_v52  ;;  %5177 = vmatmul.mubr.bf16.vlgmr.msra.gmra.mrb[20].mxu0 %v8431_v52  ;;  %v3287_v35 = vld [vmem:[#allocation14 + $0x720] sm:$0xff] }
 0x3e7   :  { %5063 = vmatpush1.bf16.msra.mxu1 %v6690_v48  ;;  %5186 = vmatpush1.bf16.msra.mxu0 %v6692_v49  ;;  %v3219_v48 = vld [vmem:[#allocation14 + $0x500] sm:$0xff] }
 0x3e8   :  { %5094 = vmatprep.mubr.bf16.mxu1 %v8435_v60  ;;  %5217 = vmatprep.mubr.bf16.mxu0 %v8435_v60  ;;  %v3223_v49 = vld [vmem:[#allocation14 + $0x520] sm:$0xff] }
 0x3e9   :  { %5064 = vmatprep.subr.bf16.mxu1 %v6699_v54  ;;  %5187 = vmatprep.subr.bf16.mxu0 %v6701_v56  ;;  %v6723_v11 = vcombine.high %v3219_v48, %v3223_v49  ;;  %v6722_v21 = vcombine.low %v3219_v48, %v3223_v49  ;;  %v3255_v54 = vld [vmem:[#allocation14 + $0x620] sm:$0xff]  ;;  %v3252_v56 = vld [vmem:[#allocation14 + $0x608] sm:$0xff] }
 0x3ea   :  { %v3263_v49 = vld [vmem:[#allocation14 + $0x660] sm:$0xff] }
 0x3eb   :  { %5065 = vmatpush1.bf16.msra.mxu1 %v6698_v16  ;;  %5188 = vmatpush1.bf16.msra.mxu0 %v6700_v61 }
 0x3ec   :  { %5066 = vmatprep.subr.bf16.mxu1 %v6707_v62  ;;  %5189 = vmatprep.subr.bf16.mxu0 %v6709_v1  ;;  %v6746_v1 = vcombine.low %v3243_v33, %v3247_v44  ;;  %v3283_v44 = vld [vmem:[#allocation14 + $0x700] sm:$0xff] }
 0x3ef   :  { %5067 = vmatpush1.bf16.msra.mxu1 %v6706_v39  ;;  %5190 = vmatpush1.bf16.msra.mxu0 %v6708_v40  ;;  %v6755_v39 = vcombine.high %v3251_v47, %v3255_v54  ;;  %v6757_v40 = vcombine.high %v3252_v56, %v3256_v57 }
 0x3f0   :  { %5068 = vmatprep.subr.bf16.mxu1 %v6715_v41  ;;  %5191 = vmatprep.subr.bf16.mxu0 %v6717_v43  ;;  %v3259_v41 = vld [vmem:[#allocation14 + $0x640] sm:$0xff] }
 0x3f3   :  { %5069 = vmatpush1.bf16.msra.mxu1 %v6714_v8  ;;  %5192 = vmatpush1.bf16.msra.mxu0 %v6716_v9  ;;  %v6754_v8 = vcombine.low %v3251_v47, %v3255_v54  ;;  %v6756_v9 = vcombine.low %v3252_v56, %v3256_v57  ;;  %v3292_v54 = vld [vmem:[#allocation14 + $0x748] sm:$0xff]  ;;  %v6786_v57 = vcombine.low %v3283_v44, %v3287_v35 }
 0x3f4   :  { %5070 = vmatprep.subr.bf16.mxu1 %v6723_v11  ;;  %5193 = vmatprep.subr.bf16.mxu0 %v6725_v12  ;;  %v6763_v12 = vcombine.high %v3259_v41, %v3263_v49  ;;  %v3296_v56 = vld [vmem:[#allocation14 + $0x768] sm:$0xff] }
 0x3f7   :  { %5071 = vmatpush1.bf16.msra.mxu1 %v6722_v21  ;;  %5194 = vmatpush1.bf16.msra.mxu0 %v6724_v55  ;;  %v3272_v21 = vld [vmem:[#allocation14 + $0x6a8] sm:$0xff]  ;;  %v6762_v55 = vcombine.low %v3259_v41, %v3263_v49  ;;  %v3307_v41 = vld [vmem:[#allocation14 + $0x7c0] sm:$0xff] }
 0x3f8   :  { %5072 = vmatprep.subr.bf16.mxu1 %v6731_v23  ;;  %5195 = vmatprep.subr.bf16.mxu0 %v6733_v24  ;;  %v6764_v23 = vcombine.low %v3260_v5, %v3264_v7  ;;  %v6771_v24 = vcombine.high %v3267_v14, %v3271_v19  ;;  %v6773_v25 = vcombine.high %v3268_v20, %v3272_v21  ;;  %v3312_v49 = vld [vmem:[#allocation14 + $0x7e8] sm:$0xff] }
 0x3fb   :  { %5073 = vmatpush1.bf16.msra.mxu1 %v6730_v63  ;;  %5196 = vmatpush1.bf16.msra.mxu0 %v6732_v30  ;;  %v3280_v63 = vld [vmem:[#allocation14 + $0x6e8] sm:$0xff]  ;;  %v6770_v30 = vcombine.low %v3267_v14, %v3271_v19  ;;  %v3319_v14 = vld [vmem:[#allocation14 + $0x820] sm:$0xff] }
 0x3fc   :  { %5074 = vmatprep.subr.bf16.mxu1 %v6739_v6  ;;  %5197 = vmatprep.subr.bf16.mxu0 %v6741_v32  ;;  %v6772_v6 = vcombine.low %v3268_v20, %v3272_v21  ;;  %v6779_v32 = vcombine.high %v3275_v26, %v3279_v28  ;;  %v6781_v33 = vcombine.high %v3276_v29, %v3280_v63  ;;  %v3316_v19 = vld [vmem:[#allocation14 + $0x808] sm:$0xff] }
 0x3fd   :  { %v6997_v10 = vpop.f32.mrb[12].mxu0  ;;  %v3320_v20 = vld [vmem:[#allocation14 + $0x828] sm:$0xff] }
 0x3fe   :  { %v7019_v58 = vpop.f32.mrb[20].mxu1  ;;  %v6998_v59 = vpop.f32.mrb[13].mxu0 }
 0x3ff   :  { %v6999_v16 = vadd.f32 %v6998_v59, %v6997_v10  ;;  %v7020_v61 = vpop.f32.mrb[21].mxu1  ;;  %5075 = vmatpush1.bf16.msra.mxu1 %v6738_v37  ;;  %5198 = vmatpush1.bf16.msra.mxu0 %v6740_v34  ;;  %v7000_v62 = vpop.f32.mrb[14].mxu0  ;;  %v3288_v37 = vld [vmem:[#allocation14 + $0x728] sm:$0xff]  ;;  %v6778_v34 = vcombine.low %v3275_v26, %v3279_v28  ;;  %v3291_v10 = vld [vmem:[#allocation14 + $0x740] sm:$0xff] }
 0x400   :  { %v7021_v3 = vadd.f32 %v7020_v61, %v7019_v58  ;;  %v7022_v38 = vpop.f32.mrb[22].mxu1  ;;  %v7001_v4 = vpop.f32.mrb[15].mxu0  ;;  %5076 = vmatprep.subr.bf16.mxu1 %v6747_v42  ;;  %5199 = vmatprep.subr.bf16.mxu0 %v6749_v46  ;;  %v6780_v42 = vcombine.low %v3276_v29, %v3280_v63  ;;  %v6787_v46 = vcombine.high %v3283_v44, %v3287_v35  ;;  %v3299_v61 = vld [vmem:[#allocation14 + $0x780] sm:$0xff] }
 0x401   :  { %v2964_v43 = vadd.f32 %v6999_v16, %v1637_v53  ;;  %v7023_v48 = vpop.f32.mrb[23].mxu1  ;;  %v6789_v47 = vcombine.high %v3284_v36, %v3288_v37  ;;  %v3295_v53 = vld [vmem:[#allocation14 + $0x760] sm:$0xff]  ;;  %v6788_v58 = vcombine.low %v3284_v36, %v3288_v37  ;;  %v6797_v16 = vcombine.high %v3292_v54, %v3296_v56 }
 0x402   :  { %v6795_v59 = vcombine.high %v3291_v10, %v3295_v53  ;;  %v3303_v62 = vld [vmem:[#allocation14 + $0x7a0] sm:$0xff]  ;;  %v6796_v38 = vcombine.low %v3292_v54, %v3296_v56  ;;  %v1629_v4 = vrot.slane %v8419_v22, %v8321_v51  ;;  %v3308_v48 = vld [vmem:[#allocation14 + $0x7c8] sm:$0xff]  ;;  %v6821_v29 = vcombine.high %v3316_v19, %v3320_v20 }
 0x403   :  { %5077 = vmatpush1.bf16.msra.mxu1 %v6746_v1  ;;  %5200 = vmatpush1.bf16.msra.mxu0 %v6748_v2  ;;  %v8449_v11 = vadd.f32 %v7021_v3, %v2964_v43  ;;  %v3300_v1 = vld [vmem:[#allocation14 + $0x788] sm:$0xff]  ;;  %v6794_v3 = vcombine.low %v3291_v10, %v3295_v53  ;;  %v3311_v43 = vld [vmem:[#allocation14 + $0x7e0] sm:$0xff]  ;;  %v6802_v5 = vcombine.low %v3299_v61, %v3303_v62 }
 0x404   :  { %5078 = vmatprep.subr.bf16.mxu1 %v6755_v39  ;;  %5201 = vmatprep.subr.bf16.mxu0 %v6757_v40  ;;  %v3304_v2 = vld [vmem:[#allocation14 + $0x7a8] sm:$0xff]  ;;  %v6803_v39 = vcombine.high %v3299_v61, %v3303_v62  ;;  %v3323_v63 = vld [vmem:[#allocation14 + $0x840] sm:$0xff] }
 0x405   :  { %v6805_v40 = vcombine.high %v3300_v1, %v3304_v2  ;;  %v6804_v7 = vcombine.low %v3300_v1, %v3304_v2  ;;  %v3331_v37 = vld [vmem:[#allocation14 + $0x880] sm:$0xff] }
 0x406   :  { %v3339_v56 = vld [vmem:[#allocation14 + $0x8c0] sm:$0xff] }
 0x407   :  { %5079 = vmatpush1.bf16.msra.mxu1 %v6754_v8  ;;  %5202 = vmatpush1.bf16.msra.mxu0 %v6756_v9  ;;  %v7176_v8 = vadd.f32 %v8427_v27, %v1629_v4  ;;  %v6811_v9 = vcombine.high %v3307_v41, %v3311_v43  ;;  %v3347_v2 = vld [vmem:[#allocation14 + $0x900] sm:$0xff]  ;;  %v3352_v4 = vld [vmem:[#allocation14 + $0x928] sm:$0xff] }
 0x408   :  { %5080 = vmatprep.subr.bf16.mxu1 %v6763_v12  ;;  %5203 = vmatprep.subr.bf16.mxu0 %v6765_v13  ;;  %v6813_v12 = vcombine.high %v3308_v48, %v3312_v49  ;;  %v3315_v13 = vld [vmem:[#allocation14 + $0x800] sm:$0xff] }
 0x409   :  { %v3051_v26 = vmax.f32 %v7176_v8, 0.0  ;;  %v6819_v28 = vcombine.high %v3315_v13, %v3319_v14 }
 0x40b   :  { %5081 = vmatpush1.bf16.msra.mxu1 %v6762_v55  ;;  %5204 = vmatpush1.bf16.msra.mxu0 %v6764_v23  ;;  %v8457_v44 = vpack.c.bf16 %v3051_v26, %v3051_v26  ;;  %v3371_v26 = vld [vmem:[#allocation14 + $0x9c0] sm:$0xff] }
 0x40c   :  { %5082 = vmatprep.subr.bf16.mxu1 %v6771_v24  ;;  %5205 = vmatprep.subr.bf16.mxu0 %v6773_v25  ;;  %v6810_v24 = vcombine.low %v3307_v41, %v3311_v43  ;;  %v6812_v25 = vcombine.low %v3308_v48, %v3312_v49  ;;  %v3355_v48 = vld [vmem:[#allocation14 + $0x940] sm:$0xff] }
 0x40d   :  { %v3359_v49 = vld [vmem:[#allocation14 + $0x960] sm:$0xff] }
 0x40f   :  { %5083 = vmatpush1.bf16.msra.mxu1 %v6770_v30  ;;  %5206 = vmatpush1.bf16.msra.mxu0 %v6772_v6  ;;  %v3327_v30 = vld [vmem:[#allocation14 + $0x860] sm:$0xff]  ;;  %v3324_v6 = vld [vmem:[#allocation14 + $0x848] sm:$0xff] }
 0x410   :  { %5084 = vmatprep.subr.bf16.mxu1 %v6779_v32  ;;  %5207 = vmatprep.subr.bf16.mxu0 %v6781_v33  ;;  %v3328_v32 = vld [vmem:[#allocation14 + $0x868] sm:$0xff]  ;;  %v6820_v33 = vcombine.low %v3316_v19, %v3320_v20  ;;  %v6827_v35 = vcombine.high %v3323_v63, %v3327_v30 }
 0x411   :  { %v6829_v36 = vcombine.high %v3324_v6, %v3328_v32  ;;  %v6828_v10 = vcombine.low %v3324_v6, %v3328_v32  ;;  %v3364_v19 = vld [vmem:[#allocation14 + $0x988] sm:$0xff] }
 0x412   :  { %v3368_v20 = vld [vmem:[#allocation14 + $0x9a8] sm:$0xff] }
 0x413   :  { %5085 = vmatpush1.bf16.msra.mxu1 %v6778_v34  ;;  %5208 = vmatpush1.bf16.msra.mxu0 %v6780_v42  ;;  %v3335_v34 = vld [vmem:[#allocation14 + $0x8a0] sm:$0xff]  ;;  %v3332_v42 = vld [vmem:[#allocation14 + $0x888] sm:$0xff] }
 0x414   :  { %5086 = vmatprep.subr.bf16.mxu1 %v6787_v46  ;;  %5209 = vmatprep.subr.bf16.mxu0 %v6789_v47  ;;  %v3336_v46 = vld [vmem:[#allocation14 + $0x8a8] sm:$0xff]  ;;  %v6826_v47 = vcombine.low %v3323_v63, %v3327_v30  ;;  %v6835_v53 = vcombine.high %v3331_v37, %v3335_v34  ;;  %v6868_v30 = vcombine.low %v3364_v19, %v3368_v20 }
 0x415   :  { %v6837_v54 = vcombine.high %v3332_v42, %v3336_v46  ;;  %v6836_v61 = vcombine.low %v3332_v42, %v3336_v46 }
 0x417   :  { %5087 = vmatpush1.bf16.msra.mxu1 %v6786_v57  ;;  %5210 = vmatpush1.bf16.msra.mxu0 %v6788_v58  ;;  %v3343_v57 = vld [vmem:[#allocation14 + $0x8e0] sm:$0xff]  ;;  %v3340_v58 = vld [vmem:[#allocation14 + $0x8c8] sm:$0xff] }
 0x418   :  { %5088 = vmatprep.subr.bf16.mxu1 %v6795_v59  ;;  %5211 = vmatprep.subr.bf16.mxu0 %v6797_v16  ;;  %v3344_v59 = vld [vmem:[#allocation14 + $0x8e8] sm:$0xff]  ;;  %v6834_v16 = vcombine.low %v3331_v37, %v3335_v34  ;;  %v6843_v62 = vcombine.high %v3339_v56, %v3343_v57 }
 0x419   :  { %v6845_v1 = vcombine.high %v3340_v58, %v3344_v59 }
 0x41b   :  { %5089 = vmatpush1.bf16.msra.mxu1 %v6794_v3  ;;  %5212 = vmatpush1.bf16.msra.mxu0 %v6796_v38  ;;  %v3351_v3 = vld [vmem:[#allocation14 + $0x920] sm:$0xff]  ;;  %v3348_v38 = vld [vmem:[#allocation14 + $0x908] sm:$0xff] }
 0x41c   :  { %5090 = vmatprep.subr.bf16.mxu1 %v6803_v39  ;;  %5213 = vmatprep.subr.bf16.mxu0 %v6805_v40  ;;  %v6842_v39 = vcombine.low %v3339_v56, %v3343_v57  ;;  %v6844_v40 = vcombine.low %v3340_v58, %v3344_v59  ;;  %v6851_v41 = vcombine.high %v3347_v2, %v3351_v3  ;;  %v3074_v56 = vld [vmem:[#allocation14 + $0x78] sm:$0xff] }
 0x41d   :  { %v3043_v22 = vpop.f32.mrb[16].mxu0  ;;  %v6853_v43 = vcombine.high %v3348_v38, %v3352_v4  ;;  %v6850_v8 = vcombine.low %v3347_v2, %v3351_v3  ;;  %v3082_v2 = vld [vmem:[#allocation14 + $0xb8] sm:$0xff] }
 0x41e   :  { %v8455_v21 = vadd.f32 %v3043_v22, %v8449_v11  ;;  %v7168_v55 = vpop.f32.mrb[17].mxu0  ;;  %v6818_v11 = vcombine.low %v3315_v13, %v3319_v14  ;;  %v3363_v22 = vld [vmem:[#allocation14 + $0x980] sm:$0xff] }
 0x41f   :  { %5091 = vmatpush1.bf16.msra.mxu1 %v6802_v5  ;;  %5214 = vmatpush1.bf16.msra.mxu0 %v6804_v7  ;;  %v3046_v23 = vpop.f32.mrb[18].mxu0  ;;  %v3356_v5 = vld [vmem:[#allocation14 + $0x948] sm:$0xff]  ;;  %v3367_v14 = vld [vmem:[#allocation14 + $0x9a0] sm:$0xff]  ;;  %v6858_v55 = vcombine.low %v3355_v48, %v3359_v49 }
 0x420   :  { %v7169_v27 = vpop.f32.mrb[19].mxu0  ;;  %5092 = vmatprep.subr.bf16.mxu1 %v6811_v9  ;;  %5215 = vmatprep.subr.bf16.mxu0 %v6813_v12  ;;  %v3360_v7 = vld [vmem:[#allocation14 + $0x968] sm:$0xff]  ;;  %v6852_v9 = vcombine.low %v3348_v38, %v3352_v4  ;;  %v6859_v12 = vcombine.high %v3355_v48, %v3359_v49  ;;  %v6866_v63 = vcombine.low %v3363_v22, %v3367_v14  ;;  %v3053_v42 = vmax.f32 %v8455_v21, 0.0  ;;  %v3081_v21 = vld [vmem:[#allocation14 + $0xb0] sm:$0xff]  ;;  %v3090_v48 = vld [vmem:[#allocation14 + $0xf8] sm:$0xff] }
 0x421   :  { %v6861_v13 = vcombine.high %v3356_v5, %v3360_v7  ;;  %v6860_v23 = vcombine.low %v3356_v5, %v3360_v7  ;;  %v3375_v27 = vld [vmem:[#allocation14 + $0x9e0] sm:$0xff] }
 0x422   :  { %v6875_v6 = vcombine.high %v3371_v26, %v3375_v27  ;;  %v6874_v37 = vcombine.low %v3371_v26, %v3375_v27  ;;  %v8464_v58 = vpack.c.bf16 %v3053_v42, %v3053_v42  ;;  %v3118_v42 = vld [vmem:[#allocation14 + $0x1d8] sm:$0xff] }
 0x423   :  { %5093 = vmatpush1.bf16.msra.mxu1 %v6810_v24  ;;  %5216 = vmatpush1.bf16.msra.mxu0 %v6812_v25  ;;  %v6867_v24 = vcombine.high %v3363_v22, %v3367_v14  ;;  %v6869_v25 = vcombine.high %v3364_v19, %v3368_v20 }
 0x424   :  { %5103 = vmatprep.subr.bf16.mxu1 %v6819_v28  ;;  %5226 = vmatprep.subr.bf16.mxu0 %v6821_v29  ;;  %v3372_v28 = vld [vmem:[#allocation14 + $0x9c8] sm:$0xff] }
 0x425   :  { %v3376_v29 = vld [vmem:[#allocation14 + $0x9e8] sm:$0xff] }
 0x426   :  { %5095 = vmatmul.mubr.bf16.vlgmr.msra.gmra.mrb[24].mxu1 %v8457_v44  ;;  %5218 = vmatmul.mubr.bf16.vlgmr.msra.gmra.mrb[20].mxu0 %v8457_v44  ;;  %v6877_v32 = vcombine.high %v3372_v28, %v3376_v29  ;;  %v6876_v34 = vcombine.low %v3372_v28, %v3376_v29 }
 0x427   :  { %5104 = vmatpush1.bf16.msra.mxu1 %v6818_v11  ;;  %5227 = vmatpush1.bf16.msra.mxu0 %v6820_v33  ;;  %v3061_v11 = vld [vmem:[#allocation14 + $0x10] sm:$0xff] }
 0x428   :  { %5105 = vmatprep.subr.bf16.mxu1 %v6827_v35  ;;  %5228 = vmatprep.subr.bf16.mxu0 %v6829_v36  ;;  %v3065_v33 = vld [vmem:[#allocation14 + $0x30] sm:$0xff]  ;;  %v3062_v35 = vld [vmem:[#allocation14 + $0x18] sm:$0xff] }
 0x429   :  { %5135 = vmatprep.mubr.bf16.mxu1 %v8086_v0  ;;  %5258 = vmatprep.mubr.bf16.mxu0 %v8086_v0  ;;  %v3066_v36 = vld [vmem:[#allocation14 + $0x38] sm:$0xff]  ;;  %v6567_v46 = vcombine.high %v3061_v11, %v3065_v33  ;;  %v6566_v57 = vcombine.low %v3061_v11, %v3065_v33 }
 0x42a   :  { %v6568_v59 = vcombine.low %v3062_v35, %v3066_v36 }
 0x42b   :  { %5106 = vmatpush1.bf16.msra.mxu1 %v6826_v47  ;;  %5229 = vmatpush1.bf16.msra.mxu0 %v6828_v10  ;;  %v6569_v47 = vcombine.high %v3062_v35, %v3066_v36  ;;  %v3069_v10 = vld [vmem:[#allocation14 + $0x50] sm:$0xff] }
 0x42c   :  { %5107 = vmatprep.subr.bf16.mxu1 %v6835_v53  ;;  %5230 = vmatprep.subr.bf16.mxu0 %v6837_v54  ;;  %v3073_v53 = vld [vmem:[#allocation14 + $0x70] sm:$0xff]  ;;  %v3070_v54 = vld [vmem:[#allocation14 + $0x58] sm:$0xff] }
 0x42d   :  { %v6574_v3 = vcombine.low %v3069_v10, %v3073_v53  ;;  %v6576_v38 = vcombine.low %v3070_v54, %v3074_v56 }
 0x42f   :  { %5108 = vmatpush1.bf16.msra.mxu1 %v6834_v16  ;;  %5231 = vmatpush1.bf16.msra.mxu0 %v6836_v61  ;;  %v6575_v16 = vcombine.high %v3069_v10, %v3073_v53  ;;  %v6577_v61 = vcombine.high %v3070_v54, %v3074_v56  ;;  %v3125_v56 = vld [vmem:[#allocation14 + $0x210] sm:$0xff] }
 0x430   :  { %5109 = vmatprep.subr.bf16.mxu1 %v6843_v62  ;;  %5232 = vmatprep.subr.bf16.mxu0 %v6845_v1  ;;  %v3077_v62 = vld [vmem:[#allocation14 + $0x90] sm:$0xff]  ;;  %v3078_v1 = vld [vmem:[#allocation14 + $0x98] sm:$0xff] }
 0x431   :  { %v6583_v4 = vcombine.high %v3077_v62, %v3081_v21  ;;  %v6582_v49 = vcombine.low %v3077_v62, %v3081_v21  ;;  %v6584_v5 = vcombine.low %v3078_v1, %v3082_v2 }
 0x433   :  { %5110 = vmatpush1.bf16.msra.mxu1 %v6842_v39  ;;  %5233 = vmatpush1.bf16.msra.mxu0 %v6844_v40  ;;  %v6585_v39 = vcombine.high %v3078_v1, %v3082_v2  ;;  %v3085_v40 = vld [vmem:[#allocation14 + $0xd0] sm:$0xff] }
 0x434   :  { %5111 = vmatprep.subr.bf16.mxu1 %v6851_v41  ;;  %5234 = vmatprep.subr.bf16.mxu0 %v6853_v43  ;;  %v3089_v41 = vld [vmem:[#allocation14 + $0xf0] sm:$0xff]  ;;  %v3086_v43 = vld [vmem:[#allocation14 + $0xd8] sm:$0xff] }
 0x435   :  { %v6591_v7 = vcombine.high %v3085_v40, %v3089_v41  ;;  %v6590_v22 = vcombine.low %v3085_v40, %v3089_v41  ;;  %v6592_v14 = vcombine.low %v3086_v43, %v3090_v48  ;;  %v3133_v2 = vld [vmem:[#allocation14 + $0x250] sm:$0xff] }
 0x437   :  { %5112 = vmatpush1.bf16.msra.mxu1 %v6850_v8  ;;  %5235 = vmatpush1.bf16.msra.mxu0 %v6852_v9  ;;  %v6593_v8 = vcombine.high %v3086_v43, %v3090_v48  ;;  %v3093_v9 = vld [vmem:[#allocation14 + $0x110] sm:$0xff] }
 0x438   :  { %5113 = vmatprep.subr.bf16.mxu1 %v6859_v12  ;;  %5236 = vmatprep.subr.bf16.mxu0 %v6861_v13  ;;  %v3097_v12 = vld [vmem:[#allocation14 + $0x130] sm:$0xff]  ;;  %v3098_v13 = vld [vmem:[#allocation14 + $0x138] sm:$0xff] }
 0x439   :  { %v6599_v19 = vcombine.high %v3093_v9, %v3097_v12  ;;  %v6598_v26 = vcombine.low %v3093_v9, %v3097_v12  ;;  %v3141_v48 = vld [vmem:[#allocation14 + $0x290] sm:$0xff] }
 0x43b   :  { %5114 = vmatpush1.bf16.msra.mxu1 %v6858_v55  ;;  %5237 = vmatpush1.bf16.msra.mxu0 %v6860_v23  ;;  %v3101_v55 = vld [vmem:[#allocation14 + $0x150] sm:$0xff] }
 0x43c   :  { %5115 = vmatprep.subr.bf16.mxu1 %v6867_v24  ;;  %5238 = vmatprep.subr.bf16.mxu0 %v6869_v25  ;;  %v3105_v23 = vld [vmem:[#allocation14 + $0x170] sm:$0xff]  ;;  %v3102_v24 = vld [vmem:[#allocation14 + $0x158] sm:$0xff] }
 0x43d   :  { %v3106_v25 = vld [vmem:[#allocation14 + $0x178] sm:$0xff]  ;;  %v6607_v28 = vcombine.high %v3101_v55, %v3105_v23  ;;  %v6606_v11 = vcombine.low %v3101_v55, %v3105_v23 }
 0x43e   :  { %v6609_v29 = vcombine.high %v3102_v24, %v3106_v25  ;;  %v6608_v33 = vcombine.low %v3102_v24, %v3106_v25  ;;  %v3157_v25 = vld [vmem:[#allocation14 + $0x310] sm:$0xff] }
 0x43f   :  { %5116 = vmatpush1.bf16.msra.mxu1 %v6866_v63  ;;  %5239 = vmatpush1.bf16.msra.mxu0 %v6868_v30  ;;  %v3109_v63 = vld [vmem:[#allocation14 + $0x190] sm:$0xff] }
 0x440   :  { %5117 = vmatprep.subr.bf16.mxu1 %v6875_v6  ;;  %5240 = vmatprep.subr.bf16.mxu0 %v6877_v32  ;;  %v3113_v30 = vld [vmem:[#allocation14 + $0x1b0] sm:$0xff]  ;;  %v3110_v6 = vld [vmem:[#allocation14 + $0x198] sm:$0xff] }
 0x441   :  { %v3114_v32 = vld [vmem:[#allocation14 + $0x1b8] sm:$0xff]  ;;  %v6615_v35 = vcombine.high %v3109_v63, %v3113_v30 }
 0x442   :  { %v6617_v36 = vcombine.high %v3110_v6, %v3114_v32  ;;  %v6616_v10 = vcombine.low %v3110_v6, %v3114_v32  ;;  %v3165_v32 = vld [vmem:[#allocation14 + $0x350] sm:$0xff] }
 0x443   :  { %5118 = vmatpush1.bf16.msra.mxu1 %v6874_v37  ;;  %5241 = vmatpush1.bf16.msra.mxu0 %v6876_v34  ;;  %v3117_v37 = vld [vmem:[#allocation14 + $0x1d0] sm:$0xff] }
 0x444   :  { %5267 = vmatprep.subr.bf16.mxu1 %v6567_v46  ;;  %5390 = vmatprep.subr.bf16.mxu0 %v6569_v47  ;;  %v3121_v34 = vld [vmem:[#allocation14 + $0x1f0] sm:$0xff]  ;;  %v3122_v46 = vld [vmem:[#allocation14 + $0x1f8] sm:$0xff]  ;;  %v6614_v47 = vcombine.low %v3109_v63, %v3113_v30 }
 0x445   :  { %v6623_v53 = vcombine.high %v3117_v37, %v3121_v34  ;;  %v6625_v54 = vcombine.high %v3118_v42, %v3122_v46  ;;  %v6624_v62 = vcombine.low %v3118_v42, %v3122_v46  ;;  %v3173_v46 = vld [vmem:[#allocation14 + $0x390] sm:$0xff] }
 0x446   :  { %5136 = vmatmul.mubr.bf16.vlgmr.msra.gmra.mrb[24].mxu1 %v8464_v58  ;;  %5259 = vmatmul.mubr.bf16.vlgmr.msra.gmra.mrb[20].mxu0 %v8464_v58 }
 0x447   :  { %5268 = vmatpush1.bf16.msra.mxu1 %v6566_v57  ;;  %5299 = vmatprep.mubr.bf16.mxu1 %v8429_v50  ;;  %v3129_v57 = vld [vmem:[#allocation14 + $0x230] sm:$0xff] }
 0x448   :  { %5391 = vmatpush1.bf16.msra.mxu0 %v6568_v59  ;;  %5422 = vmatprep.mubr.bf16.mxu0 %v8429_v50  ;;  %v3094_v50 = vld [vmem:[#allocation14 + $0x118] sm:$0xff]  ;;  %v6631_v21 = vcombine.high %v3125_v56, %v3129_v57 }
 0x449   :  { %5269 = vmatprep.subr.bf16.mxu1 %v6575_v16  ;;  %5392 = vmatprep.subr.bf16.mxu0 %v6577_v61  ;;  %v6601_v20 = vcombine.high %v3094_v50, %v3098_v13  ;;  %v6600_v27 = vcombine.low %v3094_v50, %v3098_v13  ;;  %v3126_v59 = vld [vmem:[#allocation14 + $0x218] sm:$0xff]  ;;  %v6622_v61 = vcombine.low %v3117_v37, %v3121_v34  ;;  %v3149_v13 = vld [vmem:[#allocation14 + $0x2d0] sm:$0xff] }
 0x44a   :  { %v3130_v16 = vld [vmem:[#allocation14 + $0x238] sm:$0xff] }
 0x44b   :  { %5270 = vmatpush1.bf16.msra.mxu1 %v6574_v3  ;;  %v6633_v1 = vcombine.high %v3126_v59, %v3130_v16  ;;  %v3137_v3 = vld [vmem:[#allocation14 + $0x270] sm:$0xff]  ;;  %v6632_v40 = vcombine.low %v3126_v59, %v3130_v16 }
 0x44c   :  { %5393 = vmatpush1.bf16.msra.mxu0 %v6576_v38  ;;  %5271 = vmatprep.subr.bf16.mxu1 %v6583_v4  ;;  %v3134_v38 = vld [vmem:[#allocation14 + $0x258] sm:$0xff]  ;;  %v6639_v41 = vcombine.high %v3133_v2, %v3137_v3  ;;  %v3181_v16 = vld [vmem:[#allocation14 + $0x3d0] sm:$0xff] }
 0x44d   :  { %5394 = vmatprep.subr.bf16.mxu0 %v6585_v39  ;;  %v3138_v4 = vld [vmem:[#allocation14 + $0x278] sm:$0xff]  ;;  %v6630_v39 = vcombine.low %v3125_v56, %v3129_v57 }
 0x44e   :  { %v6641_v43 = vcombine.high %v3134_v38, %v3138_v4  ;;  %v6640_v9 = vcombine.low %v3134_v38, %v3138_v4  ;;  %v3189_v4 = vld [vmem:[#allocation14 + $0x410] sm:$0xff] }
 0x44f   :  { %5272 = vmatpush1.bf16.msra.mxu1 %v6582_v49  ;;  %v3145_v49 = vld [vmem:[#allocation14 + $0x2b0] sm:$0xff] }
 0x450   :  { %5395 = vmatpush1.bf16.msra.mxu0 %v6584_v5  ;;  %5273 = vmatprep.subr.bf16.mxu1 %v6591_v7  ;;  %v3142_v5 = vld [vmem:[#allocation14 + $0x298] sm:$0xff]  ;;  %v6647_v12 = vcombine.high %v3141_v48, %v3145_v49 }
 0x451   :  { %5396 = vmatprep.subr.bf16.mxu0 %v6593_v8  ;;  %v3146_v7 = vld [vmem:[#allocation14 + $0x2b8] sm:$0xff]  ;;  %v6638_v8 = vcombine.low %v3133_v2, %v3137_v3 }
 0x452   :  { %v6649_v50 = vcombine.high %v3142_v5, %v3146_v7  ;;  %v6648_v55 = vcombine.low %v3142_v5, %v3146_v7  ;;  %v3197_v7 = vld [vmem:[#allocation14 + $0x450] sm:$0xff] }
 0x453   :  { %5274 = vmatpush1.bf16.msra.mxu1 %v6590_v22  ;;  %v3153_v22 = vld [vmem:[#allocation14 + $0x2f0] sm:$0xff] }
 0x454   :  { %5397 = vmatpush1.bf16.msra.mxu0 %v6592_v14  ;;  %5275 = vmatprep.subr.bf16.mxu1 %v6599_v19  ;;  %v3150_v14 = vld [vmem:[#allocation14 + $0x2d8] sm:$0xff]  ;;  %v6655_v23 = vcombine.high %v3149_v13, %v3153_v22 }
 0x455   :  { %5398 = vmatprep.subr.bf16.mxu0 %v6601_v20  ;;  %v3154_v19 = vld [vmem:[#allocation14 + $0x2f8] sm:$0xff]  ;;  %v6646_v20 = vcombine.low %v3141_v48, %v3145_v49 }
 0x456   :  { %v6657_v24 = vcombine.high %v3150_v14, %v3154_v19  ;;  %v6656_v63 = vcombine.low %v3150_v14, %v3154_v19  ;;  %v3205_v14 = vld [vmem:[#allocation14 + $0x490] sm:$0xff] }
 0x457   :  { %5276 = vmatpush1.bf16.msra.mxu1 %v6598_v26  ;;  %v3161_v26 = vld [vmem:[#allocation14 + $0x330] sm:$0xff] }
 0x458   :  { %5399 = vmatpush1.bf16.msra.mxu0 %v6600_v27  ;;  %5277 = vmatprep.subr.bf16.mxu1 %v6607_v28  ;;  %v3158_v27 = vld [vmem:[#allocation14 + $0x318] sm:$0xff]  ;;  %v6663_v30 = vcombine.high %v3157_v25, %v3161_v26  ;;  %v3209_v19 = vld [vmem:[#allocation14 + $0x4b0] sm:$0xff] }
 0x459   :  { %5400 = vmatprep.subr.bf16.mxu0 %v6609_v29  ;;  %v3162_v28 = vld [vmem:[#allocation14 + $0x338] sm:$0xff]  ;;  %v6654_v29 = vcombine.low %v3149_v13, %v3153_v22 }
 0x45a   :  { %v6665_v6 = vcombine.high %v3158_v27, %v3162_v28  ;;  %v6664_v37 = vcombine.low %v3158_v27, %v3162_v28  ;;  %v3213_v28 = vld [vmem:[#allocation14 + $0x4d0] sm:$0xff] }
 0x45b   :  { %5278 = vmatpush1.bf16.msra.mxu1 %v6606_v11  ;;  %v3169_v11 = vld [vmem:[#allocation14 + $0x370] sm:$0xff] }
 0x45c   :  { %5401 = vmatpush1.bf16.msra.mxu0 %v6608_v33  ;;  %5279 = vmatprep.subr.bf16.mxu1 %v6615_v35  ;;  %v3166_v33 = vld [vmem:[#allocation14 + $0x358] sm:$0xff]  ;;  %v6671_v34 = vcombine.high %v3165_v32, %v3169_v11 }
 0x45d   :  { %5402 = vmatprep.subr.bf16.mxu0 %v6617_v36  ;;  %v3170_v35 = vld [vmem:[#allocation14 + $0x378] sm:$0xff]  ;;  %v6662_v36 = vcombine.low %v3157_v25, %v3161_v26  ;;  %v6711_v26 = vcombine.high %v3205_v14, %v3209_v19 }
 0x45e   :  { %v6673_v42 = vcombine.high %v3166_v33, %v3170_v35  ;;  %v6672_v56 = vcombine.low %v3166_v33, %v3170_v35  ;;  %v3221_v33 = vld [vmem:[#allocation14 + $0x510] sm:$0xff] }
 0x45f   :  { %5280 = vmatpush1.bf16.msra.mxu1 %v6614_v47  ;;  %v3177_v47 = vld [vmem:[#allocation14 + $0x3b0] sm:$0xff] }
 0x460   :  { %5403 = vmatpush1.bf16.msra.mxu0 %v6616_v10  ;;  %5281 = vmatprep.subr.bf16.mxu1 %v6623_v53  ;;  %v3174_v10 = vld [vmem:[#allocation14 + $0x398] sm:$0xff]  ;;  %v6679_v57 = vcombine.high %v3173_v46, %v3177_v47  ;;  %v3225_v35 = vld [vmem:[#allocation14 + $0x530] sm:$0xff] }
 0x461   :  { %5404 = vmatprep.subr.bf16.mxu0 %v6625_v54  ;;  %v3178_v53 = vld [vmem:[#allocation14 + $0x3b8] sm:$0xff]  ;;  %v6670_v54 = vcombine.low %v3165_v32, %v3169_v11 }
 0x462   :  { %v6681_v59 = vcombine.high %v3174_v10, %v3178_v53  ;;  %v6680_v2 = vcombine.low %v3174_v10, %v3178_v53  ;;  %v3233_v10 = vld [vmem:[#allocation14 + $0x570] sm:$0xff]  ;;  %v3230_v53 = vld [vmem:[#allocation14 + $0x558] sm:$0xff] }
 0x463   :  { %5282 = vmatpush1.bf16.msra.mxu1 %v6622_v61  ;;  %v3185_v61 = vld [vmem:[#allocation14 + $0x3f0] sm:$0xff] }
 0x464   :  { %5405 = vmatpush1.bf16.msra.mxu0 %v6624_v62  ;;  %5283 = vmatprep.subr.bf16.mxu1 %v6631_v21  ;;  %v3182_v62 = vld [vmem:[#allocation14 + $0x3d8] sm:$0xff]  ;;  %v6687_v3 = vcombine.high %v3181_v16, %v3185_v61 }
 0x465   :  { %5406 = vmatprep.subr.bf16.mxu0 %v6633_v1  ;;  %v3186_v21 = vld [vmem:[#allocation14 + $0x3f8] sm:$0xff]  ;;  %v6678_v1 = vcombine.low %v3173_v46, %v3177_v47  ;;  %v3229_v47 = vld [vmem:[#allocation14 + $0x550] sm:$0xff] }
 0x466   :  { %v6689_v38 = vcombine.high %v3182_v62, %v3186_v21  ;;  %v6688_v48 = vcombine.low %v3182_v62, %v3186_v21  ;;  %v3241_v62 = vld [vmem:[#allocation14 + $0x5b0] sm:$0xff]  ;;  %v3238_v21 = vld [vmem:[#allocation14 + $0x598] sm:$0xff] }
 0x467   :  { %5284 = vmatpush1.bf16.msra.mxu1 %v6630_v39  ;;  %v3193_v39 = vld [vmem:[#allocation14 + $0x430] sm:$0xff] }
 0x468   :  { %5407 = vmatpush1.bf16.msra.mxu0 %v6632_v40  ;;  %5285 = vmatprep.subr.bf16.mxu1 %v6639_v41  ;;  %v3190_v40 = vld [vmem:[#allocation14 + $0x418] sm:$0xff]  ;;  %v6695_v49 = vcombine.high %v3189_v4, %v3193_v39 }
 0x469   :  { %5408 = vmatprep.subr.bf16.mxu0 %v6641_v43  ;;  %v3194_v41 = vld [vmem:[#allocation14 + $0x438] sm:$0xff]  ;;  %v6686_v43 = vcombine.low %v3181_v16, %v3185_v61  ;;  %v3237_v61 = vld [vmem:[#allocation14 + $0x590] sm:$0xff] }
 0x46a   :  { %v6697_v5 = vcombine.high %v3190_v40, %v3194_v41  ;;  %v6696_v13 = vcombine.low %v3190_v40, %v3194_v41  ;;  %v3249_v40 = vld [vmem:[#allocation14 + $0x5f0] sm:$0xff]  ;;  %v3246_v41 = vld [vmem:[#allocation14 + $0x5d8] sm:$0xff] }
 0x46b   :  { %5286 = vmatpush1.bf16.msra.mxu1 %v6638_v8  ;;  %v3201_v8 = vld [vmem:[#allocation14 + $0x470] sm:$0xff] }
 0x46c   :  { %5409 = vmatpush1.bf16.msra.mxu0 %v6640_v9  ;;  %5287 = vmatprep.subr.bf16.mxu1 %v6647_v12  ;;  %v6694_v9 = vcombine.low %v3189_v4, %v3193_v39  ;;  %v3198_v12 = vld [vmem:[#allocation14 + $0x458] sm:$0xff]  ;;  %v6703_v22 = vcombine.high %v3197_v7, %v3201_v8  ;;  %v3245_v39 = vld [vmem:[#allocation14 + $0x5d0] sm:$0xff] }
 0x46d   :  { %5410 = vmatprep.subr.bf16.mxu0 %v6649_v50  ;;  %v3202_v50 = vld [vmem:[#allocation14 + $0x478] sm:$0xff] }
 0x46e   :  { %v6704_v25 = vcombine.low %v3198_v12, %v3202_v50 }
 0x46f   :  { %5288 = vmatpush1.bf16.msra.mxu1 %v6646_v20  ;;  %v6705_v20 = vcombine.high %v3198_v12, %v3202_v50  ;;  %v3254_v12 = vld [vmem:[#allocation14 + $0x618] sm:$0xff] }
 0x470   :  { %5411 = vmatpush1.bf16.msra.mxu0 %v6648_v55  ;;  %5289 = vmatprep.subr.bf16.mxu1 %v6655_v23  ;;  %v3206_v55 = vld [vmem:[#allocation14 + $0x498] sm:$0xff] }
 0x471   :  { %5412 = vmatprep.subr.bf16.mxu0 %v6657_v24  ;;  %v3210_v23 = vld [vmem:[#allocation14 + $0x4b8] sm:$0xff]  ;;  %v6702_v24 = vcombine.low %v3197_v7, %v3201_v8  ;;  %v3253_v8 = vld [vmem:[#allocation14 + $0x610] sm:$0xff] }
 0x472   :  { %v6713_v27 = vcombine.high %v3206_v55, %v3210_v23  ;;  %v3258_v50 = vld [vmem:[#allocation14 + $0x638] sm:$0xff] }
 0x473   :  { %5290 = vmatpush1.bf16.msra.mxu1 %v6654_v29  ;;  %v3217_v29 = vld [vmem:[#allocation14 + $0x4f0] sm:$0xff] }
 0x474   :  { %5413 = vmatpush1.bf16.msra.mxu0 %v6656_v63  ;;  %5291 = vmatprep.subr.bf16.mxu1 %v6663_v30  ;;  %v3214_v63 = vld [vmem:[#allocation14 + $0x4d8] sm:$0xff]  ;;  %v6719_v32 = vcombine.high %v3213_v28, %v3217_v29 }
 0x475   :  { %5414 = vmatprep.subr.bf16.mxu0 %v6665_v6  ;;  %v3218_v30 = vld [vmem:[#allocation14 + $0x4f8] sm:$0xff]  ;;  %v6710_v6 = vcombine.low %v3205_v14, %v3209_v19  ;;  %v6761_v19 = vcombine.high %v3254_v12, %v3258_v50 }
 0x476   :  { %v6721_v11 = vcombine.high %v3214_v63, %v3218_v30 }
 0x477   :  { %5292 = vmatpush1.bf16.msra.mxu1 %v6662_v36  ;;  %v3222_v36 = vld [vmem:[#allocation14 + $0x518] sm:$0xff] }
 0x478   :  { %5415 = vmatpush1.bf16.msra.mxu0 %v6664_v37  ;;  %5293 = vmatprep.subr.bf16.mxu1 %v6671_v34  ;;  %v3226_v37 = vld [vmem:[#allocation14 + $0x538] sm:$0xff]  ;;  %v6720_v34 = vcombine.low %v3214_v63, %v3218_v30  ;;  %v3273_v63 = vld [vmem:[#allocation14 + $0x6b0] sm:$0xff] }
 0x479   :  { %5416 = vmatprep.subr.bf16.mxu0 %v6673_v42  ;;  %v6727_v42 = vcombine.high %v3221_v33, %v3225_v35  ;;  %v6729_v46 = vcombine.high %v3222_v36, %v3226_v37  ;;  %v3270_v30 = vld [vmem:[#allocation14 + $0x698] sm:$0xff] }
 0x47b   :  { %5294 = vmatpush1.bf16.msra.mxu1 %v6670_v54  ;;  %v3234_v54 = vld [vmem:[#allocation14 + $0x578] sm:$0xff] }
 0x47c   :  { %5417 = vmatpush1.bf16.msra.mxu0 %v6672_v56  ;;  %5295 = vmatprep.subr.bf16.mxu1 %v6679_v57  ;;  %v6726_v56 = vcombine.low %v3221_v33, %v3225_v35  ;;  %v6728_v57 = vcombine.low %v3222_v36, %v3226_v37  ;;  %v6737_v16 = vcombine.high %v3230_v53, %v3234_v54  ;;  %v3277_v35 = vld [vmem:[#allocation14 + $0x6d0] sm:$0xff]  ;;  %v3278_v37 = vld [vmem:[#allocation14 + $0x6d8] sm:$0xff] }
 0x47d   :  { %5418 = vmatprep.subr.bf16.mxu0 %v6681_v59  ;;  %v6735_v59 = vcombine.high %v3229_v47, %v3233_v10  ;;  %v3281_v36 = vld [vmem:[#allocation14 + $0x6f0] sm:$0xff] }
 0x47f   :  { %5296 = vmatpush1.bf16.msra.mxu1 %v6678_v1  ;;  %v3242_v1 = vld [vmem:[#allocation14 + $0x5b8] sm:$0xff] }
 0x480   :  { %5419 = vmatpush1.bf16.msra.mxu0 %v6680_v2  ;;  %5297 = vmatprep.subr.bf16.mxu1 %v6687_v3  ;;  %v6734_v2 = vcombine.low %v3229_v47, %v3233_v10  ;;  %v6736_v3 = vcombine.low %v3230_v53, %v3234_v54  ;;  %v6745_v4 = vcombine.high %v3238_v21, %v3242_v1  ;;  %v3285_v10 = vld [vmem:[#allocation14 + $0x710] sm:$0xff]  ;;  %v3286_v54 = vld [vmem:[#allocation14 + $0x718] sm:$0xff] }
 0x481   :  { %5420 = vmatprep.subr.bf16.mxu0 %v6689_v38  ;;  %v6743_v38 = vcombine.high %v3237_v61, %v3241_v62  ;;  %v3289_v53 = vld [vmem:[#allocation14 + $0x730] sm:$0xff] }
 0x483   :  { %5298 = vmatpush1.bf16.msra.mxu1 %v6686_v43  ;;  %v3250_v43 = vld [vmem:[#allocation14 + $0x5f8] sm:$0xff] }
 0x484   :  { %5421 = vmatpush1.bf16.msra.mxu0 %v6688_v48  ;;  %5308 = vmatprep.subr.bf16.mxu1 %v6695_v49  ;;  %v6742_v48 = vcombine.low %v3237_v61, %v3241_v62  ;;  %v6744_v49 = vcombine.low %v3238_v21, %v3242_v1  ;;  %v6753_v7 = vcombine.high %v3246_v41, %v3250_v43  ;;  %v3293_v62 = vld [vmem:[#allocation14 + $0x750] sm:$0xff]  ;;  %v3294_v1 = vld [vmem:[#allocation14 + $0x758] sm:$0xff] }
 0x485   :  { %5431 = vmatprep.subr.bf16.mxu0 %v6697_v5  ;;  %v6751_v5 = vcombine.high %v3245_v39, %v3249_v40  ;;  %v3297_v21 = vld [vmem:[#allocation14 + $0x770] sm:$0xff] }
 0x486   :  { %5300 = vmatmul.mubr.bf16.vlgmr.msra.gmra.mrb[28].mxu1 %v8431_v52 }
 0x487   :  { %5423 = vmatmul.mubr.bf16.vlgmr.msra.gmra.mrb[24].mxu0 %v8431_v52  ;;  %5309 = vmatpush1.bf16.msra.mxu1 %v6694_v9  ;;  %v6712_v52 = vcombine.low %v3206_v55, %v3210_v23  ;;  %v3257_v9 = vld [vmem:[#allocation14 + $0x630] sm:$0xff]  ;;  %v3262_v23 = vld [vmem:[#allocation14 + $0x658] sm:$0xff] }
 0x488   :  { %5340 = vmatprep.mubr.bf16.mxu1 %v8435_v60  ;;  %5432 = vmatpush1.bf16.msra.mxu0 %v6696_v13  ;;  %v6750_v13 = vcombine.low %v3245_v39, %v3249_v40  ;;  %v6759_v14 = vcombine.high %v3253_v8, %v3257_v9  ;;  %v3265_v55 = vld [vmem:[#allocation14 + $0x670] sm:$0xff] }
 0x489   :  { %5463 = vmatprep.mubr.bf16.mxu0 %v8435_v60  ;;  %5310 = vmatprep.subr.bf16.mxu1 %v6703_v22  ;;  %v6718_v60 = vcombine.low %v3213_v28, %v3217_v29  ;;  %v6752_v22 = vcombine.low %v3246_v41, %v3250_v43  ;;  %v3269_v29 = vld [vmem:[#allocation14 + $0x690] sm:$0xff]  ;;  %v3302_v43 = vld [vmem:[#allocation14 + $0x798] sm:$0xff] }
 0x48a   :  { %5433 = vmatprep.subr.bf16.mxu0 %v6705_v20  ;;  %v3261_v20 = vld [vmem:[#allocation14 + $0x650] sm:$0xff] }
 0x48b   :  { %5311 = vmatpush1.bf16.msra.mxu1 %v6702_v24  ;;  %v3266_v24 = vld [vmem:[#allocation14 + $0x678] sm:$0xff]  ;;  %v3301_v40 = vld [vmem:[#allocation14 + $0x790] sm:$0xff] }
 0x48c   :  { %5434 = vmatpush1.bf16.msra.mxu0 %v6704_v25  ;;  %5312 = vmatprep.subr.bf16.mxu1 %v6711_v26  ;;  %v6758_v25 = vcombine.low %v3253_v8, %v3257_v9  ;;  %v6760_v26 = vcombine.low %v3254_v12, %v3258_v50  ;;  %v6769_v28 = vcombine.high %v3262_v23, %v3266_v24  ;;  %v3305_v41 = vld [vmem:[#allocation14 + $0x7b0] sm:$0xff]  ;;  %v3310_v50 = vld [vmem:[#allocation14 + $0x7d8] sm:$0xff] }
 0x48d   :  { %5435 = vmatprep.subr.bf16.mxu0 %v6713_v27  ;;  %v6767_v27 = vcombine.high %v3261_v20, %v3265_v55  ;;  %v3309_v9 = vld [vmem:[#allocation14 + $0x7d0] sm:$0xff] }
 0x48e   :  { %v3313_v12 = vld [vmem:[#allocation14 + $0x7f0] sm:$0xff] }
 0x48f   :  { %5313 = vmatpush1.bf16.msra.mxu1 %v6710_v6  ;;  %v3274_v6 = vld [vmem:[#allocation14 + $0x6b8] sm:$0xff] }
 0x490   :  { %5436 = vmatpush1.bf16.msra.mxu0 %v6712_v52  ;;  %5314 = vmatprep.subr.bf16.mxu1 %v6719_v32  ;;  %v6766_v52 = vcombine.low %v3261_v20, %v3265_v55  ;;  %v6768_v32 = vcombine.low %v3262_v23, %v3266_v24  ;;  %v6777_v33 = vcombine.high %v3270_v30, %v3274_v6  ;;  %v3317_v55 = vld [vmem:[#allocation14 + $0x810] sm:$0xff]  ;;  %v3318_v24 = vld [vmem:[#allocation14 + $0x818] sm:$0xff] }
 0x491   :  { %5437 = vmatprep.subr.bf16.mxu0 %v6721_v11  ;;  %v6775_v11 = vcombine.high %v3269_v29, %v3273_v63  ;;  %v3321_v23 = vld [vmem:[#allocation14 + $0x830] sm:$0xff] }
 0x493   :  { %5315 = vmatpush1.bf16.msra.mxu1 %v6718_v60  ;;  %v3282_v60 = vld [vmem:[#allocation14 + $0x6f8] sm:$0xff] }
 0x494   :  { %5438 = vmatpush1.bf16.msra.mxu0 %v6720_v34  ;;  %5316 = vmatprep.subr.bf16.mxu1 %v6727_v42  ;;  %v6774_v34 = vcombine.low %v3269_v29, %v3273_v63  ;;  %v6776_v42 = vcombine.low %v3270_v30, %v3274_v6  ;;  %v6785_v47 = vcombine.high %v3278_v37, %v3282_v60  ;;  %v3325_v63 = vld [vmem:[#allocation14 + $0x850] sm:$0xff]  ;;  %v3326_v6 = vld [vmem:[#allocation14 + $0x858] sm:$0xff] }
 0x495   :  { %5439 = vmatprep.subr.bf16.mxu0 %v6729_v46  ;;  %v6783_v46 = vcombine.high %v3277_v35, %v3281_v36  ;;  %v3329_v30 = vld [vmem:[#allocation14 + $0x870] sm:$0xff] }
 0x497   :  { %5317 = vmatpush1.bf16.msra.mxu1 %v6726_v56  ;;  %v3290_v56 = vld [vmem:[#allocation14 + $0x738] sm:$0xff] }
 0x498   :  { %5440 = vmatpush1.bf16.msra.mxu0 %v6728_v57  ;;  %5318 = vmatprep.subr.bf16.mxu1 %v6735_v59  ;;  %v6782_v57 = vcombine.low %v3277_v35, %v3281_v36  ;;  %v6784_v59 = vcombine.low %v3278_v37, %v3282_v60  ;;  %v6793_v61 = vcombine.high %v3286_v54, %v3290_v56  ;;  %v3333_v36 = vld [vmem:[#allocation14 + $0x890] sm:$0xff]  ;;  %v3334_v60 = vld [vmem:[#allocation14 + $0x898] sm:$0xff] }
 0x499   :  { %5441 = vmatprep.subr.bf16.mxu0 %v6737_v16  ;;  %v6791_v16 = vcombine.high %v3285_v10, %v3289_v53  ;;  %v3337_v37 = vld [vmem:[#allocation14 + $0x8b0] sm:$0xff] }
 0x49b   :  { %5319 = vmatpush1.bf16.msra.mxu1 %v6734_v2  ;;  %v3298_v2 = vld [vmem:[#allocation14 + $0x778] sm:$0xff] }
 0x49c   :  { %5442 = vmatpush1.bf16.msra.mxu0 %v6736_v3  ;;  %5320 = vmatprep.subr.bf16.mxu1 %v6743_v38  ;;  %v6790_v3 = vcombine.low %v3285_v10, %v3289_v53  ;;  %v6792_v38 = vcombine.low %v3286_v54, %v3290_v56  ;;  %v6801_v39 = vcombine.high %v3294_v1, %v3298_v2  ;;  %v3341_v53 = vld [vmem:[#allocation14 + $0x8d0] sm:$0xff]  ;;  %v3342_v56 = vld [vmem:[#allocation14 + $0x8d8] sm:$0xff] }
 0x49d   :  { %5443 = vmatprep.subr.bf16.mxu0 %v6745_v4  ;;  %v6799_v4 = vcombine.high %v3293_v62, %v3297_v21  ;;  %v3345_v54 = vld [vmem:[#allocation14 + $0x8f0] sm:$0xff] }
 0x49f   :  { %5321 = vmatpush1.bf16.msra.mxu1 %v6742_v48  ;;  %v3306_v48 = vld [vmem:[#allocation14 + $0x7b8] sm:$0xff] }
 0x4a0   :  { %5444 = vmatpush1.bf16.msra.mxu0 %v6744_v49  ;;  %5322 = vmatprep.subr.bf16.mxu1 %v6751_v5  ;;  %v6798_v49 = vcombine.low %v3293_v62, %v3297_v21  ;;  %v6800_v5 = vcombine.low %v3294_v1, %v3298_v2  ;;  %v6809_v8 = vcombine.high %v3302_v43, %v3306_v48  ;;  %v3349_v62 = vld [vmem:[#allocation14 + $0x910] sm:$0xff]  ;;  %v3350_v1 = vld [vmem:[#allocation14 + $0x918] sm:$0xff] }
 0x4a1   :  { %5445 = vmatprep.subr.bf16.mxu0 %v6753_v7  ;;  %v6807_v7 = vcombine.high %v3301_v40, %v3305_v41  ;;  %v3353_v21 = vld [vmem:[#allocation14 + $0x930] sm:$0xff]  ;;  %v3354_v2 = vld [vmem:[#allocation14 + $0x938] sm:$0xff] }
 0x4a3   :  { %5323 = vmatpush1.bf16.msra.mxu1 %v6750_v13  ;;  %v3314_v13 = vld [vmem:[#allocation14 + $0x7f8] sm:$0xff] }
 0x4a4   :  { %5446 = vmatpush1.bf16.msra.mxu0 %v6752_v22  ;;  %5324 = vmatprep.subr.bf16.mxu1 %v6759_v14  ;;  %v6806_v22 = vcombine.low %v3301_v40, %v3305_v41  ;;  %v6808_v14 = vcombine.low %v3302_v43, %v3306_v48  ;;  %v6817_v20 = vcombine.high %v3310_v50, %v3314_v13  ;;  %v3361_v40 = vld [vmem:[#allocation14 + $0x970] sm:$0xff]  ;;  %v3358_v41 = vld [vmem:[#allocation14 + $0x958] sm:$0xff] }
 0x4a5   :  { %5447 = vmatprep.subr.bf16.mxu0 %v6761_v19  ;;  %v6815_v19 = vcombine.high %v3309_v9, %v3313_v12  ;;  %v3362_v43 = vld [vmem:[#allocation14 + $0x978] sm:$0xff]  ;;  %v6854_v48 = vcombine.low %v3349_v62, %v3353_v21 }
 0x4a7   :  { %5325 = vmatpush1.bf16.msra.mxu1 %v6758_v25  ;;  %v3322_v25 = vld [vmem:[#allocation14 + $0x838] sm:$0xff] }
 0x4a8   :  { %5448 = vmatpush1.bf16.msra.mxu0 %v6760_v26  ;;  %5326 = vmatprep.subr.bf16.mxu1 %v6767_v27  ;;  %v6814_v26 = vcombine.low %v3309_v9, %v3313_v12  ;;  %v6816_v27 = vcombine.low %v3310_v50, %v3314_v13  ;;  %v6825_v29 = vcombine.high %v3318_v24, %v3322_v25  ;;  %v3369_v9 = vld [vmem:[#allocation14 + $0x9b0] sm:$0xff]  ;;  %v3366_v12 = vld [vmem:[#allocation14 + $0x998] sm:$0xff] }
 0x4a9   :  { %5449 = vmatprep.subr.bf16.mxu0 %v6769_v28  ;;  %v6823_v28 = vcombine.high %v3317_v55, %v3321_v23  ;;  %v3370_v50 = vld [vmem:[#allocation14 + $0x9b8] sm:$0xff] }
 0x4ab   :  { %5327 = vmatpush1.bf16.msra.mxu1 %v6766_v52  ;;  %v3330_v52 = vld [vmem:[#allocation14 + $0x878] sm:$0xff] }
 0x4ac   :  { %5450 = vmatpush1.bf16.msra.mxu0 %v6768_v32  ;;  %5328 = vmatprep.subr.bf16.mxu1 %v6775_v11  ;;  %v6822_v32 = vcombine.low %v3317_v55, %v3321_v23  ;;  %v6824_v11 = vcombine.low %v3318_v24, %v3322_v25  ;;  %v6833_v35 = vcombine.high %v3326_v6, %v3330_v52  ;;  %v3377_v55 = vld [vmem:[#allocation14 + $0x9f0] sm:$0xff]  ;;  %v3374_v23 = vld [vmem:[#allocation14 + $0x9d8] sm:$0xff] }
 0x4ad   :  { %5451 = vmatprep.subr.bf16.mxu0 %v6777_v33  ;;  %v6831_v33 = vcombine.high %v3325_v63, %v3329_v30  ;;  %v3378_v24 = vld [vmem:[#allocation14 + $0x9f8] sm:$0xff] }
 0x4af   :  { %5329 = vmatpush1.bf16.msra.mxu1 %v6774_v34  ;;  %v3338_v34 = vld [vmem:[#allocation14 + $0x8b8] sm:$0xff] }
 0x4b0   :  { %5452 = vmatpush1.bf16.msra.mxu0 %v6776_v42  ;;  %5330 = vmatprep.subr.bf16.mxu1 %v6783_v46  ;;  %v6830_v42 = vcombine.low %v3325_v63, %v3329_v30  ;;  %v6832_v46 = vcombine.low %v3326_v6, %v3330_v52  ;;  %v6841_v10 = vcombine.high %v3334_v60, %v3338_v34  ;;  %v7721_v30 = vld [vmem:[#allocation17 + $0x40] sm:$0xff]  }
 0x4b1   :  { %5453 = vmatprep.subr.bf16.mxu0 %v6785_v47  ;;  %v6839_v47 = vcombine.high %v3333_v36, %v3337_v37  ;;  %v6880_v63 = vcombine.low %v3374_v23, %v3378_v24  ;;  %v7722_v6 = vld [vmem:[#allocation17 + $0xc0] sm:$0xff]  }
 0x4b2   :  { %v7723_v52 = vld [vmem:[#allocation17] sm:$0xff]  }
 0x4b3   :  { %5331 = vmatpush1.bf16.msra.mxu1 %v6782_v57  ;;  %v3346_v57 = vld [vmem:[#allocation14 + $0x8f8] sm:$0xff] }
 0x4b4   :  { %5454 = vmatpush1.bf16.msra.mxu0 %v6784_v59  ;;  %5332 = vmatprep.subr.bf16.mxu1 %v6791_v16  ;;  %v6838_v59 = vcombine.low %v3333_v36, %v3337_v37  ;;  %v6847_v16 = vcombine.high %v3341_v53, %v3345_v54  ;;  %v7728_v36 = vld [vmem:[#allocation17 + $0x88] sm:$0xff]   ;;  %v7729_v37 = vld [vmem:[#allocation17 + $0x50] sm:$0xff]  }
 0x4b5   :  { %5455 = vmatprep.subr.bf16.mxu0 %v6793_v61  ;;  %v6849_v61 = vcombine.high %v3342_v56, %v3346_v57 }
 0x4b7   :  { %5333 = vmatpush1.bf16.msra.mxu1 %v6790_v3  ;;  %v6846_v3 = vcombine.low %v3341_v53, %v3345_v54  ;;  %v7737_v53 = vld [vmem:[#allocation17 + $0x60] sm:$0xff]  }
 0x4b8   :  { %5456 = vmatpush1.bf16.msra.mxu0 %v6792_v38  ;;  %5334 = vmatprep.subr.bf16.mxu1 %v6799_v4  ;;  %v6848_v38 = vcombine.low %v3342_v56, %v3346_v57  ;;  %v6855_v4 = vcombine.high %v3349_v62, %v3353_v21  ;;  %v7738_v54 = vld [vmem:[#allocation17 + $0xe0] sm:$0xff]   ;;  %v7745_v62 = vld [vmem:[#allocation17 + $0x70] sm:$0xff]  }
 0x4b9   :  { %5457 = vmatprep.subr.bf16.mxu0 %v6801_v39  ;;  %v3357_v39 = vld [vmem:[#allocation14 + $0x950] sm:$0xff]  ;;  %v7739_v56 = vld [vmem:[#allocation17 + $0x20] sm:$0xff]   ;;  %v7746_v21 = vld [vmem:[#allocation17 + $0xf0] sm:$0xff]  }
 0x4ba   :  { %v6862_v13 = vcombine.low %v3357_v39, %v3361_v40  ;;  %v7740_v57 = vld [vmem:[#allocation17 + $0xa0] sm:$0xff]  }
 0x4bb   :  { %5335 = vmatpush1.bf16.msra.mxu1 %v6798_v49  ;;  %v6856_v49 = vcombine.low %v3350_v1, %v3354_v2 }
 0x4bc   :  { %5458 = vmatpush1.bf16.msra.mxu0 %v6800_v5  ;;  %5336 = vmatprep.subr.bf16.mxu1 %v6807_v7  ;;  %v6863_v5 = vcombine.high %v3357_v39, %v3361_v40  ;;  %v6865_v7 = vcombine.high %v3358_v41, %v3362_v43  ;;  %v7753_v39 = vld [vmem:[#allocation17 + $0x140] sm:$0xff]  }
 0x4bd   :  { %5459 = vmatprep.subr.bf16.mxu0 %v6809_v8  ;;  %v3365_v8 = vld [vmem:[#allocation14 + $0x990] sm:$0xff]  ;;  %v7754_v40 = vld [vmem:[#allocation17 + $0x1c0] sm:$0xff]  }
 0x4be   :  { %v6870_v25 = vcombine.low %v3365_v8, %v3369_v9 }
 0x4bf   :  { %5337 = vmatpush1.bf16.msra.mxu1 %v6806_v22  ;;  %v6864_v22 = vcombine.low %v3358_v41, %v3362_v43  ;;  %v8480_v41 = vld [vmem:[#allocation16] sm:$0xff] }
 0x4c0   :  { %5460 = vmatpush1.bf16.msra.mxu0 %v6808_v14  ;;  %5338 = vmatprep.subr.bf16.mxu1 %v6815_v19  ;;  %v6871_v14 = vcombine.high %v3365_v8, %v3369_v9  ;;  %v6873_v19 = vcombine.high %v3366_v12, %v3370_v50  ;;  %v3384_v43 = vrot.slane %v8480_v41, %v8301_v17 }
 0x4c1   :  { %5461 = vmatprep.subr.bf16.mxu0 %v6817_v20  ;;  %v3373_v20 = vld [vmem:[#allocation14 + $0x9d0] sm:$0xff] }
 0x4c3   :  { %5339 = vmatpush1.bf16.msra.mxu1 %v6814_v26  ;;  %v6872_v26 = vcombine.low %v3366_v12, %v3370_v50 }
 0x4c4   :  { %5462 = vmatpush1.bf16.msra.mxu0 %v6816_v27  ;;  %5349 = vmatprep.subr.bf16.mxu1 %v6823_v28  ;;  %v6879_v27 = vcombine.high %v3373_v20, %v3377_v55  ;;  %v6881_v28 = vcombine.high %v3374_v23, %v3378_v24 }
 0x4c5   :  { %5472 = vmatprep.subr.bf16.mxu0 %v6825_v29  ;;  %v6878_v29 = vcombine.low %v3373_v20, %v3377_v55 }
 0x4c6   :  { %5341 = vmatmul.mubr.bf16.vlgmr.msra.gmra.mrb[28].mxu1 %v8457_v44 }
 0x4c7   :  { %5464 = vmatmul.mubr.bf16.vlgmr.msra.gmra.mrb[24].mxu0 %v8457_v44  ;;  %5350 = vmatpush1.bf16.msra.mxu1 %v6822_v32  ;;  %v6840_v44 = vcombine.low %v3334_v60, %v3338_v34  ;;  %v7724_v32 = vld [vmem:[#allocation17 + $0x80] sm:$0xff]   ;;  %v7730_v60 = vld [vmem:[#allocation17 + $0xd0] sm:$0xff]  }
 0x4c8   :  { %5473 = vmatpush1.bf16.msra.mxu0 %v6824_v11  ;;  %5351 = vmatprep.subr.bf16.mxu1 %v6831_v33  ;;  %v7725_v11 = vld [vmem:[#allocation17 + $0x48] sm:$0xff]   ;;  %v7731_v34 = vld [vmem:[#allocation17 + $0x10] sm:$0xff]  }
 0x4c9   :  { %5474 = vmatprep.subr.bf16.mxu0 %v6833_v35  ;;  %5381 = vmatprep.mubr.bf16.mxu1 %v8086_v0  ;;  %v7726_v33 = vld [vmem:[#allocation17 + $0xc8] sm:$0xff]  }
 0x4ca   :  { %5504 = vmatprep.mubr.bf16.mxu0 %v8086_v0  ;;  %v6857_v0 = vcombine.high %v3350_v1, %v3354_v2  ;;  %v7727_v35 = vld [vmem:[#allocation17 + $0x8] sm:$0xff]   ;;  %v7747_v1 = vld [vmem:[#allocation17 + $0x30] sm:$0xff]  }
 0x4cb   :  { %5352 = vmatpush1.bf16.msra.mxu1 %v6830_v42  ;;  %v7732_v42 = vld [vmem:[#allocation17 + $0x90] sm:$0xff]  }
 0x4cc   :  { %5475 = vmatpush1.bf16.msra.mxu0 %v6832_v46  ;;  %5353 = vmatprep.subr.bf16.mxu1 %v6839_v47  ;;  %v7733_v46 = vld [vmem:[#allocation17 + $0x58] sm:$0xff]   ;;  %v7748_v2 = vld [vmem:[#allocation17 + $0xb0] sm:$0xff]  }
 0x4cd   :  { %5476 = vmatprep.subr.bf16.mxu0 %v6841_v10  ;;  %v7734_v47 = vld [vmem:[#allocation17 + $0xd8] sm:$0xff]  }
 0x4ce   :  { %v7735_v10 = vld [vmem:[#allocation17 + $0x18] sm:$0xff]  }
 0x4cf   :  { %5354 = vmatpush1.bf16.msra.mxu1 %v6838_v59  ;;  %v7741_v59 = vld [vmem:[#allocation17 + $0x68] sm:$0xff]  }
 0x4d0   :  { %5477 = vmatpush1.bf16.msra.mxu0 %v6840_v44  ;;  %5355 = vmatprep.subr.bf16.mxu1 %v6847_v16  ;;  %v7742_v44 = vld [vmem:[#allocation17 + $0xe8] sm:$0xff]  }
 0x4d1   :  { %5478 = vmatprep.subr.bf16.mxu0 %v6849_v61  ;;  %v7743_v16 = vld [vmem:[#allocation17 + $0x28] sm:$0xff]  }
 0x4d2   :  { %v7744_v61 = vld [vmem:[#allocation17 + $0xa8] sm:$0xff]  }
 0x4d3   :  { %5356 = vmatpush1.bf16.msra.mxu1 %v6846_v3  ;;  %v7749_v3 = vld [vmem:[#allocation17 + $0x78] sm:$0xff]  }
 0x4d4   :  { %5479 = vmatpush1.bf16.msra.mxu0 %v6848_v38  ;;  %5357 = vmatprep.subr.bf16.mxu1 %v6855_v4  ;;  %v7750_v38 = vld [vmem:[#allocation17 + $0xf8] sm:$0xff]  }
 0x4d5   :  { %5480 = vmatprep.subr.bf16.mxu0 %v6857_v0  ;;  %v7751_v4 = vld [vmem:[#allocation17 + $0x38] sm:$0xff]  }
 0x4d6   :  { %v7752_v0 = vld [vmem:[#allocation17 + $0xb8] sm:$0xff]  }
 0x4d7   :  { %5358 = vmatpush1.bf16.msra.mxu1 %v6854_v48  ;;  %v3392_v48 = vrot.slane %v8480_v41, %v8321_v51 }
 0x4d8   :  { %5481 = vmatpush1.bf16.msra.mxu0 %v6856_v49  ;;  %5359 = vmatprep.subr.bf16.mxu1 %v6863_v5  ;;  %v3388_v49 = vrot.slane %v8480_v41, %v8304_v18  ;;  %v3396_v5 = vrot.slane %v8480_v41, %v8345_v45  ;;  %v7756_v45 = vld [vmem:[#allocation17 + $0x180] sm:$0xff]  }
 0x4d9   :  { %5482 = vmatprep.subr.bf16.mxu0 %v6865_v7 }
 0x4db   :  { %5360 = vmatpush1.bf16.msra.mxu1 %v6862_v13 }
 0x4dc   :  { %5483 = vmatpush1.bf16.msra.mxu0 %v6864_v22  ;;  %5361 = vmatprep.subr.bf16.mxu1 %v6871_v14 }
 0x4dd   :  { %5484 = vmatprep.subr.bf16.mxu0 %v6873_v19 }
 0x4df   :  { %5362 = vmatpush1.bf16.msra.mxu1 %v6870_v25 }
 0x4e0   :  { %5485 = vmatpush1.bf16.msra.mxu0 %v6872_v26  ;;  %5363 = vmatprep.subr.bf16.mxu1 %v6879_v27  ;;  %v7755_v27 = vld [vmem:[#allocation17 + $0x100] sm:$0xff]  }
 0x4e1   :  { %5486 = vmatprep.subr.bf16.mxu0 %v6881_v28 }
 0x4e3   :  { %5364 = vmatpush1.bf16.msra.mxu1 %v6878_v29 }
 0x4e4   :  { %5487 = vmatpush1.bf16.msra.mxu0 %v6880_v63  ;;  %7034 = vmatprep.subr.bf16.mxu1 %v7721_v30  ;;  %v7757_v63 = vld [vmem:[#allocation17 + $0x148] sm:$0xff]  }
 0x4e5   :  { %7056 = vmatprep.subr.bf16.mxu0 %v7722_v6  ;;  %v7758_v30 = vld [vmem:[#allocation17 + $0x1c8] sm:$0xff]  }
 0x4e6   :  { %5382 = vmatmul.mubr.bf16.vlgmr.msra.gmra.mrb[28].mxu1 %v8464_v58  ;;  %v7759_v6 = vld [vmem:[#allocation17 + $0x108] sm:$0xff]  }
 0x4e7   :  { %5505 = vmatmul.mubr.bf16.vlgmr.msra.gmra.mrb[24].mxu0 %v8464_v58  ;;  %7035 = vmatpush3.bf16.msra.mxu1 %v7723_v52  ;;  %v7736_v58 = vld [vmem:[#allocation17 + $0x98] sm:$0xff]   ;;  %v7760_v52 = vld [vmem:[#allocation17 + $0x188] sm:$0xff]  }
 0x4e8   :  { %7057 = vmatpush3.bf16.msra.mxu0 %v7724_v32  ;;  %7036 = vmatprep.subr.bf16.mxu1 %v7725_v11  ;;  %v7761_v32 = vld [vmem:[#allocation17 + $0x150] sm:$0xff]  }
 0x4e9   :  { %7058 = vmatprep.subr.bf16.mxu0 %v7726_v33  ;;  %v7762_v11 = vld [vmem:[#allocation17 + $0x1d0] sm:$0xff]  }
 0x4ea   :  { %v7763_v33 = vld [vmem:[#allocation17 + $0x110] sm:$0xff]  }
 0x4eb   :  { %7037 = vmatpush3.bf16.msra.mxu1 %v7727_v35  ;;  %v7764_v35 = vld [vmem:[#allocation17 + $0x190] sm:$0xff]  }
 0x4ec   :  { %7059 = vmatpush3.bf16.msra.mxu0 %v7728_v36  ;;  %7038 = vmatprep.subr.bf16.mxu1 %v7729_v37  ;;  %v7765_v36 = vld [vmem:[#allocation17 + $0x158] sm:$0xff]  }
 0x4ed   :  { %7060 = vmatprep.subr.bf16.mxu0 %v7730_v60  ;;  %v7766_v37 = vld [vmem:[#allocation17 + $0x1d8] sm:$0xff]  }
 0x4ee   :  { %v7767_v60 = vld [vmem:[#allocation17 + $0x118] sm:$0xff]  }
 0x4ef   :  { %7039 = vmatpush3.bf16.msra.mxu1 %v7731_v34  ;;  %v7768_v34 = vld [vmem:[#allocation17 + $0x198] sm:$0xff]  }
 0x4f0   :  { %7061 = vmatpush3.bf16.msra.mxu0 %v7732_v42  ;;  %7040 = vmatprep.subr.bf16.mxu1 %v7733_v46  ;;  %v7769_v42 = vld [vmem:[#allocation17 + $0x160] sm:$0xff]  }
 0x4f1   :  { %7062 = vmatprep.subr.bf16.mxu0 %v7734_v47  ;;  %v7770_v46 = vld [vmem:[#allocation17 + $0x1e0] sm:$0xff]  }
 0x4f2   :  { %v7771_v47 = vld [vmem:[#allocation17 + $0x120] sm:$0xff]  }
 0x4f3   :  { %7041 = vmatpush3.bf16.msra.mxu1 %v7735_v10  ;;  %v7772_v10 = vld [vmem:[#allocation17 + $0x1a0] sm:$0xff]  }
 0x4f4   :  { %7063 = vmatpush3.bf16.msra.mxu0 %v7736_v58  ;;  %7042 = vmatprep.subr.bf16.mxu1 %v7737_v53  ;;  %v7773_v58 = vld [vmem:[#allocation17 + $0x168] sm:$0xff]  }
 0x4f5   :  { %7064 = vmatprep.subr.bf16.mxu0 %v7738_v54  ;;  %v7774_v53 = vld [vmem:[#allocation17 + $0x1e8] sm:$0xff]  }
 0x4f6   :  { %v7775_v54 = vld [vmem:[#allocation17 + $0x128] sm:$0xff]  }
 0x4f7   :  { %7043 = vmatpush3.bf16.msra.mxu1 %v7739_v56  ;;  %v7776_v56 = vld [vmem:[#allocation17 + $0x1a8] sm:$0xff]  }
 0x4f8   :  { %7065 = vmatpush3.bf16.msra.mxu0 %v7740_v57  ;;  %7044 = vmatprep.subr.bf16.mxu1 %v7741_v59  ;;  %v7777_v57 = vld [vmem:[#allocation17 + $0x170] sm:$0xff]  }
 0x4f9   :  { %7066 = vmatprep.subr.bf16.mxu0 %v7742_v44  ;;  %v7778_v59 = vld [vmem:[#allocation17 + $0x1f0] sm:$0xff]  }
 0x4fa   :  { %v7779_v44 = vld [vmem:[#allocation17 + $0x130] sm:$0xff]  }
 0x4fb   :  { %7045 = vmatpush3.bf16.msra.mxu1 %v7743_v16  ;;  %v7780_v16 = vld [vmem:[#allocation17 + $0x1b0] sm:$0xff]  }
 0x4fc   :  { %7067 = vmatpush3.bf16.msra.mxu0 %v7744_v61  ;;  %7046 = vmatprep.subr.bf16.mxu1 %v7745_v62  ;;  %v7781_v61 = vld [vmem:[#allocation17 + $0x178] sm:$0xff]  }
 0x4fd   :  { %7068 = vmatprep.subr.bf16.mxu0 %v7746_v21  ;;  %v7782_v62 = vld [vmem:[#allocation17 + $0x1f8] sm:$0xff]  }
 0x4fe   :  { %v7783_v21 = vld [vmem:[#allocation17 + $0x138] sm:$0xff]  }
 0x4ff   :  { %7047 = vmatpush3.bf16.msra.mxu1 %v7747_v1  ;;  %v7784_v1 = vld [vmem:[#allocation17 + $0x1b8] sm:$0xff]  }
 0x500   :  { %7069 = vmatpush3.bf16.msra.mxu0 %v7748_v2  ;;  %7048 = vmatprep.subr.bf16.mxu1 %v7749_v3  ;;  %v3407_v2 = vsub.s32 6, %v8296_v15  ;;  %v3403_v3 = vsub.s32 5, %v8296_v15 }
 0x501   :  { %7070 = vmatprep.subr.bf16.mxu0 %v7750_v38  ;;  %v3411_v38 = vsub.s32 7, %v8296_v15 }
 0x503   :  { %7049 = vmatpush3.bf16.msra.mxu1 %v7751_v4  ;;  %v3400_v4 = vrot.slane %v8480_v41, %v8368_v31 }
 0x504   :  { %7071 = vmatpush3.bf16.msra.mxu0 %v7752_v0  ;;  %7078 = vmatprep.subr.bf16.mxu1 %v7753_v39  ;;  %v3408_v0 = vrot.slane %v8480_v41, %v3407_v2  ;;  %v3404_v39 = vrot.slane %v8480_v41, %v3403_v3 }
 0x505   :  { %7100 = vmatprep.subr.bf16.mxu0 %v7754_v40  ;;  %v3412_v40 = vrot.slane %v8480_v41, %v3411_v38 }
 0x519   :  { %v5137_v7 = vpop.f32.mrb[24].mxu1  ;;  %v5260_v8 = vpop.f32.mrb[20].mxu0 }
 0x51a   :  { %v7178_v9 = vadd.f32 %v5137_v7, %v3384_v43  ;;  %v7180_v12 = vadd.f32 %v5260_v8, %v3392_v48  ;;  %v5139_v50 = vpop.f32.mrb[25].mxu1  ;;  %v5262_v13 = vpop.f32.mrb[21].mxu0 }
 0x51b   :  { %v7179_v22 = vadd.f32 %v5139_v50, %v3388_v49  ;;  %v7181_v14 = vadd.f32 %v5262_v13, %v3396_v5  ;;  %v5141_v19 = vpop.f32.mrb[26].mxu1  ;;  %v5264_v20 = vpop.f32.mrb[22].mxu0 }
 0x51c   :  { %v5513_v17 = vmax.f32 %v7178_v9, 0.0  ;;  %v5515_v55 = vmax.f32 %v7180_v12, 0.0  ;;  %v5142_v23 = vpop.f32.mrb[27].mxu1  ;;  %v5265_v51 = vpop.f32.mrb[23].mxu0 }
 0x51d   :  { %v5514_v24 = vmax.f32 %v7179_v22, 0.0  ;;  %v5516_v25 = vmax.f32 %v7181_v14, 0.0 }
 0x51e   :  { %v5521_v28 = vpack.c.bf16 %v5513_v17, %v5513_v17  ;;  %v5523_v29 = vpack.c.bf16 %v5515_v55, %v5515_v55 }
 0x51f   :  { %v5522_v18 = vpack.c.bf16 %v5514_v24, %v5514_v24  ;;  %v5524_v26 = vpack.c.bf16 %v5516_v25, %v5516_v25  ;;  %v6882_v25 = vld [vmem:[#allocation19] ss:$0 sm:$0xff] }
 0x521   :  { %6080 = vmatprep.mubr.bf16.mxu1 %v5522_v18  ;;  %6120 = vmatprep.mubr.bf16.mxu0 %v5524_v26 }
 0x522   :  { %6081 = vmatmul.mubr.bf16.vlgmr.msra.gmra.mrb[32].mxu1 %v5521_v28  ;;  %6121 = vmatmul.mubr.bf16.vlgmr.msra.gmra.mrb[28].mxu0 %v5523_v29 }
 0x523   :  { %7079 = vmatpush3.bf16.msra.mxu1 %v7755_v27  ;;  %7101 = vmatpush3.bf16.msra.mxu0 %v7756_v45 }
 0x524   :  { %7080 = vmatprep.subr.bf16.mxu1 %v7757_v63  ;;  %7102 = vmatprep.subr.bf16.mxu0 %v7758_v30 }
 0x527   :  { %7081 = vmatpush3.bf16.msra.mxu1 %v7759_v6  ;;  %7103 = vmatpush3.bf16.msra.mxu0 %v7760_v52 }
 0x528   :  { %7082 = vmatprep.subr.bf16.mxu1 %v7761_v32  ;;  %7104 = vmatprep.subr.bf16.mxu0 %v7762_v11 }
 0x52b   :  { %7083 = vmatpush3.bf16.msra.mxu1 %v7763_v33  ;;  %7105 = vmatpush3.bf16.msra.mxu0 %v7764_v35 }
 0x52c   :  { %7084 = vmatprep.subr.bf16.mxu1 %v7765_v36  ;;  %7106 = vmatprep.subr.bf16.mxu0 %v7766_v37 }
 0x52f   :  { %7085 = vmatpush3.bf16.msra.mxu1 %v7767_v60  ;;  %7107 = vmatpush3.bf16.msra.mxu0 %v7768_v34 }
 0x530   :  { %7086 = vmatprep.subr.bf16.mxu1 %v7769_v42  ;;  %7108 = vmatprep.subr.bf16.mxu0 %v7770_v46 }
 0x533   :  { %7087 = vmatpush3.bf16.msra.mxu1 %v7771_v47  ;;  %7109 = vmatpush3.bf16.msra.mxu0 %v7772_v10 }
 0x534   :  { %7088 = vmatprep.subr.bf16.mxu1 %v7773_v58  ;;  %7110 = vmatprep.subr.bf16.mxu0 %v7774_v53 }
 0x537   :  { %7089 = vmatpush3.bf16.msra.mxu1 %v7775_v54  ;;  %7111 = vmatpush3.bf16.msra.mxu0 %v7776_v56 }
 0x538   :  { %7090 = vmatprep.subr.bf16.mxu1 %v7777_v57  ;;  %7112 = vmatprep.subr.bf16.mxu0 %v7778_v59 }
 0x53b   :  { %7091 = vmatpush3.bf16.msra.mxu1 %v7779_v44  ;;  %7113 = vmatpush3.bf16.msra.mxu0 %v7780_v16 }
 0x53c   :  { %7092 = vmatprep.subr.bf16.mxu1 %v7781_v61  ;;  %7114 = vmatprep.subr.bf16.mxu0 %v7782_v62 }
 0x53f   :  { %7093 = vmatpush3.bf16.msra.mxu1 %v7783_v21  ;;  %7115 = vmatpush3.bf16.msra.mxu0 %v7784_v1 }
 0x5b9   :  { %v5383_v43 = vpop.f32.mrb[28].mxu1 }
 0x5ba   :  { %v7182_v48 = vadd.f32 %v5383_v43, %v3400_v4  ;;  %v5506_v49 = vpop.f32.mrb[24].mxu0  ;;  %v5385_v5 = vpop.f32.mrb[29].mxu1 }
 0x5bb   :  { %v7184_v7 = vadd.f32 %v5506_v49, %v3408_v0  ;;  %v7183_v8 = vadd.f32 %v5385_v5, %v3404_v39  ;;  %v5508_v9 = vpop.f32.mrb[25].mxu0  ;;  %v5387_v12 = vpop.f32.mrb[30].mxu1 }
 0x5bc   :  { %v5517_v50 = vmax.f32 %v7182_v48, 0.0  ;;  %v7185_v13 = vadd.f32 %v5508_v9, %v3412_v40  ;;  %v5510_v15 = vpop.f32.mrb[26].mxu0  ;;  %v5388_v22 = vpop.f32.mrb[31].mxu1 }
 0x5bd   :  { %v5519_v14 = vmax.f32 %v7184_v7, 0.0  ;;  %v5518_v31 = vmax.f32 %v7183_v8, 0.0  ;;  %v5511_v19 = vpop.f32.mrb[27].mxu0 }
 0x5be   :  { %v5520_v20 = vmax.f32 %v7185_v13, 0.0  ;;  %v5525_v55 = vpack.c.bf16 %v5517_v50, %v5517_v50 }
 0x5bf   :  { %v5526_v17 = vpack.c.bf16 %v5518_v31, %v5518_v31  ;;  %v5527_v41 = vpack.c.bf16 %v5519_v14, %v5519_v14 }
 0x5c0   :  { %v5528_v23 = vpack.c.bf16 %v5520_v20, %v5520_v20 }
 0x5c1   :  { %6160 = vmatprep.mubr.bf16.mxu1 %v5526_v17 }
 0x5c2   :  { %6200 = vmatprep.mubr.bf16.mxu0 %v5528_v23  ;;  %6161 = vmatmul.mubr.bf16.vlgmr.msra.gmra.mrb[36].mxu1 %v5525_v55 }
 0x5c3   :  { %6201 = vmatmul.mubr.bf16.vlgmr.msra.gmra.mrb[32].mxu0 %v5527_v41 }
 0x5f5   :  { %v7050_v51 = vpop.f32.mrb[32].mxu1  ;;  %v7072_v24 = vpop.f32.mrb[28].mxu0 }
 0x5f6   :  { %v7051_v18 = vpop.f32.mrb[33].mxu1  ;;  %v7073_v26 = vpop.f32.mrb[29].mxu0 }
 0x5f7   :  { %v7052_v27 = vadd.f32 %v7051_v18, %v7050_v51  ;;  %v7074_v45 = vadd.f32 %v7073_v26, %v7072_v24  ;;  %v7053_v28 = vpop.f32.mrb[34].mxu1  ;;  %v7075_v29 = vpop.f32.mrb[30].mxu0 }
 0x5f8   :  { %v7054_v63 = vpop.f32.mrb[35].mxu1  ;;  %v7076_v30 = vpop.f32.mrb[31].mxu0 }
 0x5f9   :  { %v6083_v6 = vadd.f32 %v7052_v27, %v6882_v25 }
 0x5fb   :  { %v6123_v52 = vadd.f32 %v7074_v45, %v6083_v6 }
 0x695   :  { %v7094_v32 = vpop.f32.mrb[36].mxu1 }
 0x696   :  { %v7116_v11 = vpop.f32.mrb[32].mxu0  ;;  %v7095_v33 = vpop.f32.mrb[37].mxu1 }
 0x697   :  { %v7096_v35 = vadd.f32 %v7095_v33, %v7094_v32  ;;  %v7117_v36 = vpop.f32.mrb[33].mxu0  ;;  %v7097_v37 = vpop.f32.mrb[38].mxu1 }
 0x698   :  { %v7118_v60 = vadd.f32 %v7117_v36, %v7116_v11  ;;  %v7119_v34 = vpop.f32.mrb[34].mxu0  ;;  %v7098_v42 = vpop.f32.mrb[39].mxu1 }
 0x699   :  { %v6163_v46 = vadd.f32 %v7096_v35, %v6123_v52  ;;  %v7120_v47 = vpop.f32.mrb[35].mxu0 }
 0x69b   :  { %v6203_v10 = vadd.f32 %v7118_v60, %v6163_v46 }
 0x69d   :  { %v6208_v58 = vsub.f32 0.0, %v6203_v10 }
 0x69f   :  { %v6209_v53 = vmul.f32 1.442695, %v6208_v58 }
 0x6a1   :  { %7785 = vpow2.f32 %v6209_v53 }
 0x6ab   :  { %v7786_v54 = vpop.eup %7785 }
 0x6ac   :  { %v6211_v56 = vadd.f32 1.0, %v7786_v54 }
 0x6ae   :  { %7787 = vrcp.f32 %v6211_v56 }
 0x6b8   :  { %v7788_v57 = vpop.eup %7787 }
 0x6b9   :  { %6213 = vst [vmem:[#allocation20] sm:$0xff] %v7788_v57 }
 0x6ba   :  { %8042 = shalt.err (!%p8039_p8)
}
 0x6bb   :  { %s8043_s22 = scalar_lea.hbm %s8521_s11, 128 }
 0x6bc   :  { %p8044_p9 = scmp.ne.s32.totalorder %s8521_s11, %s8043_s22  ;;  %p8047_p10 = scmp.lt.u32.totalorder %s8043_s22, %s8521_s11 }
 0x6be   :  { %p8049_p11 = pnand %p8047_p10, %p8044_p9 }
 0x6c0   :  { %8052 = shalt.err (!%p8049_p11)
}
 0x6c1   :  { %6223 = dma.vmem_to_hbm [thread:$0]  %s6221_s28, 128, %s8521_s11, [#allocation4]  }
 0x6c2   :  { %8065 = dma.done.wait [#allocation4], 128  }
 0x6c3   :  { %8066 = vsyncadd [#allocation4], 4294967168 }
 0x6c4   :  { %6227 = vsyncpa [#allocation3], 1 }
 0x6c5   :  { %6228 = vsyncpa [#allocation6], 1 }
 0x6c6   :  { %6229 = vsyncpa [#allocation9], 1 }
 0x6c7   :  { %6230 = vsyncpa [#allocation12], 1 }
 0x6c8   :  { %6231 = vsyncpa [#allocation15], 1 }
 0x6c9   :  { %6232 = vsyncpa [#allocation18], 1 }
 0x6ca   :  { %6233 = vsyncpa [#allocation4], 1 }

</bundles_post_ra>
